<compile_context>
chip_gen: v6e
topology: v6e:2x2x1
jax: 0.10.0
libtpu: 0.0.40
codegen_flags: <defaults>
</compile_context>

<pallas_src>
import jax
import jax.numpy as jnp
from jax import lax
from jax.experimental import pallas as pl
from jax.experimental.pallas import tpu as pltpu

NUM_HEADS = 4
LN_EPS = 1e-5


def _layernorm_cols(x, w, b):
    # LayerNorm over the embedding axis.  x: (E, N); w, b: (E, 1).
    mu = jnp.mean(x, axis=0, keepdims=True)
    var = jnp.mean((x - mu) ** 2, axis=0, keepdims=True)
    return (x - mu) * lax.rsqrt(var + LN_EPS) * w + b


def _gelu_exact(x):
    # Exact (erf-based) GELU, matching nn.GELU(); erf via Abramowitz & Stegun
    # 7.1.26 (|err| < 1.5e-7) so only exp / mul / where are needed to lower.
    z = x * 0.7071067811865476
    za = jnp.abs(z)
    t = 1.0 / (1.0 + 0.3275911 * za)
    poly = ((((1.061405429 * t - 1.453152027) * t + 1.421413741) * t
             - 0.284496736) * t + 0.254829592) * t
    erf_abs = 1.0 - poly * jnp.exp(-za * za)
    erf = jnp.where(z >= 0.0, erf_abs, -erf_abs)
    return 0.5 * x * (1.0 + erf)


def self_attention_kernel(
    x_ref,                      # (E, N)  one batch element: channels (sublanes) x tokens (lanes)
    ln_w_ref, ln_b_ref,         # (E, 1)            -- self.ln
    w_in_ref, b_in_ref,         # (3E, E) bf16, (3E, 1) f32 -- mha in_proj (rows [q|k|v])
    w_out_ref, b_out_ref,       # (E, E) bf16, (E, 1) f32   -- mha out_proj
    ln2_w_ref, ln2_b_ref,       # (E, 1)            -- ff_self LayerNorm
    w1_ref, b1_ref,             # (E, E) bf16, (E, 1)       -- ff_self Linear 1
    w2_ref, b2_ref,             # (E, E) bf16, (E, 1)       -- ff_self Linear 2
    out_ref,                    # (E, N)  lane-dense transposed output
):
    e, n = x_ref.shape
    d = e // NUM_HEADS

    x = x_ref[...].astype(jnp.float32)                   # (E, N)

    # x_ln = self.ln(x)
    x_ln = _layernorm_cols(x, ln_w_ref[...], ln_b_ref[...])

    # Fused QKV projection (transposed): in_proj_weight (3E, E) @ x_ln^T (E, N).
    qkv = jnp.dot(w_in_ref[...], x_ln.astype(jnp.bfloat16),
                  preferred_element_type=jnp.float32) + b_in_ref[...]      # (3E, N)
    scale = 1.0 / float(d) ** 0.5
    q = qkv[:e] * scale                                   # scale hoisted out of the head loop
    k = qkv[e:2 * e]
    v = qkv[2 * e:]

    heads = []
    for h in range(NUM_HEADS):                            # static unroll (4 heads)
        sl = slice(h * d, (h + 1) * d)
        qh = q[sl].astype(jnp.bfloat16)                   # (d, N)
        kh = k[sl].astype(jnp.bfloat16)
        vh = v[sl].astype(jnp.bfloat16)
        # Transposed scores: s_t[j, i] = k_j . q_i  -> (Nk, Nq); softmax over keys (axis 0).
        s_t = lax.dot_general(kh, qh, (((0,), (0,)), ((), ())),
                              preferred_element_type=jnp.float32)
        s_t = s_t - jnp.max(s_t, axis=0, keepdims=True)
        p_t = jnp.exp(s_t)                                # unnormalized probabilities
        denom = jnp.sum(p_t, axis=0, keepdims=True)       # (1, Nq)
        # MXU-natural PV: (d, Nk) @ (Nk, Nq); normalize AFTER the matmul.
        oh = jnp.dot(vh, p_t.astype(jnp.bfloat16),
                     preferred_element_type=jnp.float32)  # (d, Nq)
        oh = oh * pl.reciprocal(denom, approx=True)
        heads.append(oh)

    # Stitch heads along sublanes, single K=E out-projection matmul.
    oh_full = jnp.concatenate(heads, axis=0)              # (E, N) f32
    attn = jnp.dot(w_out_ref[...], oh_full.astype(jnp.bfloat16),
                   preferred_element_type=jnp.float32) + b_out_ref[...]

    # residual 1 (re-read x from VMEM instead of keeping it live over the head loop)
    attn = attn + x_ref[...].astype(jnp.float32)

    # ff_self: LayerNorm -> Linear -> GELU (exact erf) -> Linear, residual 2
    h_ln = _layernorm_cols(attn, ln2_w_ref[...], ln2_b_ref[...])
    h1 = jnp.dot(w1_ref[...], h_ln.astype(jnp.bfloat16),
                 preferred_element_type=jnp.float32) + b1_ref[...]
    h1 = _gelu_exact(h1)
    h2 = jnp.dot(w2_ref[...], h1.astype(jnp.bfloat16),
                 preferred_element_type=jnp.float32) + b2_ref[...]

    out_ref[...] = (h2 + attn).astype(out_ref.dtype)      # (E, N), lane-dense store


def init_params(key, channels):
    d = channels // NUM_HEADS
    e = d * NUM_HEADS
    assert e == channels, "example uses channels divisible by 4 (project_in/out = Identity)"
    ks = jax.random.split(key, 6)
    s = 0.02
    f32, bf16 = jnp.float32, jnp.bfloat16
    return dict(
        ln_w=jnp.ones((e, 1), f32),
        ln_b=jnp.zeros((e, 1), f32),
        # Transposed orientation uses PyTorch weights as-is (y^T = W x^T + b):
        # w_in == mha.in_proj_weight (3E, E), rows ordered [q | k | v].
        w_in=(jax.random.normal(ks[0], (3 * e, e), f32) * s).astype(bf16),
        b_in=jax.random.normal(ks[1], (3 * e, 1), f32) * s,
        w_out=(jax.random.normal(ks[2], (e, e), f32) * s).astype(bf16),    # out_proj.weight
        b_out=jnp.zeros((e, 1), f32),
        ln2_w=jnp.ones((e, 1), f32),
        ln2_b=jnp.zeros((e, 1), f32),
        w1=(jax.random.normal(ks[3], (e, e), f32) * s).astype(bf16),       # ff Linear1.weight
        b1=jax.random.normal(ks[4], (e, 1), f32) * s,
        w2=(jax.random.normal(ks[5], (e, e), f32) * s).astype(bf16),       # ff Linear2.weight
        b2=jnp.zeros((e, 1), f32),
    )


WEIGHT_NAMES = ("ln_w", "ln_b", "w_in", "b_in", "w_out", "b_out",
                "ln2_w", "ln2_b", "w1", "b1", "w2", "b2")


def self_attention_forward(x_nchw, params):
    b, c, h, w = x_nchw.shape
    n = h * w
    # (B, C, H, W) -> (B, C, N): pure reshape, no XLA transpose kernel.
    x = x_nchw.reshape(b, c, n)

    weights = [params[name] for name in WEIGHT_NAMES]

    def w_spec(arr):
        return pl.BlockSpec(arr.shape, lambda i: (0, 0))   # all weights are 2D, full-block

    out = pl.pallas_call(
        self_attention_kernel,
        out_shape=jax.ShapeDtypeStruct((b, c, n), x.dtype),
        grid=(b,),                                          # one batch element per step
        in_specs=[pl.BlockSpec((None, c, n), lambda i: (i, 0, 0))]
                 + [w_spec(wt) for wt in weights],
        out_specs=pl.BlockSpec((None, c, n), lambda i: (i, 0, 0)),
        compiler_params=pltpu.CompilerParams(
            dimension_semantics=("parallel",),              # v7x: batch elems split across TCs
            vmem_limit_bytes=32 * 1024 * 1024,              # explicit, v7x-safe budget
        ),
    )(x, *weights)

    # (B, C, N) -> (B, C, H, W): pure reshape.
    return out.reshape(b, c, h, w)


if __name__ == "__main__":
    key = jax.random.PRNGKey(0)
    k_x, k_p = jax.random.split(key)

    B, C, H, W = 2, 32, 16, 16        # channels divisible by num_heads=4; N = 256 tokens/batch
    x = jax.random.normal(k_x, (B, C, H, W), jnp.float32)
    params = init_params(k_p, C)

    y = self_attention_forward(x, params)
    jax.block_until_ready(y)
    assert y.shape == (B, C, H, W), y.shape
    assert bool(jnp.all(jnp.isfinite(y))), "non-finite output"
    print("KERNEL_OK")
</pallas_src>

<mosaic_0001>
module attributes {stable_mosaic.version = 11 : i64} {
  func.func @self_attention_kernel(%arg0: i32, %arg1: memref<1x32x256xf32, #tpu.memory_space<vmem>>, %arg2: memref<32x1xf32, #tpu.memory_space<vmem>>, %arg3: memref<32x1xf32, #tpu.memory_space<vmem>>, %arg4: memref<96x32xbf16, #tpu.memory_space<vmem>>, %arg5: memref<96x1xf32, #tpu.memory_space<vmem>>, %arg6: memref<32x32xbf16, #tpu.memory_space<vmem>>, %arg7: memref<32x1xf32, #tpu.memory_space<vmem>>, %arg8: memref<32x1xf32, #tpu.memory_space<vmem>>, %arg9: memref<32x1xf32, #tpu.memory_space<vmem>>, %arg10: memref<32x32xbf16, #tpu.memory_space<vmem>>, %arg11: memref<32x1xf32, #tpu.memory_space<vmem>>, %arg12: memref<32x32xbf16, #tpu.memory_space<vmem>>, %arg13: memref<32x1xf32, #tpu.memory_space<vmem>>, %arg14: memref<1x32x256xf32, #tpu.memory_space<vmem>>) attributes {dimension_semantics = [#tpu.dimension_semantics<parallel>], iteration_bounds = array<i64: 2>, scalar_prefetch = 0 : i64, scratch_operands = 0 : i64, tpu.core_type = #tpu.core_type<tc>, window_params = [{transform_indices = @transform_0, window_bounds = array<i64: 1, 32, 256>}, {pipeline_mode = #tpu.pipeline_mode<synchronous>, transform_indices = @transform_1, window_bounds = array<i64: 32, 1>}, {pipeline_mode = #tpu.pipeline_mode<synchronous>, transform_indices = @transform_2, window_bounds = array<i64: 32, 1>}, {pipeline_mode = #tpu.pipeline_mode<synchronous>, transform_indices = @transform_3, window_bounds = array<i64: 96, 32>}, {pipeline_mode = #tpu.pipeline_mode<synchronous>, transform_indices = @transform_4, window_bounds = array<i64: 96, 1>}, {pipeline_mode = #tpu.pipeline_mode<synchronous>, transform_indices = @transform_5, window_bounds = array<i64: 32, 32>}, {pipeline_mode = #tpu.pipeline_mode<synchronous>, transform_indices = @transform_6, window_bounds = array<i64: 32, 1>}, {pipeline_mode = #tpu.pipeline_mode<synchronous>, transform_indices = @transform_7, window_bounds = array<i64: 32, 1>}, {pipeline_mode = #tpu.pipeline_mode<synchronous>, transform_indices = @transform_8, window_bounds = array<i64: 32, 1>}, {pipeline_mode = #tpu.pipeline_mode<synchronous>, transform_indices = @transform_9, window_bounds = array<i64: 32, 32>}, {pipeline_mode = #tpu.pipeline_mode<synchronous>, transform_indices = @transform_10, window_bounds = array<i64: 32, 1>}, {pipeline_mode = #tpu.pipeline_mode<synchronous>, transform_indices = @transform_11, window_bounds = array<i64: 32, 32>}, {pipeline_mode = #tpu.pipeline_mode<synchronous>, transform_indices = @transform_12, window_bounds = array<i64: 32, 1>}, {transform_indices = @transform_13, window_bounds = array<i64: 1, 32, 256>}]} {
    %c0 = arith.constant 0 : index
    %c0_0 = arith.constant 0 : index
    %c0_1 = arith.constant 0 : index
    %0 = vector.load %arg1[%c0, %c0_0, %c0_1] : memref<1x32x256xf32, #tpu.memory_space<vmem>>, vector<1x32x256xf32>
    %1 = vector.shape_cast %0 : vector<1x32x256xf32> to vector<32x256xf32>
    %c0_2 = arith.constant 0 : index
    %c0_3 = arith.constant 0 : index
    %2 = vector.load %arg2[%c0_2, %c0_3] : memref<32x1xf32, #tpu.memory_space<vmem>>, vector<32x1xf32>
    %c0_4 = arith.constant 0 : index
    %c0_5 = arith.constant 0 : index
    %3 = vector.load %arg3[%c0_4, %c0_5] : memref<32x1xf32, #tpu.memory_space<vmem>>, vector<32x1xf32>
    %cst = arith.constant dense<0.000000e+00> : vector<256xf32>
    %4 = vector.multi_reduction <add>, %1, %cst [0] : vector<32x256xf32> to vector<256xf32>
    %5 = vector.shape_cast %4 : vector<256xf32> to vector<1x256xf32>
    %cst_6 = arith.constant 3.200000e+01 : f32
    %6 = vector.broadcast %cst_6 : f32 to vector<1x256xf32>
    %7 = arith.divf %5, %6 : vector<1x256xf32>
    %8 = vector.broadcast %7 : vector<1x256xf32> to vector<32x256xf32>
    %9 = arith.subf %1, %8 : vector<32x256xf32>
    %10 = arith.mulf %9, %9 : vector<32x256xf32>
    %cst_7 = arith.constant dense<0.000000e+00> : vector<256xf32>
    %11 = vector.multi_reduction <add>, %10, %cst_7 [0] : vector<32x256xf32> to vector<256xf32>
    %12 = vector.shape_cast %11 : vector<256xf32> to vector<1x256xf32>
    %cst_8 = arith.constant 3.200000e+01 : f32
    %13 = vector.broadcast %cst_8 : f32 to vector<1x256xf32>
    %14 = arith.divf %12, %13 : vector<1x256xf32>
    %15 = vector.broadcast %7 : vector<1x256xf32> to vector<32x256xf32>
    %16 = arith.subf %1, %15 : vector<32x256xf32>
    %cst_9 = arith.constant 9.99999974E-6 : f32
    %17 = vector.broadcast %cst_9 : f32 to vector<1x256xf32>
    %18 = arith.addf %14, %17 : vector<1x256xf32>
    %19 = math.rsqrt %18 : vector<1x256xf32>
    %20 = vector.broadcast %19 : vector<1x256xf32> to vector<32x256xf32>
    %21 = arith.mulf %16, %20 : vector<32x256xf32>
    %22 = vector.broadcast %2 : vector<32x1xf32> to vector<32x256xf32>
    %23 = arith.mulf %21, %22 : vector<32x256xf32>
    %24 = vector.broadcast %3 : vector<32x1xf32> to vector<32x256xf32>
    %25 = arith.addf %23, %24 : vector<32x256xf32>
    %c0_10 = arith.constant 0 : index
    %c0_11 = arith.constant 0 : index
    %26 = vector.load %arg4[%c0_10, %c0_11] : memref<96x32xbf16, #tpu.memory_space<vmem>>, vector<96x32xbf16>
    %27 = arith.truncf %25 : vector<32x256xf32> to vector<32x256xbf16>
    %cst_12 = arith.constant dense<0.000000e+00> : vector<96x256xf32>
    %28 = tpu.matmul %26, %27, %cst_12 {dimension_numbers = #tpu.dot_dimension_numbers<[1], [0], [0], [1], [0, 0, 1, 1], [], []>} : vector<96x32xbf16>, vector<32x256xbf16>, vector<96x256xf32> -> vector<96x256xf32>
    %c0_13 = arith.constant 0 : index
    %c0_14 = arith.constant 0 : index
    %29 = vector.load %arg5[%c0_13, %c0_14] : memref<96x1xf32, #tpu.memory_space<vmem>>, vector<96x1xf32>
    %30 = vector.broadcast %29 : vector<96x1xf32> to vector<96x256xf32>
    %31 = arith.addf %28, %30 : vector<96x256xf32>
    %32 = vector.extract_strided_slice %31 {offsets = [0, 0], sizes = [32, 256], strides = [1, 1]} : vector<96x256xf32> to vector<32x256xf32>
    %cst_15 = arith.constant 0.353553385 : f32
    %33 = vector.broadcast %cst_15 : f32 to vector<32x256xf32>
    %34 = arith.mulf %32, %33 : vector<32x256xf32>
    %35 = vector.extract_strided_slice %31 {offsets = [32, 0], sizes = [32, 256], strides = [1, 1]} : vector<96x256xf32> to vector<32x256xf32>
    %36 = vector.extract_strided_slice %31 {offsets = [64, 0], sizes = [32, 256], strides = [1, 1]} : vector<96x256xf32> to vector<32x256xf32>
    %37 = vector.extract_strided_slice %34 {offsets = [0, 0], sizes = [8, 256], strides = [1, 1]} : vector<32x256xf32> to vector<8x256xf32>
    %38 = arith.truncf %37 : vector<8x256xf32> to vector<8x256xbf16>
    %39 = vector.extract_strided_slice %35 {offsets = [0, 0], sizes = [8, 256], strides = [1, 1]} : vector<32x256xf32> to vector<8x256xf32>
    %40 = arith.truncf %39 : vector<8x256xf32> to vector<8x256xbf16>
    %41 = vector.extract_strided_slice %36 {offsets = [0, 0], sizes = [8, 256], strides = [1, 1]} : vector<32x256xf32> to vector<8x256xf32>
    %42 = arith.truncf %41 : vector<8x256xf32> to vector<8x256xbf16>
    %cst_16 = arith.constant dense<0.000000e+00> : vector<256x256xf32>
    %43 = tpu.matmul %40, %38, %cst_16 {dimension_numbers = #tpu.dot_dimension_numbers<[0], [0], [1], [1], [0, 1, 1, 1], [], []>} : vector<8x256xbf16>, vector<8x256xbf16>, vector<256x256xf32> -> vector<256x256xf32>
    %cst_17 = arith.constant dense<0xFF800000> : vector<256xf32>
    %44 = vector.multi_reduction <maximumf>, %43, %cst_17 [0] : vector<256x256xf32> to vector<256xf32>
    %45 = vector.shape_cast %44 : vector<256xf32> to vector<1x256xf32>
    %46 = vector.broadcast %45 : vector<1x256xf32> to vector<256x256xf32>
    %47 = arith.subf %43, %46 : vector<256x256xf32>
    %48 = math.exp %47 : vector<256x256xf32>
    %cst_18 = arith.constant dense<0.000000e+00> : vector<256xf32>
    %49 = vector.multi_reduction <add>, %48, %cst_18 [0] : vector<256x256xf32> to vector<256xf32>
    %50 = vector.shape_cast %49 : vector<256xf32> to vector<1x256xf32>
    %51 = arith.truncf %48 : vector<256x256xf32> to vector<256x256xbf16>
    %cst_19 = arith.constant dense<0.000000e+00> : vector<8x256xf32>
    %52 = tpu.matmul %42, %51, %cst_19 {dimension_numbers = #tpu.dot_dimension_numbers<[1], [0], [0], [1], [0, 0, 1, 1], [], []>} : vector<8x256xbf16>, vector<256x256xbf16>, vector<8x256xf32> -> vector<8x256xf32>
    %53 = tpu.reciprocal %50 {approx = true} : vector<1x256xf32> -> vector<1x256xf32>
    %54 = vector.broadcast %53 : vector<1x256xf32> to vector<8x256xf32>
    %55 = arith.mulf %52, %54 : vector<8x256xf32>
    %56 = vector.extract_strided_slice %34 {offsets = [8, 0], sizes = [8, 256], strides = [1, 1]} : vector<32x256xf32> to vector<8x256xf32>
    %57 = arith.truncf %56 : vector<8x256xf32> to vector<8x256xbf16>
    %58 = vector.extract_strided_slice %35 {offsets = [8, 0], sizes = [8, 256], strides = [1, 1]} : vector<32x256xf32> to vector<8x256xf32>
    %59 = arith.truncf %58 : vector<8x256xf32> to vector<8x256xbf16>
    %60 = vector.extract_strided_slice %36 {offsets = [8, 0], sizes = [8, 256], strides = [1, 1]} : vector<32x256xf32> to vector<8x256xf32>
    %61 = arith.truncf %60 : vector<8x256xf32> to vector<8x256xbf16>
    %cst_20 = arith.constant dense<0.000000e+00> : vector<256x256xf32>
    %62 = tpu.matmul %59, %57, %cst_20 {dimension_numbers = #tpu.dot_dimension_numbers<[0], [0], [1], [1], [0, 1, 1, 1], [], []>} : vector<8x256xbf16>, vector<8x256xbf16>, vector<256x256xf32> -> vector<256x256xf32>
    %cst_21 = arith.constant dense<0xFF800000> : vector<256xf32>
    %63 = vector.multi_reduction <maximumf>, %62, %cst_21 [0] : vector<256x256xf32> to vector<256xf32>
    %64 = vector.shape_cast %63 : vector<256xf32> to vector<1x256xf32>
    %65 = vector.broadcast %64 : vector<1x256xf32> to vector<256x256xf32>
    %66 = arith.subf %62, %65 : vector<256x256xf32>
    %67 = math.exp %66 : vector<256x256xf32>
    %cst_22 = arith.constant dense<0.000000e+00> : vector<256xf32>
    %68 = vector.multi_reduction <add>, %67, %cst_22 [0] : vector<256x256xf32> to vector<256xf32>
    %69 = vector.shape_cast %68 : vector<256xf32> to vector<1x256xf32>
    %70 = arith.truncf %67 : vector<256x256xf32> to vector<256x256xbf16>
    %cst_23 = arith.constant dense<0.000000e+00> : vector<8x256xf32>
    %71 = tpu.matmul %61, %70, %cst_23 {dimension_numbers = #tpu.dot_dimension_numbers<[1], [0], [0], [1], [0, 0, 1, 1], [], []>} : vector<8x256xbf16>, vector<256x256xbf16>, vector<8x256xf32> -> vector<8x256xf32>
    %72 = tpu.reciprocal %69 {approx = true} : vector<1x256xf32> -> vector<1x256xf32>
    %73 = vector.broadcast %72 : vector<1x256xf32> to vector<8x256xf32>
    %74 = arith.mulf %71, %73 : vector<8x256xf32>
    %75 = vector.extract_strided_slice %34 {offsets = [16, 0], sizes = [8, 256], strides = [1, 1]} : vector<32x256xf32> to vector<8x256xf32>
    %76 = arith.truncf %75 : vector<8x256xf32> to vector<8x256xbf16>
    %77 = vector.extract_strided_slice %35 {offsets = [16, 0], sizes = [8, 256], strides = [1, 1]} : vector<32x256xf32> to vector<8x256xf32>
    %78 = arith.truncf %77 : vector<8x256xf32> to vector<8x256xbf16>
    %79 = vector.extract_strided_slice %36 {offsets = [16, 0], sizes = [8, 256], strides = [1, 1]} : vector<32x256xf32> to vector<8x256xf32>
    %80 = arith.truncf %79 : vector<8x256xf32> to vector<8x256xbf16>
    %cst_24 = arith.constant dense<0.000000e+00> : vector<256x256xf32>
    %81 = tpu.matmul %78, %76, %cst_24 {dimension_numbers = #tpu.dot_dimension_numbers<[0], [0], [1], [1], [0, 1, 1, 1], [], []>} : vector<8x256xbf16>, vector<8x256xbf16>, vector<256x256xf32> -> vector<256x256xf32>
    %cst_25 = arith.constant dense<0xFF800000> : vector<256xf32>
    %82 = vector.multi_reduction <maximumf>, %81, %cst_25 [0] : vector<256x256xf32> to vector<256xf32>
    %83 = vector.shape_cast %82 : vector<256xf32> to vector<1x256xf32>
    %84 = vector.broadcast %83 : vector<1x256xf32> to vector<256x256xf32>
    %85 = arith.subf %81, %84 : vector<256x256xf32>
    %86 = math.exp %85 : vector<256x256xf32>
    %cst_26 = arith.constant dense<0.000000e+00> : vector<256xf32>
    %87 = vector.multi_reduction <add>, %86, %cst_26 [0] : vector<256x256xf32> to vector<256xf32>
    %88 = vector.shape_cast %87 : vector<256xf32> to vector<1x256xf32>
    %89 = arith.truncf %86 : vector<256x256xf32> to vector<256x256xbf16>
    %cst_27 = arith.constant dense<0.000000e+00> : vector<8x256xf32>
    %90 = tpu.matmul %80, %89, %cst_27 {dimension_numbers = #tpu.dot_dimension_numbers<[1], [0], [0], [1], [0, 0, 1, 1], [], []>} : vector<8x256xbf16>, vector<256x256xbf16>, vector<8x256xf32> -> vector<8x256xf32>
    %91 = tpu.reciprocal %88 {approx = true} : vector<1x256xf32> -> vector<1x256xf32>
    %92 = vector.broadcast %91 : vector<1x256xf32> to vector<8x256xf32>
    %93 = arith.mulf %90, %92 : vector<8x256xf32>
    %94 = vector.extract_strided_slice %34 {offsets = [24, 0], sizes = [8, 256], strides = [1, 1]} : vector<32x256xf32> to vector<8x256xf32>
    %95 = arith.truncf %94 : vector<8x256xf32> to vector<8x256xbf16>
    %96 = vector.extract_strided_slice %35 {offsets = [24, 0], sizes = [8, 256], strides = [1, 1]} : vector<32x256xf32> to vector<8x256xf32>
    %97 = arith.truncf %96 : vector<8x256xf32> to vector<8x256xbf16>
    %98 = vector.extract_strided_slice %36 {offsets = [24, 0], sizes = [8, 256], strides = [1, 1]} : vector<32x256xf32> to vector<8x256xf32>
    %99 = arith.truncf %98 : vector<8x256xf32> to vector<8x256xbf16>
    %cst_28 = arith.constant dense<0.000000e+00> : vector<256x256xf32>
    %100 = tpu.matmul %97, %95, %cst_28 {dimension_numbers = #tpu.dot_dimension_numbers<[0], [0], [1], [1], [0, 1, 1, 1], [], []>} : vector<8x256xbf16>, vector<8x256xbf16>, vector<256x256xf32> -> vector<256x256xf32>
    %cst_29 = arith.constant dense<0xFF800000> : vector<256xf32>
    %101 = vector.multi_reduction <maximumf>, %100, %cst_29 [0] : vector<256x256xf32> to vector<256xf32>
    %102 = vector.shape_cast %101 : vector<256xf32> to vector<1x256xf32>
    %103 = vector.broadcast %102 : vector<1x256xf32> to vector<256x256xf32>
    %104 = arith.subf %100, %103 : vector<256x256xf32>
    %105 = math.exp %104 : vector<256x256xf32>
    %cst_30 = arith.constant dense<0.000000e+00> : vector<256xf32>
    %106 = vector.multi_reduction <add>, %105, %cst_30 [0] : vector<256x256xf32> to vector<256xf32>
    %107 = vector.shape_cast %106 : vector<256xf32> to vector<1x256xf32>
    %108 = arith.truncf %105 : vector<256x256xf32> to vector<256x256xbf16>
    %cst_31 = arith.constant dense<0.000000e+00> : vector<8x256xf32>
    %109 = tpu.matmul %99, %108, %cst_31 {dimension_numbers = #tpu.dot_dimension_numbers<[1], [0], [0], [1], [0, 0, 1, 1], [], []>} : vector<8x256xbf16>, vector<256x256xbf16>, vector<8x256xf32> -> vector<8x256xf32>
    %110 = tpu.reciprocal %107 {approx = true} : vector<1x256xf32> -> vector<1x256xf32>
    %111 = vector.broadcast %110 : vector<1x256xf32> to vector<8x256xf32>
    %112 = arith.mulf %109, %111 : vector<8x256xf32>
    %113 = tpu.concatenate %55, %74, %93, %112 in 0 : vector<8x256xf32>, vector<8x256xf32>, vector<8x256xf32>, vector<8x256xf32> -> vector<32x256xf32>
    %c0_32 = arith.constant 0 : index
    %c0_33 = arith.constant 0 : index
    %114 = vector.load %arg6[%c0_32, %c0_33] : memref<32x32xbf16, #tpu.memory_space<vmem>>, vector<32x32xbf16>
    %115 = arith.truncf %113 : vector<32x256xf32> to vector<32x256xbf16>
    %cst_34 = arith.constant dense<0.000000e+00> : vector<32x256xf32>
    %116 = tpu.matmul %114, %115, %cst_34 {dimension_numbers = #tpu.dot_dimension_numbers<[1], [0], [0], [1], [0, 0, 1, 1], [], []>} : vector<32x32xbf16>, vector<32x256xbf16>, vector<32x256xf32> -> vector<32x256xf32>
    %c0_35 = arith.constant 0 : index
    %c0_36 = arith.constant 0 : index
    %117 = vector.load %arg7[%c0_35, %c0_36] : memref<32x1xf32, #tpu.memory_space<vmem>>, vector<32x1xf32>
    %118 = vector.broadcast %117 : vector<32x1xf32> to vector<32x256xf32>
    %119 = arith.addf %116, %118 : vector<32x256xf32>
    %c0_37 = arith.constant 0 : index
    %c0_38 = arith.constant 0 : index
    %c0_39 = arith.constant 0 : index
    %120 = vector.load %arg1[%c0_37, %c0_38, %c0_39] : memref<1x32x256xf32, #tpu.memory_space<vmem>>, vector<1x32x256xf32>
    %121 = vector.shape_cast %120 : vector<1x32x256xf32> to vector<32x256xf32>
    %122 = arith.addf %119, %121 : vector<32x256xf32>
    %c0_40 = arith.constant 0 : index
    %c0_41 = arith.constant 0 : index
    %123 = vector.load %arg8[%c0_40, %c0_41] : memref<32x1xf32, #tpu.memory_space<vmem>>, vector<32x1xf32>
    %c0_42 = arith.constant 0 : index
    %c0_43 = arith.constant 0 : index
    %124 = vector.load %arg9[%c0_42, %c0_43] : memref<32x1xf32, #tpu.memory_space<vmem>>, vector<32x1xf32>
    %cst_44 = arith.constant dense<0.000000e+00> : vector<256xf32>
    %125 = vector.multi_reduction <add>, %122, %cst_44 [0] : vector<32x256xf32> to vector<256xf32>
    %126 = vector.shape_cast %125 : vector<256xf32> to vector<1x256xf32>
    %cst_45 = arith.constant 3.200000e+01 : f32
    %127 = vector.broadcast %cst_45 : f32 to vector<1x256xf32>
    %128 = arith.divf %126, %127 : vector<1x256xf32>
    %129 = vector.broadcast %128 : vector<1x256xf32> to vector<32x256xf32>
    %130 = arith.subf %122, %129 : vector<32x256xf32>
    %131 = arith.mulf %130, %130 : vector<32x256xf32>
    %cst_46 = arith.constant dense<0.000000e+00> : vector<256xf32>
    %132 = vector.multi_reduction <add>, %131, %cst_46 [0] : vector<32x256xf32> to vector<256xf32>
    %133 = vector.shape_cast %132 : vector<256xf32> to vector<1x256xf32>
    %cst_47 = arith.constant 3.200000e+01 : f32
    %134 = vector.broadcast %cst_47 : f32 to vector<1x256xf32>
    %135 = arith.divf %133, %134 : vector<1x256xf32>
    %136 = vector.broadcast %128 : vector<1x256xf32> to vector<32x256xf32>
    %137 = arith.subf %122, %136 : vector<32x256xf32>
    %cst_48 = arith.constant 9.99999974E-6 : f32
    %138 = vector.broadcast %cst_48 : f32 to vector<1x256xf32>
    %139 = arith.addf %135, %138 : vector<1x256xf32>
    %140 = math.rsqrt %139 : vector<1x256xf32>
    %141 = vector.broadcast %140 : vector<1x256xf32> to vector<32x256xf32>
    %142 = arith.mulf %137, %141 : vector<32x256xf32>
    %143 = vector.broadcast %123 : vector<32x1xf32> to vector<32x256xf32>
    %144 = arith.mulf %142, %143 : vector<32x256xf32>
    %145 = vector.broadcast %124 : vector<32x1xf32> to vector<32x256xf32>
    %146 = arith.addf %144, %145 : vector<32x256xf32>
    %c0_49 = arith.constant 0 : index
    %c0_50 = arith.constant 0 : index
    %147 = vector.load %arg10[%c0_49, %c0_50] : memref<32x32xbf16, #tpu.memory_space<vmem>>, vector<32x32xbf16>
    %148 = arith.truncf %146 : vector<32x256xf32> to vector<32x256xbf16>
    %cst_51 = arith.constant dense<0.000000e+00> : vector<32x256xf32>
    %149 = tpu.matmul %147, %148, %cst_51 {dimension_numbers = #tpu.dot_dimension_numbers<[1], [0], [0], [1], [0, 0, 1, 1], [], []>} : vector<32x32xbf16>, vector<32x256xbf16>, vector<32x256xf32> -> vector<32x256xf32>
    %c0_52 = arith.constant 0 : index
    %c0_53 = arith.constant 0 : index
    %150 = vector.load %arg11[%c0_52, %c0_53] : memref<32x1xf32, #tpu.memory_space<vmem>>, vector<32x1xf32>
    %151 = vector.broadcast %150 : vector<32x1xf32> to vector<32x256xf32>
    %152 = arith.addf %149, %151 : vector<32x256xf32>
    %cst_54 = arith.constant 0.707106769 : f32
    %153 = vector.broadcast %cst_54 : f32 to vector<32x256xf32>
    %154 = arith.mulf %152, %153 : vector<32x256xf32>
    %155 = math.absf %154 : vector<32x256xf32>
    %cst_55 = arith.constant 0.327591091 : f32
    %156 = vector.broadcast %cst_55 : f32 to vector<32x256xf32>
    %157 = arith.mulf %156, %155 : vector<32x256xf32>
    %cst_56 = arith.constant 1.000000e+00 : f32
    %158 = vector.broadcast %cst_56 : f32 to vector<32x256xf32>
    %159 = arith.addf %158, %157 : vector<32x256xf32>
    %cst_57 = arith.constant 1.000000e+00 : f32
    %160 = vector.broadcast %cst_57 : f32 to vector<32x256xf32>
    %161 = arith.divf %160, %159 : vector<32x256xf32>
    %cst_58 = arith.constant 1.06140542 : f32
    %162 = vector.broadcast %cst_58 : f32 to vector<32x256xf32>
    %163 = arith.mulf %162, %161 : vector<32x256xf32>
    %cst_59 = arith.constant 1.45315206 : f32
    %164 = vector.broadcast %cst_59 : f32 to vector<32x256xf32>
    %165 = arith.subf %163, %164 : vector<32x256xf32>
    %166 = arith.mulf %165, %161 : vector<32x256xf32>
    %cst_60 = arith.constant 1.42141378 : f32
    %167 = vector.broadcast %cst_60 : f32 to vector<32x256xf32>
    %168 = arith.addf %166, %167 : vector<32x256xf32>
    %169 = arith.mulf %168, %161 : vector<32x256xf32>
    %cst_61 = arith.constant 0.284496725 : f32
    %170 = vector.broadcast %cst_61 : f32 to vector<32x256xf32>
    %171 = arith.subf %169, %170 : vector<32x256xf32>
    %172 = arith.mulf %171, %161 : vector<32x256xf32>
    %cst_62 = arith.constant 0.254829586 : f32
    %173 = vector.broadcast %cst_62 : f32 to vector<32x256xf32>
    %174 = arith.addf %172, %173 : vector<32x256xf32>
    %175 = arith.mulf %174, %161 : vector<32x256xf32>
    %cst_63 = arith.constant 0.000000e+00 : f32
    %176 = vector.broadcast %cst_63 : f32 to vector<32x256xf32>
    %177 = arith.subf %176, %155 : vector<32x256xf32>
    %178 = arith.mulf %177, %155 : vector<32x256xf32>
    %179 = math.exp %178 : vector<32x256xf32>
    %180 = arith.mulf %175, %179 : vector<32x256xf32>
    %cst_64 = arith.constant 1.000000e+00 : f32
    %181 = vector.broadcast %cst_64 : f32 to vector<32x256xf32>
    %182 = arith.subf %181, %180 : vector<32x256xf32>
    %cst_65 = arith.constant 0.000000e+00 : f32
    %183 = vector.broadcast %cst_65 : f32 to vector<32x256xf32>
    %184 = arith.cmpf oge, %154, %183 : vector<32x256xf32>
    %cst_66 = arith.constant 0.000000e+00 : f32
    %185 = vector.broadcast %cst_66 : f32 to vector<32x256xf32>
    %186 = arith.subf %185, %182 : vector<32x256xf32>
    %187 = arith.select %184, %182, %186 : vector<32x256xi1>, vector<32x256xf32>
    %cst_67 = arith.constant 5.000000e-01 : f32
    %188 = vector.broadcast %cst_67 : f32 to vector<32x256xf32>
    %189 = arith.mulf %188, %152 : vector<32x256xf32>
    %cst_68 = arith.constant 1.000000e+00 : f32
    %190 = vector.broadcast %cst_68 : f32 to vector<32x256xf32>
    %191 = arith.addf %190, %187 : vector<32x256xf32>
    %192 = arith.mulf %189, %191 : vector<32x256xf32>
    %c0_69 = arith.constant 0 : index
    %c0_70 = arith.constant 0 : index
    %193 = vector.load %arg12[%c0_69, %c0_70] : memref<32x32xbf16, #tpu.memory_space<vmem>>, vector<32x32xbf16>
    %194 = arith.truncf %192 : vector<32x256xf32> to vector<32x256xbf16>
    %cst_71 = arith.constant dense<0.000000e+00> : vector<32x256xf32>
    %195 = tpu.matmul %193, %194, %cst_71 {dimension_numbers = #tpu.dot_dimension_numbers<[1], [0], [0], [1], [0, 0, 1, 1], [], []>} : vector<32x32xbf16>, vector<32x256xbf16>, vector<32x256xf32> -> vector<32x256xf32>
    %c0_72 = arith.constant 0 : index
    %c0_73 = arith.constant 0 : index
    %196 = vector.load %arg13[%c0_72, %c0_73] : memref<32x1xf32, #tpu.memory_space<vmem>>, vector<32x1xf32>
    %197 = vector.broadcast %196 : vector<32x1xf32> to vector<32x256xf32>
    %198 = arith.addf %195, %197 : vector<32x256xf32>
    %199 = arith.addf %198, %122 : vector<32x256xf32>
    %c0_74 = arith.constant 0 : index
    %c0_75 = arith.constant 0 : index
    %c0_76 = arith.constant 0 : index
    %200 = vector.load %arg14[%c0_74, %c0_75, %c0_76] : memref<1x32x256xf32, #tpu.memory_space<vmem>>, vector<1x32x256xf32>
    %201 = vector.shape_cast %200 : vector<1x32x256xf32> to vector<32x256xf32>
    %202 = vector.shape_cast %199 : vector<32x256xf32> to vector<1x32x256xf32>
    tpu.vector_store %arg14[%c0_74, %c0_75, %c0_76], %202 {strides = array<i32>} : memref<1x32x256xf32, #tpu.memory_space<vmem>>, vector<1x32x256xf32>,
    return
  }
  func.func @transform_0(%arg0: i32) -> (i32, i32, i32) {
    %c0_i32 = arith.constant 0 : i32
    %c0_i32_0 = arith.constant 0 : i32
    %c0_i32_1 = arith.constant 0 : i32
    return %arg0, %c0_i32, %c0_i32_0 : i32, i32, i32
  }
  func.func @transform_1(%arg0: i32) -> (i32, i32) {
    %c0_i32 = arith.constant 0 : i32
    %c0_i32_0 = arith.constant 0 : i32
    %c0_i32_1 = arith.constant 0 : i32
    return %c0_i32, %c0_i32_0 : i32, i32
  }
  func.func @transform_2(%arg0: i32) -> (i32, i32) {
    %c0_i32 = arith.constant 0 : i32
    %c0_i32_0 = arith.constant 0 : i32
    %c0_i32_1 = arith.constant 0 : i32
    return %c0_i32, %c0_i32_0 : i32, i32
  }
  func.func @transform_3(%arg0: i32) -> (i32, i32) {
    %c0_i32 = arith.constant 0 : i32
    %c0_i32_0 = arith.constant 0 : i32
    %c0_i32_1 = arith.constant 0 : i32
    return %c0_i32, %c0_i32_0 : i32, i32
  }
  func.func @transform_4(%arg0: i32) -> (i32, i32) {
    %c0_i32 = arith.constant 0 : i32
    %c0_i32_0 = arith.constant 0 : i32
    %c0_i32_1 = arith.constant 0 : i32
    return %c0_i32, %c0_i32_0 : i32, i32
  }
  func.func @transform_5(%arg0: i32) -> (i32, i32) {
    %c0_i32 = arith.constant 0 : i32
    %c0_i32_0 = arith.constant 0 : i32
    %c0_i32_1 = arith.constant 0 : i32
    return %c0_i32, %c0_i32_0 : i32, i32
  }
  func.func @transform_6(%arg0: i32) -> (i32, i32) {
    %c0_i32 = arith.constant 0 : i32
    %c0_i32_0 = arith.constant 0 : i32
    %c0_i32_1 = arith.constant 0 : i32
    return %c0_i32, %c0_i32_0 : i32, i32
  }
  func.func @transform_7(%arg0: i32) -> (i32, i32) {
    %c0_i32 = arith.constant 0 : i32
    %c0_i32_0 = arith.constant 0 : i32
    %c0_i32_1 = arith.constant 0 : i32
    return %c0_i32, %c0_i32_0 : i32, i32
  }
  func.func @transform_8(%arg0: i32) -> (i32, i32) {
    %c0_i32 = arith.constant 0 : i32
    %c0_i32_0 = arith.constant 0 : i32
    %c0_i32_1 = arith.constant 0 : i32
    return %c0_i32, %c0_i32_0 : i32, i32
  }
  func.func @transform_9(%arg0: i32) -> (i32, i32) {
    %c0_i32 = arith.constant 0 : i32
    %c0_i32_0 = arith.constant 0 : i32
    %c0_i32_1 = arith.constant 0 : i32
    return %c0_i32, %c0_i32_0 : i32, i32
  }
  func.func @transform_10(%arg0: i32) -> (i32, i32) {
    %c0_i32 = arith.constant 0 : i32
    %c0_i32_0 = arith.constant 0 : i32
    %c0_i32_1 = arith.constant 0 : i32
    return %c0_i32, %c0_i32_0 : i32, i32
  }
  func.func @transform_11(%arg0: i32) -> (i32, i32) {
    %c0_i32 = arith.constant 0 : i32
    %c0_i32_0 = arith.constant 0 : i32
    %c0_i32_1 = arith.constant 0 : i32
    return %c0_i32, %c0_i32_0 : i32, i32
  }
  func.func @transform_12(%arg0: i32) -> (i32, i32) {
    %c0_i32 = arith.constant 0 : i32
    %c0_i32_0 = arith.constant 0 : i32
    %c0_i32_1 = arith.constant 0 : i32
    return %c0_i32, %c0_i32_0 : i32, i32
  }
  func.func @transform_13(%arg0: i32) -> (i32, i32, i32) {
    %c0_i32 = arith.constant 0 : i32
    %c0_i32_0 = arith.constant 0 : i32
    %c0_i32_1 = arith.constant 0 : i32
    return %arg0, %c0_i32, %c0_i32_0 : i32, i32, i32
  }
}

</mosaic_0001>

<bundles_post_ra>
// kernel: tpu_custom_call.1
= control target key start
LH: loop header
LB: loop body
LE: loop exit
PB: predicated region body
PF: predicated region fallthrough
CT: control target
= control target key end

     0   :  { %18 = vsyncpa [#allocation3], 0  ;;  %s8245_s0 = inlined_call_operand.vmem [shape: f32[2,32,256], index: 0, kind: input, shape index: {}]   ;;  %s8246_s1 = inlined_call_operand.vmem [shape: f32[32,1], index: 1, kind: input, shape index: {}]   ;;  %s8247_s2 = inlined_call_operand.vmem [shape: f32[32,1], index: 2, kind: input, shape index: {}]   ;;  %s8248_s3 = inlined_call_operand.vmem [shape: bf16[96,32], index: 3, kind: input, shape index: {}]   ;;  %s8249_s4 = inlined_call_operand.vmem [shape: f32[96,1], index: 4, kind: input, shape index: {}]   ;;  %s8250_s5 = inlined_call_operand.vmem [shape: bf16[32,32], index: 5, kind: input, shape index: {}]   ;;  %s8251_s6 = inlined_call_operand.vmem [shape: f32[32,1], index: 6, kind: input, shape index: {}]   ;;  %s8252_s7 = inlined_call_operand.vmem [shape: f32[32,1], index: 7, kind: input, shape index: {}]   ;;  %s8253_s8 = inlined_call_operand.vmem [shape: f32[32,1], index: 8, kind: input, shape index: {}]   ;;  %s8254_s9 = inlined_call_operand.vmem [shape: bf16[32,32], index: 9, kind: input, shape index: {}]   ;;  %s8255_s10 = inlined_call_operand.vmem [shape: f32[32,1], index: 10, kind: input, shape index: {}]   ;;  %s8256_s11 = inlined_call_operand.vmem [shape: bf16[32,32], index: 11, kind: input, shape index: {}]   ;;  %s8257_s12 = inlined_call_operand.vmem [shape: f32[32,1], index: 12, kind: input, shape index: {}]   ;;  %s8258_s13 = inlined_call_operand.hbm [shape: f32[2,32,256], index: 13, kind: output, shape index: {}]  }
   0x1   :  { %20 = vsyncpa [#allocation3 + $0x1], 0  ;;  %s5270_s25 = smov 0   ;;  %s5272_s26 = smov 0  }
   0x2   :  { %s5274_s27 = smov 0   ;;  %s5276_s28 = smov 0  }
   0x3 LB: > { %8363 = sst [smem:[#allocation5_spill]] %s5190_s27  ;;  %s5291_s29 = sadd.s32 4294967295, %s5194_s28   ;;  %s5194_s28 = sphi %s5276_s28, %s8690_s28   ;;  %s5190_s27 = sphi %s5274_s27, %s8692_s27   ;;  %s5186_s26 = sphi %s5272_s26, %s8694_s26   ;;  %s5182_s25 = sphi %s5270_s25, %s8693_s25  }
   0x4   : > { %s4380_s30 = sadd.s32 4294967294, %s5194_s28   ;;  %s5295_s14 = sadd.s32 1, %s5194_s28  }
   0x5   : > { %8364 = sst [smem:[#allocation6_spill]] %s5295_s14  ;;  %s311_s15 = sadd.s32 1, %s5190_s27 }
   0x6   : > { %s308_s16 = ssub.s32 %s5194_s28, %s5295_s14  ;;  %p321_p0 = scmp.ne.s32.totalorder %s5190_s27, %s5186_s26 }
   0x7   : > { %p309_p1 = scmp.eq.s32.totalorder %s308_s16, 0  ;;  %p322_p2 = scmp.eq.s32.totalorder %s5291_s29, 1 }
   0x8   : > { %p327_p3 = scmp.ne.s32.totalorder %s5186_s26, %s5182_s25  ;;  %p328_p4 = scmp.eq.s32.totalorder %s4380_s30, 1 }
   0x9   : > { %s5306_s17 = scalar_select %p309_p1, %s5190_s27, %s311_s15  }
   0xa   : > { %p5308_p5 = por %p322_p2, %p321_p0  ;;  %p5312_p6 = por %p328_p4, %p327_p3 }
   0xb   : > { %8365 = sst [smem:[#allocation7_spill]] %s5306_s17  ;;  %p4383_p7 = scmp.ge.s32.totalorder %s5194_s28, 1 }
   0xc   : > { %p390_p8 = scmp.lt.s32.totalorder %s5194_s28, 3 }
   0xe   : > { %p391_p9 = pnand %p4383_p7, %p390_p8 }
  0x10   : > { %394 = sbr.rel (%p391_p9) target bundleno = 3335 (0xd07), region = 72 }
  0x15   : > { %v454_v0 = vld [vmem:[%s8247_s2 + $0x10] sm:$0xff]  ;;  %p434_p10 = scmp.lt.s32.totalorder %s5291_s29, 1  ;;  %v8262_v2 = vmov 0   ;;  %v455_v3 = vld [vmem:[%s8247_s2 + $0x18] sm:$0xff]  ;;  %v449_v5 = vld [vmem:[%s8246_s1 + $0x8] sm:$0xff]  ;;  %vm699_vm0 = vcmask 261120  }
  0x16   : > { %v450_v1 = vld [vmem:[%s8246_s1 + $0x10] sm:$0xff]  ;;  %4545 = vset.pattern.permute.xlu1 %v8262_v2  ;;  %4544 = vset.pattern.permute.xlu0 %v8262_v2  ;;  %v451_v4 = vld [vmem:[%s8246_s1 + $0x18] sm:$0xff]  ;;  %v448_v6 = vld [vmem:[%s8246_s1] sm:$0xff]  ;;  %vm906_vm1 = vcmask 1043456   ;;  %vm857_vm2 = vcmask 64512   ;;  %s431_s20 = sand.u32 1, %s5186_s26  }
  0x17   : > { %565 = vperm.xlu1 %4545, %v454_v0   ;;  %537 = vperm.xlu0 %4544, %v450_v1   ;;  %s435_s15 = scalar_select %p434_p10, %s5291_s29, 1  ;;  %v453_v7 = vld [vmem:[%s8247_s2 + $0x8] sm:$0xff]  ;;  %v452_v8 = vld [vmem:[%s8247_s2] sm:$0xff] }
  0x18   : > { %750 = vmatprep.mubr.bf16.mxu0 %v8262_v2  ;;  %945 = vmatprep.mubr.bf16.mxu1 %v8262_v2  ;;  %v597_v13 = vld [vmem:[%s8249_s4] sm:$0xff]  ;;  %s5197_s24 = smov [#allocation2]  }
  0x19   : > { %s4500_s21 = sshll.u32 %s435_s15, 6  ;;  %v601_v14 = vld [vmem:[%s8249_s4 + $0x20] sm:$0xff]  ;;  %s4384_s15 = sshll.u32 %s431_s20, 6 }
  0x1a   : > { %s5345_s16 = scalar_lea.vmem %s8245_s0, %s4500_s21  ;;  %s8177_s22 = scalar_lea.vmem [#allocation2], %s4384_s15 }
  0x1b   : > { %570 = vperm.xlu1 %4545, %v455_v3   ;;  %542 = vperm.xlu0 %4544, %v451_v4   ;;  %v440_v9 = vld [vmem:[%s5345_s16] sm:$0xff]  ;;  %v441_v10 = vld [vmem:[%s5345_s16 + $0x8] sm:$0xff]  ;;  %v442_v11 = vld [vmem:[%s5345_s16 + $0x10] sm:$0xff]  ;;  %s4318_s27 = sshll.u32 %s8177_s22, 4  ;;  %s5138_s30 = sshll.u32 %s5197_s24, 4  ;;  %s8198_s27 = int_to_ptr.vmem [resolvable:$true] %s4318_s27  ;;  %s5139_s30 = int_to_ptr.vmem [resolvable:$false] %s5138_s30 }
  0x1c   : > { %v443_v12 = vld [vmem:[%s5345_s16 + $0x18] sm:$0xff]  ;;  %v456_v15 = vadd.f32 %v442_v11, %v440_v9  ;;  %v444_v16 = vld [vmem:[%s5345_s16 + $0x20] sm:$0xff]  ;;  %v445_v18 = vld [vmem:[%s5345_s16 + $0x28] sm:$0xff]  ;;  %s5134_s23 = scalar_lea.vmem %s8198_s27, 1024  ;;  %s5140_s15 = scalar_lea.vmem %s5139_s30, 2048 }
  0x1d   : > { %v465_v17 = vadd.f32 %v443_v12, %v441_v10  ;;  %v446_v20 = vld [vmem:[%s5345_s16 + $0x30] sm:$0xff]  ;;  %v447_v22 = vld [vmem:[%s5345_s16 + $0x38] sm:$0xff]  ;;  %p5135_p11 = scmp.ne.s32.totalorder %s8198_s27, %s5134_s23  ;;  %p5141_p0 = scmp.lt.s32.totalorder %s8198_s27, %s5139_s30 }
  0x1e   : > { %v457_v19 = vadd.f32 %v456_v15, %v444_v16  ;;  %p5142_p1 = scmp.lt.s32.totalorder %s5140_s15, %s5134_s23 }
  0x1f   : > { %532 = vperm.xlu1 %4545, %v449_v5   ;;  %527 = vperm.xlu0 %4544, %v448_v6   ;;  %v466_v21 = vadd.f32 %v465_v17, %v445_v18  ;;  %p5136_p12 = pnand %p5135_p11, %p5308_p5 }
  0x20   : > { %v458_v23 = vadd.f32 %v457_v19, %v446_v20  ;;  %p5143_p2 = por %p5142_p1, %p5141_p0 }
  0x21   : > { %v467_v24 = vadd.f32 %v466_v21, %v447_v22  ;;  %p5137_p13 = pneg %p5136_p12 }
  0x22   : > { %v459_v25 = vrot.slane %v458_v23, 4 }
  0x23   : > { %560 = vperm.xlu1 %4545, %v453_v7   ;;  %555 = vperm.xlu0 %4544, %v452_v8   ;;  %v468_v26 = vrot.slane %v467_v24, 4  ;;  %p5144_p3 = pnand %p5143_p2, %p5137_p13 }
  0x24   : > { %v460_v27 = vadd.f32 %v459_v25, %v458_v23 }
  0x25   : > { %v469_v28 = vadd.f32 %v468_v26, %v467_v24 }
  0x26   : > { %v461_v29 = vrot.slane %v460_v27, 2 }
  0x27   : > { %611 = vperm.xlu1 %4545, %v597_v13   ;;  %631 = vperm.xlu0 %4544, %v601_v14   ;;  %v470_v30 = vrot.slane %v469_v28, 2 }
  0x28   : > { %v462_v31 = vadd.f32 %v461_v29, %v460_v27 }
  0x29   : > { %v471_v32 = vadd.f32 %v470_v30, %v469_v28 }
  0x2a   : > { %v463_v33 = vrot.slane %v462_v31, 1 }
  0x2b   : > { %v472_v34 = vrot.slane %v471_v32, 1 }
  0x2c   : > { %v464_v35 = vadd.f32 %v463_v33, %v462_v31 }
  0x2d   : > { %v473_v36 = vadd.f32 %v472_v34, %v471_v32 }
  0x2e   : > { %v475_v37 = vmul.f32 0.03125, %v464_v35 }
  0x2f   : > { %v476_v38 = vmul.f32 0.03125, %v473_v36 }
  0x30   : > { %v477_v39 = vsub.f32 %v440_v9, %v475_v37  ;;  %v479_v40 = vsub.f32 %v442_v11, %v475_v37  ;;  %v481_v43 = vsub.f32 %v444_v16, %v475_v37  ;;  %v483_v49 = vsub.f32 %v446_v20, %v475_v37 }
  0x31   : > { %v478_v41 = vsub.f32 %v441_v10, %v476_v38  ;;  %v480_v42 = vsub.f32 %v443_v12, %v476_v38  ;;  %v482_v46 = vsub.f32 %v445_v18, %v476_v38  ;;  %v484_v52 = vsub.f32 %v447_v22, %v476_v38 }
  0x32   : > { %v485_v44 = vmul.f32 %v477_v39, %v477_v39  ;;  %v487_v45 = vmul.f32 %v479_v40, %v479_v40  ;;  %v489_v50 = vmul.f32 %v481_v43, %v481_v43  ;;  %v491_v55 = vmul.f32 %v483_v49, %v483_v49 }
  0x33   : > { %v486_v47 = vmul.f32 %v478_v41, %v478_v41  ;;  %v488_v48 = vmul.f32 %v480_v42, %v480_v42  ;;  %v490_v53 = vmul.f32 %v482_v46, %v482_v46  ;;  %v492_v57 = vmul.f32 %v484_v52, %v484_v52 }
  0x34   : > { %v493_v51 = vadd.f32 %v487_v45, %v485_v44 }
  0x35   : > { %v502_v54 = vadd.f32 %v488_v48, %v486_v47 }
  0x36   : > { %v494_v56 = vadd.f32 %v493_v51, %v489_v50 }
  0x37   : > { %v503_v58 = vadd.f32 %v502_v54, %v490_v53  ;;  %v4547_v53 = vld [vmem:[%s8248_s3 + $0x8] sm:$0xff]   ;;  %v4548_v54 = vld [vmem:[%s8248_s3 + $0x10] sm:$0xff]  }
  0x38   : > { %v495_v59 = vadd.f32 %v494_v56, %v491_v55  ;;  %v4549_v55 = vld [vmem:[%s8248_s3 + $0x18] sm:$0xff]   ;;  %v4550_v56 = vld [vmem:[%s8248_s3 + $0x20] sm:$0xff]  }
  0x39   : > { %v504_v60 = vadd.f32 %v503_v58, %v492_v57 }
  0x3a   : > { %v496_v61 = vrot.slane %v495_v59, 4 }
  0x3b   : > { %v505_v62 = vrot.slane %v504_v60, 4 }
  0x3c   : > { %v497_v63 = vadd.f32 %v496_v61, %v495_v59 }
  0x3d   : > { %v506_v0 = vadd.f32 %v505_v62, %v504_v60 }
  0x3e   : > { %v498_v1 = vrot.slane %v497_v63, 2 }
  0x3f   : > { %v507_v3 = vrot.slane %v506_v0, 2 }
  0x40   : > { %v499_v4 = vadd.f32 %v498_v1, %v497_v63 }
  0x41   : > { %v508_v5 = vadd.f32 %v507_v3, %v506_v0 }
  0x42   : > { %v500_v6 = vrot.slane %v499_v4, 1 }
  0x43   : > { %v509_v7 = vrot.slane %v508_v5, 1 }
  0x44   : > { %v501_v8 = vadd.f32 %v500_v6, %v499_v4 }
  0x45   : > { %v510_v9 = vadd.f32 %v509_v7, %v508_v5 }
  0x46   : > { %v511_v10 = vmul.f32 0.03125, %v501_v8 }
  0x47   : > { %v512_v11 = vmul.f32 0.03125, %v510_v9 }
  0x48   : > { %v513_v12 = vadd.f32 1e-05, %v511_v10 }
  0x49   : > { %v514_v13 = vadd.f32 1e-05, %v512_v11 }
  0x4a   : > { %4558 = vrsqrt.f32 %v513_v12 }
  0x4b   : > { %4560 = vrsqrt.f32 %v514_v13 }
  0x57   : > { %v4559_v14 = vpop.eup %4558 }
  0x58   : > { %v4561_v15 = vpop.eup %4560  ;;  %v521_v18 = vmul.f32 %v4559_v14, %v481_v43  ;;  %v523_v20 = vmul.f32 %v4559_v14, %v483_v49  ;;  %v519_v28 = vmul.f32 %v4559_v14, %v479_v40  ;;  %v517_v29 = vmul.f32 %v4559_v14, %v477_v39 }
  0x59   : > { %v522_v19 = vmul.f32 %v4561_v15, %v482_v46  ;;  %v524_v21 = vmul.f32 %v4561_v15, %v484_v52  ;;  %v520_v30 = vmul.f32 %v4561_v15, %v480_v42  ;;  %v518_v31 = vmul.f32 %v4561_v15, %v478_v41  ;;  %v4546_v52 = vld [vmem:[%s8248_s3] sm:$0xff]  }
  0x92   : > { %v566_v16 = vpop.permute.xlu1 %565  ;;  %v538_v17 = vpop.permute.xlu0 %537 }
  0x93   : > { %v549_v22 = vmul.f32 %v538_v17, %v521_v18  ;;  %v550_v23 = vmul.f32 %v538_v17, %v522_v19  ;;  %v605_v17 = vld [vmem:[%s8249_s4 + $0x40] sm:$0xff]  ;;  %v4551_v18 = vld [vmem:[%s8248_s3 + $0x28] sm:$0xff]  }
  0x94   : > { %v602_v19 = vld [vmem:[%s8249_s4 + $0x28] sm:$0xff] }
  0x95   : > { %v578_v36 = vadd.f32 %v566_v16, %v550_v23  ;;  %v577_v37 = vadd.f32 %v566_v16, %v549_v22 }
  0x96   : > { %v571_v24 = vpop.permute.xlu1 %570  ;;  %v543_v25 = vpop.permute.xlu0 %542 }
  0x97   : > { %v551_v26 = vmul.f32 %v543_v25, %v523_v20  ;;  %v552_v27 = vmul.f32 %v543_v25, %v524_v21  ;;  %v598_v20 = vld [vmem:[%s8249_s4 + $0x8] sm:$0xff] }
  0x99   : > { %v580_v32 = vadd.f32 %v571_v24, %v552_v27  ;;  %v579_v33 = vadd.f32 %v571_v24, %v551_v26 }
  0x9a   : > { %v533_v34 = vpop.permute.xlu1 %532  ;;  %v528_v35 = vpop.permute.xlu0 %527 }
  0x9b   : > { %v596_v38 = vpack.c.bf16 %v580_v32, %v578_v36  ;;  %v595_v43 = vpack.c.bf16 %v579_v33, %v577_v37  ;;  %v547_v44 = vmul.f32 %v533_v34, %v519_v28  ;;  %v548_v45 = vmul.f32 %v533_v34, %v520_v30 }
  0x9c   : > { %v545_v46 = vmul.f32 %v528_v35, %v517_v29  ;;  %v546_v47 = vmul.f32 %v528_v35, %v518_v31 }
  0x9d   : > { %730 = vmatprep.subr.bf16.mxu0 %v596_v38 }
  0x9e   : > { %v561_v48 = vpop.permute.xlu1 %560  ;;  %v556_v49 = vpop.permute.xlu0 %555  ;;  %731 = vmatpush1.bf16.msra.mxu0 %v595_v43 }
  0x9f   : > { %v575_v50 = vadd.f32 %v561_v48, %v547_v44  ;;  %v576_v40 = vadd.f32 %v561_v48, %v548_v45  ;;  %v573_v39 = vadd.f32 %v556_v49, %v545_v46  ;;  %v574_v42 = vadd.f32 %v556_v49, %v546_v47 }
  0xa1   : > { %v593_v41 = vpack.c.bf16 %v575_v50, %v573_v39  ;;  %v594_v51 = vpack.c.bf16 %v576_v40, %v574_v42 }
  0xa2   : > { %v612_v57 = vpop.permute.xlu1 %611  ;;  %v632_v10 = vpop.permute.xlu0 %631 }
  0xa3   : > { %732 = vmatprep.subr.bf16.mxu0 %v594_v51 }
  0xa4   : > { %733 = vmatpush1.bf16.msra.mxu0 %v593_v41 }
  0xa7   : > { %4393 = vmatmul.mubr.msk.bf16.vlgmr.msra.gmra.mxu0 %vm699_vm0, %v4546_v52 }
  0xa8   : > { %760 = vmatprep.mubr.bf16.mxu0 %v8262_v2 }
  0xaf   : > { %4394 = vmatmul.mubr.msk.bf16.gmra.mxu0 %vm699_vm0, %v4547_v53  ;;  %v606_v53 = vld [vmem:[%s8249_s4 + $0x48] sm:$0xff] }
  0xb0   : > { %770 = vmatprep.mubr.bf16.mxu0 %v8262_v2 }
  0xb7   : > { %4395 = vmatmul.mubr.msk.bf16.gmra.mxu0 %vm699_vm0, %v4548_v54  ;;  %v599_v54 = vld [vmem:[%s8249_s4 + $0x10] sm:$0xff] }
  0xb8   : > { %780 = vmatprep.mubr.bf16.mxu0 %v8262_v2 }
  0xbf   : > { %4396 = vmatmul.mubr.msk.bf16.gmra.mxu0 %vm699_vm0, %v4549_v55  ;;  %v603_v55 = vld [vmem:[%s8249_s4 + $0x30] sm:$0xff] }
  0xc0   : > { %790 = vmatprep.mubr.bf16.mxu0 %v8262_v2 }
  0xc7   : > { %4397 = vmatmul.mubr.msk.bf16.gmra.mxu0 %vm699_vm0, %v4550_v56 }
  0xc8   : > { %800 = vmatprep.mubr.bf16.mxu0 %v8262_v2 }
  0xcf   : > { %4398 = vmatmul.mubr.msk.bf16.gmra.mxu0 %vm699_vm0, %v4551_v18 }
 0x167   : > { %v752_v58 = vpop.f32.mrf.mxu0 }
 0x168   : > { %v753_v59 = vadd.f32 %v752_v58, %v612_v57 }
 0x169   : > { %v754_v60 = vpop.f32.mrf.mxu0 }
 0x16a   : > { %v811_v61 = vmul.f32 0.35355338, %v753_v59  ;;  %v755_v62 = vadd.f32 %v754_v60, %v612_v57 }
 0x16b   : > { %v5392_v63 = vpop.f32.mrf.mxu0 }
 0x16c   : > { %8368 = vst [vmem:[#allocation8_spill] sm:$0xff] %v5392_v63  ;;  %v819_v0 = vpack.c.bf16 %v811_v61, %v811_v61  ;;  %v812_v1 = vmul.f32 0.35355338, %v755_v62 }
 0x16d   : > { %v5394_v3 = vpop.f32.mrf.mxu0 }
 0x16e   : > { %8369 = vst [vmem:[#allocation9_spill] sm:$0xff] %v5394_v3  ;;  %v820_v4 = vpack.c.bf16 %v812_v1, %v812_v1  ;;  %v908_v6 = vsel %vm906_vm1, %v819_v0, 0 }
 0x16f   : > { %v5396_v5 = vpop.f32.mrf.mxu0 }
 0x170   : > { %8370 = vst [vmem:[#allocation10_spill] sm:$0xff] %v5396_v5  ;;  %4399 = vmatprep.subr.msk.bf16.mxu1 %vm906_vm1, %v820_v4 }
 0x171   : > { %v5400_v7 = vpop.f32.mrf.mxu0  ;;  %928 = vmatpush1.bf16.msra.mxu1 %v908_v6 }
 0x172   : > { %8371 = vst [vmem:[#allocation11_spill] sm:$0xff] %v5400_v7 }
 0x173   : > { %v5402_v8 = vpop.f32.mrf.mxu0 }
 0x174   : > { %8372 = vst [vmem:[#allocation12_spill] sm:$0xff] %v5402_v8 }
 0x175   : > { %v5404_v9 = vpop.f32.mrf.mxu0 }
 0x176   : > { %8373 = vst [vmem:[#allocation13_spill] sm:$0xff] %v5404_v9  ;;  %v607_v9 = vld [vmem:[%s8249_s4 + $0x50] sm:$0xff] }
 0x177   : > { %v772_v11 = vpop.f32.mrf.mxu0 }
 0x178   : > { %v773_v12 = vadd.f32 %v772_v11, %v632_v10 }
 0x179   : > { %v774_v13 = vpop.f32.mrf.mxu0 }
 0x17a   : > { %v821_v14 = vpack.c.bf16 %v773_v12, %v773_v12  ;;  %v775_v15 = vadd.f32 %v774_v13, %v632_v10 }
 0x17b   : > { %v776_v30 = vpop.f32.mrf.mxu0 }
 0x17c   : > { %v822_v16 = vpack.c.bf16 %v775_v15, %v775_v15  ;;  %825 = vxpose.xlu0.c.b16.start.end [1/1] (short) %v821_v14, 128 }
 0x17d   : > { %v778_v31 = vpop.f32.mrf.mxu0 }
 0x17e   : > { %841 = vxpose.xlu1.c.b16.start.end [1/1] (short) %v822_v16, 128 }
 0x17f   : > { %v5429_v33 = vpop.f32.mrf.mxu0 }
 0x181   : > { %v5432_v36 = vpop.f32.mrf.mxu0 }
 0x183   : > { %v5435_v37 = vpop.f32.mrf.mxu0 }
 0x184   : > { %8374 = vst [vmem:[#allocation14_spill] sm:$0xff] %v5435_v37 }
 0x185   : > { %v5438_v44 = vpop.f32.mrf.mxu0 }
 0x186   : > { %8375 = vst [vmem:[#allocation15_spill] sm:$0xff] %v5438_v44 }
 0x187   : > { %v5441_v46 = vpop.f32.mrf.mxu0 }
 0x188   : > { %8376 = vst [vmem:[#allocation16_spill] sm:$0xff] %v5441_v46 }
 0x189   : > { %v794_v48 = vpop.f32.mrf.mxu0 }
 0x19e   : > { %651 = vperm.xlu1 %4545, %v605_v17  }
 0x1a1   : > { %636 = vperm.xlu0 %4544, %v602_v19  }
 0x1a5   : > { %616 = vperm.xlu0 %4544, %v598_v20  }
 0x1de   : > { %v833_v21 = vpop.trf.xlu0 }
 0x1df   : > { %4400 = vmatmul.mubr.msk.bf16.vlgmr.msra.gmra.mxu1 %vm857_vm2, %v833_v21 }
 0x1e0   : > { %955 = vmatprep.mubr.bf16.mxu1 %v8262_v2  ;;  %v849_v23 = vpop.trf.xlu1 }
 0x1e2   : > { %v834_v22 = vpop.trf.xlu0 }
 0x1e4   : > { %v850_v25 = vpop.trf.xlu1 }
 0x1e6   : > { %v835_v24 = vpop.trf.xlu0 }
 0x1e7   : > { %4401 = vmatmul.mubr.msk.bf16.gmra.mxu1 %vm857_vm2, %v834_v22 }
 0x1e8   : > { %965 = vmatprep.mubr.bf16.mxu1 %v8262_v2  ;;  %v851_v27 = vpop.trf.xlu1 }
 0x1ea   : > { %v836_v26 = vpop.trf.xlu0 }
 0x1ec   : > { %v852_v28 = vpop.trf.xlu1 }
 0x1ee   : > { %v837_v29 = vpop.trf.xlu0 }
 0x1ef   : > { %4402 = vmatmul.mubr.msk.bf16.gmra.mxu1 %vm857_vm2, %v835_v24 }
 0x1f0   : > { %975 = vmatprep.mubr.bf16.mxu1 %v8262_v2  ;;  %v853_v32 = vpop.trf.xlu1 }
 0x1f2   : > { %v838_v34 = vpop.trf.xlu0 }
 0x1f4   : > { %v854_v35 = vpop.trf.xlu1 }
 0x1f6   : > { %v839_v38 = vpop.trf.xlu0 }
 0x1f7   : > { %4403 = vmatmul.mubr.msk.bf16.gmra.mxu1 %vm857_vm2, %v836_v26 }
 0x1f8   : > { %985 = vmatprep.mubr.bf16.mxu1 %v8262_v2  ;;  %v855_v43 = vpop.trf.xlu1 }
 0x1fa   : > { %v840_v47 = vpop.trf.xlu0 }
 0x1fc   : > { %v856_v45 = vpop.trf.xlu1 }
 0x1ff   : > { %4404 = vmatmul.mubr.msk.bf16.gmra.mxu1 %vm857_vm2, %v837_v29 }
 0x200   : > { %995 = vmatprep.mubr.bf16.mxu1 %v8262_v2 }
 0x207   : > { %4405 = vmatmul.mubr.msk.bf16.gmra.mxu1 %vm857_vm2, %v838_v34 }
 0x208   : > { %1005 = vmatprep.mubr.bf16.mxu1 %v8262_v2 }
 0x20f   : > { %4406 = vmatmul.mubr.msk.bf16.gmra.mxu1 %vm857_vm2, %v839_v38 }
 0x210   : > { %1015 = vmatprep.mubr.bf16.mxu1 %v8262_v2 }
 0x217   : > { %4407 = vmatmul.mubr.msk.bf16.gmra.mxu1 %vm857_vm2, %v840_v47 }
 0x218   : > { %1025 = vmatprep.mubr.bf16.mxu1 %v8262_v2 }
 0x219   : > { %v5445_v49 = vpop.permute.xlu1 %651 }
 0x21a   : > { %8377 = vst [vmem:[#allocation17_spill] sm:$0xff] %v5445_v49  ;;  %v795_v50 = vadd.f32 %v794_v48, %v5445_v49 }
 0x21c   : > { %v824_v40 = vpack.c.bf16 %v795_v50, %v795_v50  ;;  %v637_v39 = vpop.permute.xlu0 %636 }
 0x21d   : > { %v777_v42 = vadd.f32 %v776_v30, %v637_v39  ;;  %v779_v41 = vadd.f32 %v778_v31, %v637_v39 }
 0x21e   : > { %1510 = vmatprep.mubr.bf16.mxu0 %v824_v40 }
 0x21f   : > { %v1525_v51 = vpack.c.bf16 %v777_v42, %v777_v42  ;;  %v1526_v52 = vpack.c.bf16 %v779_v41, %v779_v41  ;;  %4408 = vmatmul.mubr.msk.bf16.gmra.mxu1 %vm857_vm2, %v849_v23 }
 0x220   : > { %1035 = vmatprep.mubr.bf16.mxu1 %v8262_v2  ;;  %v5474_v57 = vpop.permute.xlu0 %616 }
 0x221   : > { %1545 = vxpose.xlu0.c.b16.start.end [1/1] (short) %v1526_v52, 128  ;;  %1529 = vxpose.xlu1.c.b16.start.end [1/1] (short) %v1525_v51, 128  ;;  %8379 = vst [vmem:[#allocation19_spill] sm:$0xff] %v5474_v57 }
 0x227   : > { %4409 = vmatmul.mubr.msk.bf16.gmra.mxu1 %vm857_vm2, %v850_v25 }
 0x228   : > { %1045 = vmatprep.mubr.bf16.mxu1 %v8262_v2 }
 0x22f   : > { %4410 = vmatmul.mubr.msk.bf16.gmra.mxu1 %vm857_vm2, %v851_v27  ;;  %v5528_v27 = vpop.f32.mrf.mxu0 }
 0x230   : > { %1055 = vmatprep.mubr.bf16.mxu1 %v8262_v2  ;;  %8396 = vst [vmem:[#allocation36_spill] sm:$0xff] %v5528_v27 }
 0x231   : > { %v798_v30 = vpop.f32.mrf.mxu0 }
 0x237   : > { %4411 = vmatmul.mubr.msk.bf16.gmra.mxu1 %vm857_vm2, %v852_v28 }
 0x238   : > { %1065 = vmatprep.mubr.bf16.mxu1 %v8262_v2 }
 0x23f   : > { %4412 = vmatmul.mubr.msk.bf16.gmra.mxu1 %vm857_vm2, %v853_v32 }
 0x240   : > { %1075 = vmatprep.mubr.bf16.mxu1 %v8262_v2 }
 0x241   : > { %656 = vperm.xlu1 %4545, %v606_v53  }
 0x245   : > { %621 = vperm.xlu1 %4545, %v599_v54  }
 0x246   : > { %641 = vperm.xlu0 %4544, %v603_v55  }
 0x247   : > { %4413 = vmatmul.mubr.msk.bf16.gmra.mxu1 %vm857_vm2, %v854_v35 }
 0x248   : > { %1085 = vmatprep.mubr.bf16.mxu1 %v8262_v2 }
 0x24f   : > { %4414 = vmatmul.mubr.msk.bf16.gmra.mxu1 %vm857_vm2, %v855_v43 }
 0x250   : > { %1095 = vmatprep.mubr.bf16.mxu1 %v8262_v2 }
 0x257   : > { %4415 = vmatmul.mubr.msk.bf16.gmra.mxu1 %vm857_vm2, %v856_v45 }
 0x283   : > { %v5472_v56 = vpop.trf.xlu1  ;;  %v5476_v58 = vpop.trf.xlu0 }
 0x284   : > { %8378 = vst [vmem:[#allocation18_spill] sm:$0xff] %v5472_v56  ;;  %8380 = vst [vmem:[#allocation20_spill] sm:$0xff] %v5476_v58 }
 0x287   : > { %v5478_v59 = vpop.trf.xlu1  ;;  %v5480_v60 = vpop.trf.xlu0 }
 0x288   : > { %8381 = vst [vmem:[#allocation21_spill] sm:$0xff] %v5478_v59  ;;  %8382 = vst [vmem:[#allocation22_spill] sm:$0xff] %v5480_v60 }
 0x28b   : > { %v5482_v61 = vpop.trf.xlu1  ;;  %v5484_v62 = vpop.trf.xlu0 }
 0x28c   : > { %8383 = vst [vmem:[#allocation23_spill] sm:$0xff] %v5482_v61  ;;  %8384 = vst [vmem:[#allocation24_spill] sm:$0xff] %v5484_v62 }
 0x28f   : > { %v5486_v0 = vpop.trf.xlu1  ;;  %v5494_v10 = vpop.trf.xlu0 }
 0x290   : > { %8385 = vst [vmem:[#allocation25_spill] sm:$0xff] %v5486_v0  ;;  %8386 = vst [vmem:[#allocation26_spill] sm:$0xff] %v5494_v10 }
 0x293   : > { %v5496_v11 = vpop.trf.xlu1  ;;  %v5504_v15 = vpop.trf.xlu0 }
 0x294   : > { %8387 = vst [vmem:[#allocation27_spill] sm:$0xff] %v5496_v11  ;;  %8388 = vst [vmem:[#allocation28_spill] sm:$0xff] %v5504_v15 }
 0x297   : > { %v5506_v16 = vpop.trf.xlu1  ;;  %v5514_v20 = vpop.trf.xlu0 }
 0x298   : > { %8389 = vst [vmem:[#allocation29_spill] sm:$0xff] %v5506_v16  ;;  %8391 = vst [vmem:[#allocation31_spill] sm:$0xff] %v5514_v20 }
 0x29b   : > { %v5516_v21 = vpop.trf.xlu1  ;;  %v5524_v25 = vpop.trf.xlu0 }
 0x29c   : > { %8392 = vst [vmem:[#allocation32_spill] sm:$0xff] %v5516_v21  ;;  %8394 = vst [vmem:[#allocation34_spill] sm:$0xff] %v5524_v25 }
 0x29f   : > { %v5488_v1 = vpop.f32.mrf.mxu1  ;;  %v5526_v26 = vpop.trf.xlu1 }
 0x2a0   : > { %8395 = vst [vmem:[#allocation35_spill] sm:$0xff] %v5526_v26  ;;  %v5536_v32 = vpop.trf.xlu0 }
 0x2a1   : > { %v5490_v4 = vpop.f32.mrf.mxu1  ;;  %8397 = vst [vmem:[#allocation37_spill] sm:$0xff] %v5536_v32  ;;  %v600_v32 = vld [vmem:[%s8249_s4 + $0x18] sm:$0xff] }
 0x2a3   : > { %v5492_v6 = vpop.f32.mrf.mxu1 }
 0x2a5   : > { %v5498_v12 = vpop.f32.mrf.mxu1 }
 0x2a7   : > { %v5500_v13 = vpop.f32.mrf.mxu1 }
 0x2a9   : > { %v5502_v14 = vpop.f32.mrf.mxu1 }
 0x2ab   : > { %v5508_v17 = vpop.f32.mrf.mxu1 }
 0x2ac   : > { %v1107_v21 = vmax.f32 %v5492_v6, %v5508_v17 }
 0x2ad   : > { %v5510_v18 = vpop.f32.mrf.mxu1 }
 0x2ae   : > { %8390 = vst [vmem:[#allocation30_spill] sm:$0xff] %v5510_v18 }
 0x2af   : > { %v5512_v19 = vpop.f32.mrf.mxu1 }
 0x2b1   : > { %v5518_v22 = vpop.f32.mrf.mxu1 }
 0x2b3   : > { %v5520_v23 = vpop.f32.mrf.mxu1 }
 0x2b4   : > { %v1109_v0 = vmax.f32 %v1107_v21, %v5520_v23 }
 0x2b5   : > { %v5522_v24 = vpop.f32.mrf.mxu1 }
 0x2b6   : > { %8393 = vst [vmem:[#allocation33_spill] sm:$0xff] %v5522_v24 }
 0x2b7   : > { %v5530_v28 = vpop.f32.mrf.mxu1 }
 0x2b9   : > { %v5532_v29 = vpop.f32.mrf.mxu1 }
 0x2bb   : > { %v5534_v31 = vpop.f32.mrf.mxu1 }
 0x2bc   : > { %v5538_v34 = vpop.permute.xlu1 %656  ;;  %v1111_v56 = vmax.f32 %v1109_v0, %v5534_v31 }
 0x2bd   : > { %8398 = vst [vmem:[#allocation38_spill] sm:$0xff] %v5538_v34  ;;  %v799_v35 = vadd.f32 %v798_v30, %v5538_v34  ;;  %v5541_v38 = vpop.f32.mrf.mxu1  ;;  %v604_v34 = vld [vmem:[%s8249_s4 + $0x38] sm:$0xff] }
 0x2be   : > { %8399 = vst [vmem:[#allocation39_spill] sm:$0xff] %v5541_v38 }
 0x2bf   : > { %v1528_v43 = vpack.c.bf16 %v799_v35, %v799_v35  ;;  %v5543_v45 = vpop.f32.mrf.mxu1 }
 0x2c0   : > { %8400 = vst [vmem:[#allocation40_spill] sm:$0xff] %v5543_v45 }
 0x2c1   : > { %v642_v47 = vpop.permute.xlu0 %641  ;;  %v5545_v48 = vpop.f32.mrf.mxu1  ;;  %2212 = vmatprep.mubr.bf16.mxu1 %v1528_v43 }
 0x2c2   : > { %8401 = vst [vmem:[#allocation41_spill] sm:$0xff] %v5545_v48  ;;  %v783_v50 = vadd.f32 %v5429_v33, %v642_v47  ;;  %v785_v40 = vadd.f32 %v5432_v36, %v642_v47 }
 0x2c3   : > { %v5549_v39 = vpop.f32.mrf.mxu1 }
 0x2c4   : > { %v2227_v42 = vpack.c.bf16 %v783_v50, %v783_v50  ;;  %v2228_v41 = vpack.c.bf16 %v785_v40, %v785_v40  ;;  %v1113_v3 = vmax.f32 %v1111_v56, %v5549_v39 }
 0x2c5   : > { %v5551_v51 = vpop.f32.mrf.mxu1 }
 0x2c6   : > { %8402 = vst [vmem:[#allocation42_spill] sm:$0xff] %v5551_v51  ;;  %2247 = vxpose.xlu1.c.b16.start.end [1/1] (short) %v2228_v41, 128  ;;  %2231 = vxpose.xlu0.c.b16.start.end [1/1] (short) %v2227_v42, 128 }
 0x2c7   : > { %v5553_v52 = vpop.f32.mrf.mxu1 }
 0x2c8   : > { %8403 = vst [vmem:[#allocation43_spill] sm:$0xff] %v5553_v52 }
 0x2c9   : > { %v5555_v53 = vpop.f32.mrf.mxu1 }
 0x2cb   : > { %v5557_v54 = vpop.f32.mrf.mxu1 }
 0x2cd   : > { %v5559_v55 = vpop.f32.mrf.mxu1 }
 0x2cf   : > { %v5561_v30 = vpop.f32.mrf.mxu1 }
 0x2d0   : > { %8404 = vst [vmem:[#allocation44_spill] sm:$0xff] %v5561_v30 }
 0x2d1   : > { %v5563_v33 = vpop.f32.mrf.mxu1 }
 0x2d3   : > { %v5565_v36 = vpop.f32.mrf.mxu1 }
 0x2d5   : > { %v5567_v35 = vpop.f32.mrf.mxu1 }
 0x2d7   : > { %v5569_v43 = vpop.f32.mrf.mxu1 }
 0x2d9   : > { %v5571_v47 = vpop.f32.mrf.mxu1 }
 0x2db   : > { %v5573_v50 = vpop.f32.mrf.mxu1 }
 0x2dc   : > { %8405 = vst [vmem:[#allocation45_spill] sm:$0xff] %v5573_v50 }
 0x2dd   : > { %v5575_v40 = vpop.f32.mrf.mxu1 }
 0x2df   : > { %v5577_v42 = vpop.f32.mrf.mxu1 }
 0x2e1   : > { %v5579_v41 = vpop.f32.mrf.mxu1 }
 0x2e3   : > { %v5581_v2 = vpop.f32.mrf.mxu1 }
 0x2e5   : > { %v5586_v8 = vpop.f32.mrf.mxu1 }
 0x2e6   : > { %661 = vperm.xlu1 %4545, %v607_v9  }
 0x2e7   : > { %v5588_v27 = vpop.f32.mrf.mxu1 }
 0x2e8   : > { %8406 = vst [vmem:[#allocation46_spill] sm:$0xff] %v5588_v27 }
 0x2e9   : > { %v5593_v7 = vpop.f32.mrf.mxu1 }
 0x2eb   : > { %646 = vperm.xlu0 %4544, %v604_v34   ;;  %v5595_v5 = vpop.f32.mrf.mxu1 }
 0x2ec   : > { %8407 = vst [vmem:[#allocation47_spill] sm:$0xff] %v5595_v5 }
 0x2ed   : > { %v5600_v25 = vpop.f32.mrf.mxu1 }
 0x2ef   : > { %626 = vperm.xlu0 %4544, %v600_v32   ;;  %v5602_v20 = vpop.f32.mrf.mxu1  ;;  %v1106_v32 = vmax.f32 %v5488_v1, %v5500_v13 }
 0x2f0   : > { %8408 = vst [vmem:[#allocation48_spill] sm:$0xff] %v5602_v20 }
 0x2f1   : > { %v5604_v9 = vpop.f32.mrf.mxu1  ;;  %v1108_v11 = vmax.f32 %v1106_v32, %v5512_v19  ;;  %v1115_v32 = vmax.f32 %v1113_v3, %v5557_v54 }
 0x2f3   : > { %v5606_v15 = vpop.f32.mrf.mxu1  ;;  %v1110_v59 = vmax.f32 %v1108_v11, %v5530_v28  ;;  %v1117_v11 = vmax.f32 %v1115_v32, %v5565_v36  ;;  %v1144_v32 = vmax.f32 %v5498_v12, %v5510_v18 }
 0x2f4   : > { %8409 = vst [vmem:[#allocation49_spill] sm:$0xff] %v5606_v15 }
 0x2f5   : > { %v5608_v10 = vpop.f32.mrf.mxu1  ;;  %v1112_v49 = vmax.f32 %v1110_v59, %v5543_v45  ;;  %v1119_v59 = vmax.f32 %v1117_v11, %v5573_v50 }
 0x2f7   : > { %v5610_v62 = vpop.f32.mrf.mxu1  ;;  %v1114_v57 = vmax.f32 %v1112_v49, %v5553_v52  ;;  %v1121_v49 = vmax.f32 %v1119_v59, %v5581_v2  ;;  %v1146_v59 = vmax.f32 %v1144_v32, %v5522_v24 }
 0x2f9   : > { %v5612_v34 = vpop.f32.mrf.mxu1  ;;  %v1116_v21 = vmax.f32 %v1114_v57, %v5561_v30  ;;  %v1123_v57 = vmax.f32 %v1121_v49, %v5595_v5  ;;  %v1148_v18 = vmax.f32 %v1146_v59, %v5541_v38 }
 0x2fb   : > { %v5614_v60 = vpop.f32.mrf.mxu1  ;;  %v1118_v0 = vmax.f32 %v1116_v21, %v5569_v43  ;;  %v1125_v11 = vmax.f32 %v1123_v57, %v5606_v15  ;;  %v1150_v32 = vmax.f32 %v1148_v18, %v5551_v51 }
 0x2fd   : > { %v5616_v58 = vpop.f32.mrf.mxu1  ;;  %v1120_v56 = vmax.f32 %v1118_v0, %v5577_v42  ;;  %v1143_v0 = vmax.f32 %v5490_v4, %v5502_v14  ;;  %v1127_v49 = vmax.f32 %v1125_v11, %v5614_v60  ;;  %v1152_v59 = vmax.f32 %v1150_v32, %v5559_v55 }
 0x2ff   : > { %v5618_v26 = vpop.f32.mrf.mxu1  ;;  %v1122_v3 = vmax.f32 %v1120_v56, %v5588_v27  ;;  %v1145_v27 = vmax.f32 %v1143_v0, %v5518_v22  ;;  %v1154_v18 = vmax.f32 %v1152_v59, %v5567_v35 }
 0x301   : > { %v5624_v16 = vpop.f32.mrf.mxu1  ;;  %v1124_v21 = vmax.f32 %v1122_v3, %v5602_v20  ;;  %v1147_v20 = vmax.f32 %v1145_v27, %v5532_v29 }
 0x303   : > { %v5628_v61 = vpop.f32.mrf.mxu1  ;;  %v1126_v56 = vmax.f32 %v1124_v21, %v5610_v62  ;;  %v1149_v0 = vmax.f32 %v1147_v20, %v5545_v48  ;;  %v1156_v20 = vmax.f32 %v1154_v18, %v5575_v40 }
 0x304   : > { %v1129_v57 = vmax.f32 %v1127_v49, %v5628_v61 }
 0x305   : > { %v5632_v46 = vpop.f32.mrf.mxu1  ;;  %v1128_v3 = vmax.f32 %v1126_v56, %v5618_v26  ;;  %v1151_v27 = vmax.f32 %v1149_v0, %v5555_v53 }
 0x307   : > { %v5636_v63 = vpop.f32.mrf.mxu1  ;;  %v1153_v51 = vmax.f32 %v1151_v27, %v5563_v33 }
 0x308   : > { %v1130_v21 = vmax.f32 %v1128_v3, %v5636_v63 }
 0x309   : > { %v5640_v44 = vpop.f32.mrf.mxu1  ;;  %v1155_v32 = vmax.f32 %v1153_v51, %v5571_v47 }
 0x30b   : > { %v5644_v37 = vpop.f32.mrf.mxu1 }
 0x30c   : > { %v1131_v11 = vmax.f32 %v1129_v57, %v5644_v37 }
 0x30d   : > { %v5648_v45 = vpop.f32.mrf.mxu1 }
 0x30f   : > { %v5652_v52 = vpop.f32.mrf.mxu1 }
 0x310   : > { %8410 = vst [vmem:[#allocation50_spill] sm:$0xff] %v5652_v52  ;;  %v1132_v56 = vmax.f32 %v1130_v21, %v5652_v52  ;;  %v1158_v21 = vmax.f32 %v1156_v20, %v5586_v8 }
 0x311   : > { %v5656_v30 = vpop.f32.mrf.mxu1 }
 0x312   : > { %v1160_v0 = vmax.f32 %v1158_v21, %v5600_v25 }
 0x313   : > { %v5662_v50 = vpop.f32.mrf.mxu1 }
 0x314   : > { %8411 = vst [vmem:[#allocation51_spill] sm:$0xff] %v5662_v50  ;;  %v1133_v49 = vmax.f32 %v1131_v11, %v5662_v50  ;;  %v1157_v50 = vmax.f32 %v1155_v32, %v5579_v41 }
 0x315   : > { %v5669_v5 = vpop.f32.mrf.mxu1 }
 0x316   : > { %v1159_v59 = vmax.f32 %v1157_v50, %v5593_v7 }
 0x317   : > { %v5675_v15 = vpop.f32.mrf.mxu1 }
 0x318   : > { %v1134_v3 = vmax.f32 %v1132_v56, %v5675_v15  ;;  %v1162_v56 = vmax.f32 %v1160_v0, %v5608_v10  ;;  %v1161_v27 = vmax.f32 %v1159_v59, %v5604_v9 }
 0x319   : > { %v5681_v24 = vpop.f32.mrf.mxu1 }
 0x31a   : > { %v1164_v18 = vmax.f32 %v1162_v56, %v5616_v58  ;;  %v1163_v51 = vmax.f32 %v1161_v27, %v5612_v34 }
 0x31b   : > { %v5687_v38 = vpop.f32.mrf.mxu1 }
 0x31c   : > { %v1135_v57 = vmax.f32 %v1133_v49, %v5687_v38  ;;  %v1165_v32 = vmax.f32 %v1163_v51, %v5624_v16 }
 0x31e   : > { %v1136_v48 = vmax.f32 %v1134_v3, %v1135_v57  ;;  %v1166_v57 = vmax.f32 %v1164_v18, %v5632_v46  ;;  %v1167_v50 = vmax.f32 %v1165_v32, %v5640_v44 }
 0x320   : > { %v1137_v11 = vrot.slane %v1136_v48, 4  ;;  %v1168_v21 = vmax.f32 %v1166_v57, %v5648_v45  ;;  %v1169_v59 = vmax.f32 %v1167_v50, %v5656_v30 }
 0x322   : > { %v1138_v52 = vmax.f32 %v1136_v48, %v1137_v11  ;;  %v5707_v48 = vpop.f32.mrf.mxu1  ;;  %v1170_v11 = vmax.f32 %v1168_v21, %v5669_v5  ;;  %v1171_v56 = vmax.f32 %v1169_v59, %v5681_v24 }
 0x324   : > { %v1139_v49 = vrot.slane %v1138_v52, 2 }
 0x326   : > { %v1140_v3 = vmax.f32 %v1138_v52, %v1139_v49  ;;  %v1172_v52 = vmax.f32 %v1170_v11, %v5707_v48 }
 0x328   : > { %v1141_v20 = vrot.slane %v1140_v3, 1  ;;  %v1173_v51 = vmax.f32 %v1171_v56, %v1172_v52  ;;  %v5726_v11 = vpop.trf.xlu0 }
 0x329   : > { %8412 = vst [vmem:[#allocation52_spill] sm:$0xff] %v5726_v11 }
 0x32a   : > { %v5711_v0 = vmax.f32 %v1140_v3, %v1141_v20  ;;  %v1174_v50 = vrot.slane %v1173_v51, 4 }
 0x32c   : > { %v1180_v49 = vsub.f32 %v5488_v1, %v5711_v0  ;;  %v1182_v27 = vsub.f32 %v5492_v6, %v5711_v0  ;;  %v1184_v18 = vsub.f32 %v5500_v13, %v5711_v0  ;;  %v1186_v3 = vsub.f32 %v5508_v17, %v5711_v0  ;;  %v5734_v56 = vpop.trf.xlu0 }
 0x32d   : > { %v1188_v32 = vsub.f32 %v5512_v19, %v5711_v0  ;;  %v1190_v1 = vsub.f32 %v5520_v23, %v5711_v0  ;;  %v1192_v13 = vsub.f32 %v5530_v28, %v5711_v0  ;;  %v1175_v59 = vmax.f32 %v1173_v51, %v1174_v50  ;;  %8413 = vst [vmem:[#allocation53_spill] sm:$0xff] %v5734_v56  ;;  %v8415_v28 = vld [vmem:[#allocation43_spill] sm:$0xff] }
 0x32e   : > { %v1244_v57 = vmul.f32 1.442695, %v1180_v49  ;;  %v1248_v20 = vmul.f32 1.442695, %v1182_v27  ;;  %v1252_v21 = vmul.f32 1.442695, %v1184_v18  ;;  %v1194_v52 = vsub.f32 %v5534_v31, %v5711_v0 }
 0x32f   : > { %v1256_v6 = vmul.f32 1.442695, %v1186_v3  ;;  %v1260_v17 = vmul.f32 1.442695, %v1188_v32  ;;  %v1264_v19 = vmul.f32 1.442695, %v1190_v1  ;;  %v1198_v18 = vsub.f32 %v5549_v39, %v5711_v0 }
 0x330   : > { %4562 = vpow2.f32 %v1244_v57  ;;  %v8414_v49 = vld [vmem:[#allocation40_spill] sm:$0xff]  ;;  %v1268_v23 = vmul.f32 1.442695, %v1192_v13  ;;  %v1176_v3 = vrot.slane %v1175_v59, 2  ;;  %v1200_v57 = vsub.f32 %v8415_v28, %v5711_v0  ;;  %v5748_v39 = vpop.trf.xlu0 }
 0x331   : > { %4564 = vpow2.f32 %v1248_v20  ;;  %v1196_v27 = vsub.f32 %v8414_v49, %v5711_v0  ;;  %v1272_v51 = vmul.f32 1.442695, %v1194_v52  ;;  %v1202_v31 = vsub.f32 %v5557_v54, %v5711_v0  ;;  %v8416_v20 = vld [vmem:[#allocation44_spill] sm:$0xff]  ;;  %8417 = vst [vmem:[#allocation40_spill] sm:$0xff] %v5748_v39 }
 0x332   : > { %4566 = vpow2.f32 %v1252_v21  ;;  %v1204_v32 = vsub.f32 %v8416_v20, %v5711_v0  ;;  %v1206_v50 = vsub.f32 %v5565_v36, %v5711_v0  ;;  %v1280_v1 = vmul.f32 1.442695, %v1198_v18 }
 0x333   : > { %4568 = vpow2.f32 %v1256_v6  ;;  %v1276_v21 = vmul.f32 1.442695, %v1196_v27  ;;  %v1177_v6 = vmax.f32 %v1175_v59, %v1176_v3  ;;  %v1284_v52 = vmul.f32 1.442695, %v1200_v57 }
 0x334   : > { %4570 = vpow2.f32 %v1260_v17  ;;  %v1208_v17 = vsub.f32 %v5569_v43, %v5711_v0  ;;  %v1288_v49 = vmul.f32 1.442695, %v1202_v31  ;;  %v1226_v36 = vsub.f32 %v5614_v60, %v5711_v0  ;;  %v5773_v20 = vpop.trf.xlu0 }
 0x335   : > { %4572 = vpow2.f32 %v1264_v19  ;;  %v1224_v19 = vsub.f32 %v5610_v62, %v5711_v0  ;;  %v1292_v59 = vmul.f32 1.442695, %v1204_v32  ;;  %v1228_v43 = vsub.f32 %v5618_v26, %v5711_v0  ;;  %8420 = vst [vmem:[#allocation54_spill] sm:$0xff] %v5773_v20 }
 0x336   : > { %4574 = vpow2.f32 %v1268_v23  ;;  %v1296_v18 = vmul.f32 1.442695, %v1206_v50  ;;  %v1178_v3 = vrot.slane %v1177_v6, 1  ;;  %v1230_v62 = vsub.f32 %v5628_v61, %v5711_v0  ;;  %v8421_v50 = vld [vmem:[#allocation45_spill] sm:$0xff] }
 0x337   : > { %4576 = vpow2.f32 %v1272_v51  ;;  %v1300_v28 = vmul.f32 1.442695, %v1208_v17  ;;  %v1232_v51 = vsub.f32 %v5636_v63, %v5711_v0  ;;  %v1332_v31 = vmul.f32 1.442695, %v1224_v19 }
 0x338   : > { %4578 = vpow2.f32 %v1276_v21  ;;  %v1234_v26 = vsub.f32 %v5644_v37, %v5711_v0  ;;  %v1336_v32 = vmul.f32 1.442695, %v1226_v36  ;;  %v1340_v17 = vmul.f32 1.442695, %v1228_v43 }
 0x339   : > { %4580 = vpow2.f32 %v1280_v1  ;;  %v1210_v1 = vsub.f32 %v8421_v50, %v5711_v0  ;;  %v1212_v63 = vsub.f32 %v5577_v42, %v5711_v0  ;;  %v1344_v19 = vmul.f32 1.442695, %v1230_v62 }
 0x33a   : > { %4582 = vpow2.f32 %v1284_v52  ;;  %v5782_v52 = vmax.f32 %v1177_v6, %v1178_v3  ;;  %v1214_v36 = vsub.f32 %v5581_v2, %v5711_v0  ;;  %v1352_v6 = vmul.f32 1.442695, %v1234_v26  ;;  %v8424_v26 = vld [vmem:[#allocation47_spill] sm:$0xff] }
 0x33b   : > { %4584 = vpow2.f32 %v1288_v49  ;;  %v1304_v42 = vmul.f32 1.442695, %v1210_v1 }
 0x33c   : > { %4586 = vpow2.f32 %v1292_v59  ;;  %v1348_v59 = vmul.f32 1.442695, %v1232_v51  ;;  %v1181_v62 = vsub.f32 %v5490_v4, %v5782_v52  ;;  %v1183_v51 = vsub.f32 %v5498_v12, %v5782_v52 }
 0x33d   : > { %v5750_v13 = vpop.eup %4562  ;;  %4588 = vpow2.f32 %v1296_v18  ;;  %v1185_v1 = vsub.f32 %v5502_v14, %v5782_v52  ;;  %v8427_v14 = vld [vmem:[#allocation49_spill] sm:$0xff] }
 0x33e   : > { %8418 = vst [vmem:[#allocation43_spill] sm:$0xff] %v5750_v13  ;;  %v5754_v54 = vpop.eup %4564  ;;  %4590 = vpow2.f32 %v1300_v28  ;;  %v5798_v28 = vpop.trf.xlu0  ;;  %v1246_v12 = vmul.f32 1.442695, %v1181_v62 }
 0x33f   : > { %8419 = vst [vmem:[#allocation44_spill] sm:$0xff] %v5754_v54  ;;  %v1372_v27 = vadd.f32 %v5754_v54, %v5750_v13  ;;  %v5762_v23 = vpop.eup %4566  ;;  %4592 = vpow2.f32 %v1332_v31  ;;  %8423 = vst [vmem:[#allocation45_spill] sm:$0xff] %v5798_v28  ;;  %v8443_v54 = vld [vmem:[#allocation15_spill] sm:$0xff] }
 0x340   : > { %v5769_v57 = vpop.eup %4568  ;;  %4594 = vpow2.f32 %v1336_v32  ;;  %v1218_v32 = vsub.f32 %v8424_v26, %v5711_v0 }
 0x341   : > { %v1373_v60 = vadd.f32 %v5762_v23, %v1372_v27  ;;  %v5778_v21 = vpop.eup %4570  ;;  %v8422_v27 = vld [vmem:[#allocation46_spill] sm:$0xff]  ;;  %4596 = vpow2.f32 %v1340_v17 }
 0x342   : > { %v5787_v49 = vpop.eup %4572  ;;  %v1216_v18 = vsub.f32 %v8422_v27, %v5711_v0  ;;  %4598 = vpow2.f32 %v1344_v19  ;;  %v5823_v26 = vpop.trf.xlu0 }
 0x343   : > { %v1374_v61 = vadd.f32 %v5769_v57, %v1373_v60  ;;  %v5794_v3 = vpop.eup %4574  ;;  %v1308_v60 = vmul.f32 1.442695, %v1212_v63  ;;  %4600 = vpow2.f32 %v1348_v59  ;;  %v8425_v63 = vld [vmem:[#allocation48_spill] sm:$0xff]  ;;  %v8426_v59 = vld [vmem:[#allocation30_spill] sm:$0xff]  ;;  %8428 = vst [vmem:[#allocation46_spill] sm:$0xff] %v5823_v26 }
 0x344   : > { %v5803_v31 = vpop.eup %4576  ;;  %v1316_v50 = vmul.f32 1.442695, %v1216_v18  ;;  %4602 = vpow2.f32 %v1352_v6  ;;  %v1220_v19 = vsub.f32 %v8425_v63, %v5711_v0  ;;  %v1187_v27 = vsub.f32 %v8426_v59, %v5782_v52  ;;  %v8429_v59 = vld [vmem:[#allocation33_spill] sm:$0xff] }
 0x345   : > { %v1375_v37 = vadd.f32 %v5778_v21, %v1374_v61  ;;  %v1312_v61 = vmul.f32 1.442695, %v1214_v36  ;;  %v5810_v17 = vpop.eup %4578  ;;  %4604 = vpow2.f32 %v1304_v42  ;;  %v1250_v18 = vmul.f32 1.442695, %v1183_v51 }
 0x346   : > { %4606 = vpow2.f32 %v1308_v60  ;;  %v1189_v60 = vsub.f32 %v5518_v22, %v5782_v52  ;;  %v1324_v51 = vmul.f32 1.442695, %v1220_v19  ;;  %v1191_v28 = vsub.f32 %v8429_v59, %v5782_v52  ;;  %v8431_v59 = vld [vmem:[#allocation41_spill] sm:$0xff] }
 0x347   : > { %v1376_v43 = vadd.f32 %v5787_v49, %v1375_v37  ;;  %v5814_v37 = vpop.eup %4580  ;;  %4608 = vpow2.f32 %v1312_v61  ;;  %v1197_v20 = vsub.f32 %v8431_v59, %v5782_v52 }
 0x348   : > { %v5819_v6 = vpop.eup %4582  ;;  %4610 = vpow2.f32 %v1316_v50  ;;  %v1193_v50 = vsub.f32 %v5532_v29, %v5782_v52  ;;  %v1205_v29 = vsub.f32 %v5563_v33, %v5782_v52  ;;  %v1209_v33 = vsub.f32 %v5571_v47, %v5782_v52 }
 0x349   : > { %v1377_v2 = vadd.f32 %v5794_v3, %v1376_v43  ;;  %v1222_v43 = vsub.f32 %v8427_v14, %v5711_v0  ;;  %v5825_v42 = vpop.eup %4584  ;;  %4612 = vpow2.f32 %v1246_v12 }
 0x34a   : > { %v5830_v63 = vpop.eup %4586  ;;  %4614 = vpow2.f32 %v1250_v18  ;;  %v1266_v18 = vmul.f32 1.442695, %v1191_v28  ;;  %v1294_v47 = vmul.f32 1.442695, %v1205_v29 }
 0x34b   : > { %v1378_v4 = vadd.f32 %v5803_v31, %v1377_v2  ;;  %v1320_v2 = vmul.f32 1.442695, %v1218_v32  ;;  %v5834_v61 = vpop.eup %4588  ;;  %v1328_v22 = vmul.f32 1.442695, %v1222_v43  ;;  %v5854_v43 = vpop.trf.xlu0 }
 0x34c   : > { %v5839_v14 = vpop.eup %4590  ;;  %8432 = vst [vmem:[#allocation47_spill] sm:$0xff] %v5854_v43 }
 0x34d   : > { %v1379_v36 = vadd.f32 %v5810_v17, %v1378_v4  ;;  %v1254_v4 = vmul.f32 1.442695, %v1185_v1  ;;  %4616 = vpow2.f32 %v1320_v2  ;;  %v8430_v1 = vld [vmem:[#allocation39_spill] sm:$0xff]  ;;  %v5843_v26 = vpop.eup %4592 }
 0x34e   : > { %v1195_v19 = vsub.f32 %v8430_v1, %v5782_v52  ;;  %v5848_v39 = vpop.eup %4594  ;;  %v1270_v1 = vmul.f32 1.442695, %v1193_v50  ;;  %v1302_v50 = vmul.f32 1.442695, %v1209_v33 }
 0x34f   : > { %v1380_v62 = vadd.f32 %v5814_v37, %v1379_v36  ;;  %v1258_v36 = vmul.f32 1.442695, %v1187_v27  ;;  %4618 = vpow2.f32 %v1254_v4  ;;  %v1207_v27 = vsub.f32 %v5567_v35, %v5782_v52  ;;  %v5856_v2 = vpop.eup %4596  ;;  %v5885_v56 = vpop.trf.xlu0 }
 0x350   : > { %4620 = vpow2.f32 %v1324_v51  ;;  %v5861_v4 = vpop.eup %4598  ;;  %v1211_v35 = vsub.f32 %v5575_v40, %v5782_v52  ;;  %v1274_v28 = vmul.f32 1.442695, %v1195_v19  ;;  %8435 = vst [vmem:[#allocation30_spill] sm:$0xff] %v5885_v56 }
 0x351   : > { %v1381_v32 = vadd.f32 %v5819_v6, %v1380_v62  ;;  %v1262_v62 = vmul.f32 1.442695, %v1189_v60  ;;  %4622 = vpow2.f32 %v1258_v36  ;;  %v5867_v51 = vpop.eup %4600  ;;  %v1278_v36 = vmul.f32 1.442695, %v1197_v20 }
 0x352   : > { %4624 = vpow2.f32 %v1328_v22  ;;  %v8433_v22 = vld [vmem:[#allocation42_spill] sm:$0xff]  ;;  %v1298_v19 = vmul.f32 1.442695, %v1207_v27  ;;  %v1306_v27 = vmul.f32 1.442695, %v1211_v35 }
 0x353   : > { %v1382_v12 = vadd.f32 %v5825_v42, %v1381_v32  ;;  %4626 = vpow2.f32 %v1262_v62  ;;  %v1199_v60 = vsub.f32 %v8433_v22, %v5782_v52 }
 0x354   : > { %4628 = vpow2.f32 %v1266_v18 }
 0x355   : > { %v1383_v32 = vadd.f32 %v5830_v63, %v1382_v12  ;;  %v5872_v12 = vpop.eup %4602  ;;  %4630 = vpow2.f32 %v1270_v1  ;;  %v1203_v1 = vsub.f32 %v5559_v55, %v5782_v52  ;;  %v1282_v62 = vmul.f32 1.442695, %v1199_v60 }
 0x356   : > { %v5876_v43 = vpop.eup %4604  ;;  %4632 = vpow2.f32 %v1274_v28  ;;  %v1240_v60 = vsub.f32 %v5675_v15, %v5711_v0 }
 0x357   : > { %v1384_v59 = vadd.f32 %v5834_v61, %v1383_v32  ;;  %v5881_v20 = vpop.eup %4606  ;;  %v1201_v32 = vsub.f32 %v5555_v53, %v5782_v52  ;;  %4634 = vpow2.f32 %v1278_v36  ;;  %v8438_v53 = vld [vmem:[#allocation50_spill] sm:$0xff]  ;;  %v1290_v35 = vmul.f32 1.442695, %v1203_v1 }
 0x358   : > { %8434 = vst [vmem:[#allocation48_spill] sm:$0xff] %v5881_v20  ;;  %v5887_v18 = vpop.eup %4608  ;;  %4636 = vpow2.f32 %v1294_v47  ;;  %v1236_v28 = vsub.f32 %v8438_v53, %v5711_v0  ;;  %v8441_v53 = vld [vmem:[#allocation51_spill] sm:$0xff] }
 0x359   : > { %v1385_v40 = vadd.f32 %v5839_v14, %v1384_v59  ;;  %8436 = vst [vmem:[#allocation49_spill] sm:$0xff] %v5887_v18  ;;  %v5892_v59 = vpop.eup %4610  ;;  %4638 = vpow2.f32 %v1298_v19 }
 0x35a   : > { %8437 = vst [vmem:[#allocation33_spill] sm:$0xff] %v5892_v59  ;;  %v5894_v22 = vpop.eup %4612  ;;  %4640 = vpow2.f32 %v1302_v50  ;;  %v1356_v50 = vmul.f32 1.442695, %v1236_v28  ;;  %v1235_v28 = vsub.f32 %v5648_v45, %v5782_v52  ;;  %v1213_v45 = vsub.f32 %v5579_v41, %v5782_v52 }
 0x35b   : > { %v1386_v29 = vadd.f32 %v5876_v43, %v1385_v40  ;;  %v5899_v56 = vpop.eup %4614  ;;  %v1286_v40 = vmul.f32 1.442695, %v1201_v32  ;;  %4642 = vpow2.f32 %v1306_v27 }
 0x35c   : > { %8439 = vst [vmem:[#allocation39_spill] sm:$0xff] %v5899_v56  ;;  %v5901_v11 = vpop.eup %4616  ;;  %v1409_v36 = vadd.f32 %v5899_v56, %v5894_v22  ;;  %4644 = vpow2.f32 %v1282_v62 }
 0x35d   : > { %v1387_v33 = vadd.f32 %v5881_v20, %v1386_v29  ;;  %8440 = vst [vmem:[#allocation41_spill] sm:$0xff] %v5901_v11  ;;  %v5906_v47 = vpop.eup %4618  ;;  %v1238_v29 = vsub.f32 %v8441_v53, %v5711_v0  ;;  %4646 = vpow2.f32 %v1286_v40 }
 0x35e   : > { %v5912_v32 = vpop.eup %4620  ;;  %v1410_v1 = vadd.f32 %v5906_v47, %v1409_v36  ;;  %4648 = vpow2.f32 %v1290_v35 }
 0x35f   : > { %v1388_v55 = vadd.f32 %v5887_v18, %v1387_v33  ;;  %v5916_v27 = vpop.eup %4622  ;;  %v1233_v33 = vsub.f32 %v5640_v44, %v5782_v52  ;;  %v8442_v18 = vld [vmem:[#allocation14_spill] sm:$0xff]  ;;  %v1360_v36 = vmul.f32 1.442695, %v1238_v29  ;;  %4650 = vpow2.f32 %v1356_v50 }
 0x360   : > { %v5922_v15 = vpop.eup %4624  ;;  %v1411_v62 = vadd.f32 %v5916_v27, %v1410_v1  ;;  %v1354_v1 = vmul.f32 1.442695, %v1235_v28  ;;  %v1217_v50 = vsub.f32 %v5593_v7, %v5782_v52 }
 0x361   : > { %v1389_v20 = vadd.f32 %v5892_v59, %v1388_v55  ;;  %v5928_v55 = vpop.eup %4626  ;;  %v1350_v35 = vmul.f32 1.442695, %v1233_v33  ;;  %4652 = vpow2.f32 %v1360_v36  ;;  %v1310_v36 = vmul.f32 1.442695, %v1213_v45 }
 0x362   : > { %v5930_v40 = vpop.eup %4628  ;;  %v1221_v45 = vsub.f32 %v5604_v9, %v5782_v52 }
 0x363   : > { %v1390_v56 = vadd.f32 %v5901_v11, %v1389_v20  ;;  %v1412_v20 = vadd.f32 %v5928_v55, %v1411_v62  ;;  %v5936_v11 = vpop.eup %4630 }
 0x364   : > { %v5940_v29 = vpop.eup %4632 }
 0x366   : > { %v647_v19 = vpop.permute.xlu0 %646 }
 0x367   : > { %v787_v53 = vadd.f32 %v8442_v18, %v647_v19  ;;  %v789_v13 = vadd.f32 %v8443_v54, %v647_v19  ;;  %v1242_v54 = vsub.f32 %v5687_v38, %v5711_v0  ;;  %v1364_v18 = vmul.f32 1.442695, %v1240_v60  ;;  %v5944_v0 = vpop.eup %4634 }
 0x368   : > { %v1391_v19 = vadd.f32 %v5912_v32, %v1390_v56  ;;  %v1413_v38 = vadd.f32 %v5930_v40, %v1412_v20  ;;  %v1215_v56 = vsub.f32 %v5586_v8, %v5782_v52  ;;  %v4637_v60 = vpop.eup %4636 }
 0x369   : > { %v2929_v59 = vpack.c.bf16 %v787_v53, %v787_v53  ;;  %v2930_v44 = vpack.c.bf16 %v789_v13, %v789_v13  ;;  %4654 = vpow2.f32 %v1364_v18  ;;  %v1368_v41 = vmul.f32 1.442695, %v1242_v54  ;;  %v4639_v53 = vpop.eup %4638 }
 0x36a   : > { %v1392_v13 = vadd.f32 %v5922_v15, %v1391_v19  ;;  %4656 = vpow2.f32 %v1350_v35  ;;  %v5952_v28 = vpop.eup %4640  ;;  %v1219_v54 = vsub.f32 %v5600_v25, %v5782_v52  ;;  %v1314_v18 = vmul.f32 1.442695, %v1215_v56 }
 0x36b   : > { %2949 = vxpose.xlu0.c.b16.start.end [1/1] (short) %v2930_v44, 128  ;;  %2933 = vxpose.xlu1.c.b16.start.end [1/1] (short) %v2929_v59, 128  ;;  %v1414_v59 = vadd.f32 %v5936_v11, %v1413_v38  ;;  %4658 = vpow2.f32 %v1354_v1  ;;  %v5956_v44 = vpop.eup %4642  ;;  %v1460_v1 = vpack.c.bf16 %v5876_v43, %v5839_v14  ;;  %v1241_v43 = vsub.f32 %v5681_v24, %v5782_v52 }
 0x36c   : > { %v1393_v33 = vadd.f32 %v5843_v26, %v1392_v13  ;;  %4660 = vpow2.f32 %v1368_v41  ;;  %v1461_v20 = vpack.c.bf16 %v5956_v44, %v5952_v28  ;;  %v4645_v35 = vpop.eup %4644  ;;  %v1318_v13 = vmul.f32 1.442695, %v1217_v50 }
 0x36d   : > { %v1415_v8 = vadd.f32 %v5940_v29, %v1414_v59  ;;  %v4647_v38 = vpop.eup %4646  ;;  %4662 = vpow2.f32 %v1310_v36  ;;  %v1459_v41 = vpack.c.bf16 %v4639_v53, %v4637_v60  ;;  %v1223_v59 = vsub.f32 %v5608_v10, %v5782_v52 }
 0x36e   : > { %v1394_v62 = vadd.f32 %v5848_v39, %v1393_v33  ;;  %1478 = vmatprep.subr.bf16.mxu0 %v1461_v20  ;;  %v4649_v33 = vpop.eup %4648  ;;  %4664 = vpow2.f32 %v1314_v18  ;;  %v1322_v50 = vmul.f32 1.442695, %v1219_v54  ;;  %v1243_v36 = vsub.f32 %v5707_v48, %v5782_v52 }
 0x36f   : > { %v1416_v7 = vadd.f32 %v5944_v0, %v1415_v8  ;;  %1479 = vmatpush1.bf16.msra.mxu0 %v1460_v1  ;;  %v1326_v8 = vmul.f32 1.442695, %v1221_v45  ;;  %v1458_v10 = vpack.c.bf16 %v5834_v61, %v5830_v63  ;;  %4666 = vpow2.f32 %v1318_v13  ;;  %v5981_v20 = vpop.eup %4650 }
 0x370   : > { %v1395_v19 = vadd.f32 %v5856_v2, %v1394_v62  ;;  %v1225_v62 = vsub.f32 %v5612_v34, %v5782_v52  ;;  %1480 = vmatprep.subr.bf16.mxu0 %v1459_v41  ;;  %v1227_v54 = vsub.f32 %v5616_v58, %v5782_v52  ;;  %v1229_v24 = vsub.f32 %v5624_v16, %v5782_v52  ;;  %v5989_v45 = vpop.eup %4652 }
 0x371   : > { %v1417_v56 = vadd.f32 %v4645_v35, %v1416_v7  ;;  %v1457_v7 = vpack.c.bf16 %v4649_v33, %v4647_v38  ;;  %v1237_v48 = vsub.f32 %v5656_v30, %v5782_v52  ;;  %v1330_v18 = vmul.f32 1.442695, %v1223_v59 }
 0x372   : > { %v1396_v25 = vadd.f32 %v5861_v4, %v1395_v19  ;;  %4668 = vpow2.f32 %v1322_v50  ;;  %v1334_v61 = vmul.f32 1.442695, %v1225_v62  ;;  %v1239_v58 = vsub.f32 %v5669_v5, %v5782_v52 }
 0x373   : > { %v1418_v14 = vadd.f32 %v4647_v38, %v1417_v56  ;;  %1481 = vmatpush1.bf16.msra.mxu0 %v1458_v10  ;;  %v1366_v38 = vmul.f32 1.442695, %v1241_v43  ;;  %v1370_v16 = vmul.f32 1.442695, %v1243_v36  ;;  %v1456_v30 = vpack.c.bf16 %v5825_v42, %v5819_v6 }
 0x374   : > { %v1397_v9 = vadd.f32 %v5867_v51, %v1396_v25  ;;  %1482 = vmatprep.subr.bf16.mxu0 %v1457_v7  ;;  %4670 = vpow2.f32 %v1326_v8  ;;  %v1231_v59 = vsub.f32 %v5632_v46, %v5782_v52  ;;  %v1338_v5 = vmul.f32 1.442695, %v1227_v54 }
 0x375   : > { %v1419_v34 = vadd.f32 %v4649_v33, %v1418_v14  ;;  %v1455_v33 = vpack.c.bf16 %v4645_v35, %v5944_v0  ;;  %4672 = vpow2.f32 %v1330_v18  ;;  %v1342_v62 = vmul.f32 1.442695, %v1229_v24 }
 0x376   : > { %v1398_v19 = vadd.f32 %v5872_v12, %v1397_v9  ;;  %v5992_v1 = vpop.eup %4654  ;;  %4674 = vpow2.f32 %v1334_v61  ;;  %v1358_v0 = vmul.f32 1.442695, %v1237_v48  ;;  %v1362_v35 = vmul.f32 1.442695, %v1239_v58  ;;  %v3638_v48 = vld [vmem:[%s8251_s6 + $0x8] sm:$0xff]  ;;  %v8446_v58 = vld [vmem:[#allocation44_spill] sm:$0xff] }
 0x377   : > { %v1420_v13 = vadd.f32 %v4637_v60, %v1419_v34  ;;  %v5998_v25 = vpop.eup %4656  ;;  %1483 = vmatpush1.bf16.msra.mxu0 %v1456_v30  ;;  %4676 = vpow2.f32 %v1366_v38  ;;  %v1454_v46 = vpack.c.bf16 %v5814_v37, %v5810_v17  ;;  %v1346_v43 = vmul.f32 1.442695, %v1231_v59 }
 0x378   : > { %v1399_v63 = vadd.f32 %v5981_v20, %v1398_v19  ;;  %v6002_v60 = vpop.eup %4658  ;;  %1484 = vmatprep.subr.bf16.mxu0 %v1455_v33  ;;  %4678 = vpow2.f32 %v1370_v16  ;;  %v1452_v17 = vpack.c.bf16 %v5803_v31, %v5794_v3  ;;  %v1450_v19 = vpack.c.bf16 %v5787_v49, %v5778_v21  ;;  %v3639_v33 = vld [vmem:[%s8251_s6 + $0x10] sm:$0xff] }
 0x379   : > { %v1421_v41 = vadd.f32 %v4639_v53, %v1420_v13  ;;  %v1473_v42 = vpack.c.bf16 %v6002_v60, %v5998_v25  ;;  %v6010_v53 = vpop.eup %4660  ;;  %4680 = vpow2.f32 %v1338_v5  ;;  %v1449_v31 = vpack.c.bf16 %v5916_v27, %v5906_v47  ;;  %v8444_v27 = vld [vmem:[#allocation39_spill] sm:$0xff] }
 0x37a   : > { %v1400_v56 = vadd.f32 %v5989_v45, %v1399_v63  ;;  %v6020_v14 = vpop.eup %4662  ;;  %4682 = vpow2.f32 %v1342_v62  ;;  %v1448_v21 = vpack.c.bf16 %v5769_v57, %v5762_v23  ;;  %v1447_v24 = vpack.c.bf16 %v8444_v27, %v5894_v22  ;;  %v608_v63 = vld [vmem:[%s8249_s4 + $0x58] sm:$0xff]  ;;  %v4195_v27 = vld [vmem:[%s8257_s12] sm:$0xff] }
 0x37b   : > { %v1422_v6 = vadd.f32 %v5952_v28, %v1421_v41  ;;  %v1453_v28 = vpack.c.bf16 %v5940_v29, %v5936_v11  ;;  %1485 = vmatpush1.bf16.msra.mxu0 %v1454_v46  ;;  %v6023_v8 = vpop.eup %4664  ;;  %4684 = vpow2.f32 %v1358_v0  ;;  %v1451_v11 = vpack.c.bf16 %v5930_v40, %v5928_v55  ;;  %v3637_v55 = vld [vmem:[%s8251_s6] sm:$0xff]  ;;  %v8445_v57 = vld [vmem:[#allocation43_spill] sm:$0xff] }
 0x37c   : > { %v1401_v9 = vadd.f32 %v5992_v1, %v1400_v56  ;;  %4686 = vpow2.f32 %v1362_v35  ;;  %v6030_v29 = vpop.eup %4666  ;;  %v1446_v38 = vpack.c.bf16 %v8446_v58, %v8445_v57  ;;  %v3640_v56 = vld [vmem:[%s8251_s6 + $0x18] sm:$0xff]  ;;  %v1476_v62 = vpack.c.bf16 %v6010_v53, %v5992_v1  ;;  %v3740_v35 = vld [vmem:[%s8252_s7 + $0x10] sm:$0xff] }
 0x37d   : > { %v1423_v50 = vadd.f32 %v5956_v44, %v1422_v6  ;;  %1486 = vmatprep.subr.bf16.mxu0 %v1453_v28  ;;  %4688 = vpow2.f32 %v1346_v43  ;;  %v3741_v0 = vld [vmem:[%s8252_s7 + $0x18] sm:$0xff]  ;;  %v3744_v28 = vld [vmem:[%s8253_s8 + $0x10] sm:$0xff] }
 0x37e   : > { %v6015_v52 = vadd.f32 %v6010_v53, %v1401_v9  ;;  %v3745_v53 = vld [vmem:[%s8253_s8 + $0x18] sm:$0xff]  ;;  %v4197_v57 = vld [vmem:[%s8257_s12 + $0x10] sm:$0xff] }
 0x37f   : > { %v1424_v36 = vadd.f32 %v6020_v14, %v1423_v50  ;;  %1487 = vmatpush1.bf16.msra.mxu0 %v1452_v17  ;;  %v6033_v10 = vpop.eup %4668  ;;  %v1474_v50 = vpack.c.bf16 %v5989_v45, %v5981_v20  ;;  %v8447_v17 = vpack.c.bf16 %v5872_v12, %v5867_v51  ;;  %v3742_v51 = vld [vmem:[%s8253_s8] sm:$0xff] }
 0x380   : > { %1488 = vmatprep.subr.bf16.mxu0 %v1451_v11 }
 0x381   : > { %v1425_v37 = vadd.f32 %v6023_v8, %v1424_v36  ;;  %v6043_v40 = vpop.eup %4670  ;;  %v3739_v36 = vld [vmem:[%s8252_s7 + $0x8] sm:$0xff] }
 0x382   : > { %v6045_v34 = vpop.eup %4672 }
 0x383   : > { %v1426_v44 = vadd.f32 %v6030_v29, %v1425_v37  ;;  %1489 = vmatpush1.bf16.msra.mxu0 %v1450_v19  ;;  %v4675_v54 = vpop.eup %4674  ;;  %v3738_v37 = vld [vmem:[%s8252_s7] sm:$0xff]  ;;  %v1467_v12 = vpack.c.bf16 %v6045_v34, %v6043_v40  ;;  %v3881_v19 = vld [vmem:[%s8255_s10 + $0x18] sm:$0xff] }
 0x384   : > { %1490 = vmatprep.subr.bf16.mxu0 %v1449_v31  ;;  %v4677_v49 = vpop.eup %4676  ;;  %v8450_v31 = vld [vmem:[#allocation19_spill] sm:$0xff] }
 0x385   : > { %v1427_v3 = vadd.f32 %v6033_v10, %v1426_v44  ;;  %v4679_v18 = vpop.eup %4678  ;;  %v8448_v44 = vpack.c.bf16 %v5861_v4, %v5856_v2  ;;  %v3880_v2 = vld [vmem:[%s8255_s10 + $0x10] sm:$0xff]  ;;  %v1466_v4 = vpack.c.bf16 %v5922_v15, %v5912_v32  ;;  %v8453_v32 = vld [vmem:[#allocation33_spill] sm:$0xff] }
 0x386   : > { %v4681_v61 = vpop.eup %4680  ;;  %v1477_v30 = vpack.c.bf16 %v4679_v18, %v4677_v49  ;;  %v8454_v15 = vld [vmem:[#allocation41_spill] sm:$0xff] }
 0x387   : > { %v1428_v7 = vadd.f32 %v6043_v40, %v1427_v3  ;;  %1491 = vmatpush1.bf16.msra.mxu0 %v1448_v21  ;;  %v4683_v23 = vpop.eup %4682  ;;  %v8449_v3 = vpack.c.bf16 %v5848_v39, %v5843_v26  ;;  %v3879_v39 = vld [vmem:[%s8255_s10 + $0x8] sm:$0xff]  ;;  %v3878_v26 = vld [vmem:[%s8255_s10] sm:$0xff]  ;;  %v1464_v21 = vpack.c.bf16 %v8454_v15, %v8453_v32 }
 0x388   : > { %1492 = vmatprep.subr.bf16.mxu0 %v1447_v24  ;;  %v4685_v16 = vpop.eup %4684  ;;  %v8455_v24 = vld [vmem:[#allocation17_spill] sm:$0xff] }
 0x389   : > { %v1429_v47 = vadd.f32 %v6045_v34, %v1428_v7  ;;  %v4687_v41 = vpop.eup %4686  ;;  %v8452_v34 = vld [vmem:[#allocation9_spill] sm:$0xff] }
 0x38a   : > { %v4689_v5 = vpop.eup %4688  ;;  %v1475_v6 = vpack.c.bf16 %v4687_v41, %v4685_v16  ;;  %v759_v7 = vadd.f32 %v8452_v34, %v8450_v31 }
 0x38b   : > { %3643 = vperm.xlu1 %4545, %v3637_v55   ;;  %v1430_v13 = vadd.f32 %v4675_v54, %v1429_v47  ;;  %1493 = vmatpush1.bf16.msra.mxu0 %v1446_v38  ;;  %v1471_v45 = vpack.c.bf16 %v4689_v5, %v4683_v23  ;;  %v8451_v55 = vld [vmem:[#allocation8_spill] sm:$0xff] }
 0x38c   : > { %1494 = vmatprep.subr.bf16.mxu0 %v1477_v30  ;;  %v757_v40 = vadd.f32 %v8451_v55, %v8450_v31  ;;  %v814_v47 = vmul.f32 0.35355338, %v759_v7  ;;  %v8461_v30 = vld [vmem:[#allocation21_spill] sm:$0xff] }
 0x38d   : > { %v1431_v22 = vadd.f32 %v4681_v61, %v1430_v13 }
 0x38f   : > { %3648 = vperm.xlu1 %4545, %v3638_v48   ;;  %v1432_v59 = vadd.f32 %v4683_v23, %v1431_v22  ;;  %1495 = vmatpush2.bf16.msra.mxu0 %v1476_v62  ;;  %v8456_v48 = vld [vmem:[#allocation16_spill] sm:$0xff]  ;;  %v8460_v22 = vld [vmem:[#allocation18_spill] sm:$0xff]  ;;  %v8467_v62 = vld [vmem:[#allocation35_spill] sm:$0xff] }
 0x390   : > { %666 = vperm.xlu0 %4544, %v608_v63   ;;  %1496 = vmatprep.subr.bf16.mxu0 %v1475_v6  ;;  %v8457_v63 = vld [vmem:[#allocation48_spill] sm:$0xff] }
 0x391   : > { %v1433_v9 = vadd.f32 %v4689_v5, %v1432_v59  ;;  %v8465_v59 = vld [vmem:[#allocation29_spill] sm:$0xff]  ;;  %v8466_v5 = vld [vmem:[#allocation32_spill] sm:$0xff] }
 0x393   : > { %3658 = vperm.xlu1 %4545, %v3640_v56   ;;  %v1434_v46 = vadd.f32 %v5998_v25, %v1433_v9  ;;  %1497 = vmatpush2.bf16.msra.mxu0 %v1474_v50  ;;  %v8462_v56 = vld [vmem:[#allocation23_spill] sm:$0xff]  ;;  %v6180_v9 = vpop.permute.xlu1 %621 }
 0x394   : > { %3653 = vperm.xlu0 %4544, %v3639_v33   ;;  %1498 = vmatprep.subr.bf16.mxu0 %v1473_v42  ;;  %v3743_v42 = vld [vmem:[%s8253_s8 + $0x8] sm:$0xff]  ;;  %v8464_v33 = vld [vmem:[#allocation27_spill] sm:$0xff]  ;;  %8468 = vst [vmem:[#allocation42_spill] sm:$0xff] %v6180_v9 }
 0x395   : > { %v1435_v1 = vadd.f32 %v6002_v60, %v1434_v46  ;;  %v1469_v60 = vpack.c.bf16 %v4681_v61, %v4675_v54  ;;  %v1465_v54 = vpack.c.bf16 %v6033_v10, %v6030_v29  ;;  %v1463_v29 = vpack.c.bf16 %v6023_v8, %v6020_v14  ;;  %v4196_v10 = vld [vmem:[%s8257_s12 + $0x8] sm:$0xff]  ;;  %v4198_v8 = vld [vmem:[%s8257_s12 + $0x18] sm:$0xff]  ;;  %v8472_v46 = vld [vmem:[#allocation22_spill] sm:$0xff] }
 0x396   : > { %v8458_v61 = vld [vmem:[#allocation49_spill] sm:$0xff]  ;;  %v1524_v14 = vpack.c.bf16 %v814_v47, %v814_v47 }
 0x397   : > { %3831 = vperm.xlu1 %4545, %v3741_v0   ;;  %v1436_v43 = vadd.f32 %v4685_v16, %v1435_v1  ;;  %1499 = vmatpush2.bf16.msra.mxu0 %v8447_v17  ;;  %v1462_v13 = vpack.c.bf16 %v8458_v61, %v8457_v63  ;;  %v8459_v16 = vmov 0   ;;  %v6182_v6 = vpop.trf.xlu1  ;;  %v8470_v0 = vld [vmem:[#allocation20_spill] sm:$0xff]  ;;  %v8481_v17 = vld [vmem:[#allocation31_spill] sm:$0xff] }
 0x398   : > { %3826 = vperm.xlu0 %4544, %v3740_v35   ;;  %1500 = vmatprep.subr.bf16.mxu0 %v1471_v45  ;;  %8469 = vst [vmem:[#allocation50_spill] sm:$0xff] %v6182_v6  ;;  %v8474_v1 = vld [vmem:[#allocation24_spill] sm:$0xff] }
 0x399   : > { %v1437_v20 = vadd.f32 %v4687_v41, %v1436_v43  ;;  %v8463_v41 = vld [vmem:[#allocation25_spill] sm:$0xff]  ;;  %v8477_v43 = vld [vmem:[#allocation26_spill] sm:$0xff]  ;;  %v8479_v45 = vld [vmem:[#allocation28_spill] sm:$0xff] }
 0x39b   : > { %3859 = vperm.xlu1 %4545, %v3745_v53   ;;  %v1438_v11 = vadd.f32 %v4677_v49, %v1437_v20  ;;  %1501 = vmatpush2.bf16.msra.mxu0 %v8448_v44  ;;  %v813_v49 = vmul.f32 0.35355338, %v757_v40  ;;  %v6187_v35 = vpop.trf.xlu1  ;;  %v8485_v44 = vld [vmem:[#allocation34_spill] sm:$0xff] }
 0x39c   : > { %3854 = vperm.xlu0 %4544, %v3744_v28   ;;  %1502 = vmatprep.subr.bf16.mxu0 %v1469_v60  ;;  %8471 = vst [vmem:[#allocation51_spill] sm:$0xff] %v6187_v35 }
 0x39d   : > { %v6097_v25 = vadd.f32 %v4679_v18, %v1438_v11  ;;  %v793_v18 = vadd.f32 %v8456_v48, %v8455_v24  ;;  %v1523_v23 = vpack.c.bf16 %v813_v49, %v813_v49  ;;  %v6216_v11 = vpop.f32.mrf.mxu0 }
 0x39e   : > { %8483 = vst [vmem:[#allocation8_spill] sm:$0xff] %v6216_v11 }
 0x39f   : > { %3821 = vperm.xlu1 %4545, %v3739_v36   ;;  %1503 = vmatpush2.bf16.msra.mxu0 %v8449_v3  ;;  %v823_v58 = vpack.c.bf16 %v793_v18, %v793_v18  ;;  %v1610_v38 = vsel %vm906_vm1, %v1523_v23, 0  ;;  %v6192_v50 = vpop.trf.xlu1  ;;  %v804_v60 = vpop.f32.mrf.mxu0  ;;  %v1403_v3 = vrot.slane %v6015_v52, 4 }
 0x3a0   : > { %3816 = vperm.xlu0 %4544, %v3738_v37   ;;  %1504 = vmatprep.subr.bf16.mxu0 %v1467_v12  ;;  %8473 = vst [vmem:[#allocation14_spill] sm:$0xff] %v6192_v50 }
 0x3a1   : > { %v6230_v15 = vpop.f32.mrf.mxu0 }
 0x3a2   : > { %8487 = vst [vmem:[#allocation33_spill] sm:$0xff] %v6230_v15 }
 0x3a3   : > { %3849 = vperm.xlu1 %4545, %v3743_v42   ;;  %1505 = vmatpush2.bf16.msra.mxu0 %v1466_v4  ;;  %v6197_v53 = vpop.trf.xlu1  ;;  %v1404_v4 = vadd.f32 %v1403_v3, %v6015_v52 }
 0x3a4   : > { %3844 = vperm.xlu0 %4544, %v3742_v51   ;;  %1506 = vmatprep.subr.bf16.mxu0 %v1465_v54  ;;  %8475 = vst [vmem:[#allocation15_spill] sm:$0xff] %v6197_v53 }
 0x3a5   : > { %v1405_v55 = vrot.slane %v1404_v4, 2 }
 0x3a7   : > { %3899 = vperm.xlu1 %4545, %v3881_v19   ;;  %1507 = vmatpush2.bf16.msra.mxu0 %v1464_v21  ;;  %v6199_v28 = vpop.trf.xlu1  ;;  %v8486_v19 = vld [vmem:[#allocation37_spill] sm:$0xff]  ;;  %v1406_v34 = vadd.f32 %v1405_v55, %v1404_v4  ;;  %v6232_v21 = vpop.f32.mrf.mxu0 }
 0x3a8   : > { %3894 = vperm.xlu0 %4544, %v3880_v2   ;;  %1508 = vmatprep.subr.bf16.mxu0 %v1463_v29  ;;  %8476 = vst [vmem:[#allocation39_spill] sm:$0xff] %v6199_v28  ;;  %v1440_v2 = vrot.slane %v6097_v25, 4  ;;  %8488 = vst [vmem:[#allocation41_spill] sm:$0xff] %v6232_v21 }
 0x3a9   : > { %v1407_v54 = vrot.slane %v1406_v34, 1 }
 0x3aa   : > { %v1441_v31 = vadd.f32 %v1440_v2, %v6097_v25 }
 0x3ab   : > { %3889 = vperm.xlu1 %4545, %v3879_v39   ;;  %1509 = vmatpush2.bf16.msra.mxu0 %v1462_v13  ;;  %v6204_v20 = vpop.trf.xlu1 }
 0x3ac   : > { %3884 = vperm.xlu0 %4544, %v3878_v26   ;;  %4416 = vmatprep.subr.msk.bf16.mxu0 %vm906_vm1, %v1524_v14  ;;  %8478 = vst [vmem:[#allocation43_spill] sm:$0xff] %v6204_v20  ;;  %v1442_v40 = vrot.slane %v1441_v31, 2  ;;  %v1408_v26 = vadd.f32 %v1407_v54, %v1406_v34 }
 0x3ae   : > { %1511 = vmatmul.mubr.bf16.vlgmr.msra.gmra.mxu0 %v823_v58  ;;  %v1443_v7 = vadd.f32 %v1442_v40, %v1441_v31  ;;  %4690 = vrcp.f32 %v1408_v26 }
 0x3af   : > { %4206 = vperm.xlu1 %4545, %v4196_v10   ;;  %1630 = vmatpush1.bf16.msra.mxu0 %v1610_v38  ;;  %v6209_v36 = vpop.trf.xlu1 }
 0x3b0   : > { %4201 = vperm.xlu0 %4544, %v4195_v27   ;;  %1647 = vmatprep.mubr.bf16.mxu0 %v8459_v16  ;;  %8480 = vst [vmem:[#allocation44_spill] sm:$0xff] %v6209_v36  ;;  %v1444_v39 = vrot.slane %v1443_v7, 1 }
 0x3b2   : > { %v1445_v32 = vadd.f32 %v1444_v39, %v1443_v7 }
 0x3b3   : > { %4216 = vperm.xlu1 %4545, %v4198_v8   ;;  %v6214_v37 = vpop.trf.xlu1 }
 0x3b4   : > { %4211 = vperm.xlu0 %4544, %v4197_v57   ;;  %8482 = vst [vmem:[#allocation19_spill] sm:$0xff] %v6214_v37  ;;  %4692 = vrcp.f32 %v1445_v32 }
 0x3b6   : > { %4417 = vmatmul.mubr.msk.bf16.vlgmr.msra.gmra.mxu0 %vm857_vm2, %v8460_v22 }
 0x3b7   : > { %1657 = vmatprep.mubr.bf16.mxu0 %v8459_v16  ;;  %v6218_v42 = vpop.permute.xlu1 %661 }
 0x3b8   : > { %8484 = vst [vmem:[#allocation9_spill] sm:$0xff] %v6218_v42  ;;  %v805_v51 = vadd.f32 %v804_v60, %v6218_v42 }
 0x3ba   : > { %v2230_v12 = vpack.c.bf16 %v805_v51, %v805_v51 }
 0x3bb   : > { %v4691_v49 = vpop.eup %4690 }
 0x3be   : > { %4418 = vmatmul.mubr.msk.bf16.gmra.mxu0 %vm857_vm2, %v8461_v30 }
 0x3bf   : > { %1667 = vmatprep.mubr.bf16.mxu0 %v8459_v16 }
 0x3c1   : > { %v4693_v52 = vpop.eup %4692 }
 0x3c6   : > { %4419 = vmatmul.mubr.msk.bf16.gmra.mxu0 %vm857_vm2, %v8462_v56 }
 0x3c7   : > { %1677 = vmatprep.mubr.bf16.mxu0 %v8459_v16 }
 0x3ce   : > { %4420 = vmatmul.mubr.msk.bf16.gmra.mxu0 %vm857_vm2, %v8463_v41 }
 0x3cf   : > { %1687 = vmatprep.mubr.bf16.mxu0 %v8459_v16 }
 0x3d6   : > { %4421 = vmatmul.mubr.msk.bf16.gmra.mxu0 %vm857_vm2, %v8464_v33 }
 0x3d7   : > { %1697 = vmatprep.mubr.bf16.mxu0 %v8459_v16 }
 0x3de   : > { %4422 = vmatmul.mubr.msk.bf16.gmra.mxu0 %vm857_vm2, %v8465_v59 }
 0x3df   : > { %1707 = vmatprep.mubr.bf16.mxu0 %v8459_v16 }
 0x3e6   : > { %4423 = vmatmul.mubr.msk.bf16.gmra.mxu0 %vm857_vm2, %v8466_v5 }
 0x3e7   : > { %1717 = vmatprep.mubr.bf16.mxu0 %v8459_v16 }
 0x3ee   : > { %4424 = vmatmul.mubr.msk.bf16.gmra.mxu0 %vm857_vm2, %v8467_v62 }
 0x3ef   : > { %1727 = vmatprep.mubr.bf16.mxu0 %v8459_v16 }
 0x3f6   : > { %4425 = vmatmul.mubr.msk.bf16.gmra.mxu0 %vm857_vm2, %v8470_v0 }
 0x3f7   : > { %1737 = vmatprep.mubr.bf16.mxu0 %v8459_v16 }
 0x3fe   : > { %4426 = vmatmul.mubr.msk.bf16.gmra.mxu0 %vm857_vm2, %v8472_v46 }
 0x3ff   : > { %1747 = vmatprep.mubr.bf16.mxu0 %v8459_v16 }
 0x406   : > { %4427 = vmatmul.mubr.msk.bf16.gmra.mxu0 %vm857_vm2, %v8474_v1 }
 0x407   : > { %1757 = vmatprep.mubr.bf16.mxu0 %v8459_v16 }
 0x40e   : > { %4428 = vmatmul.mubr.msk.bf16.gmra.mxu0 %vm857_vm2, %v8477_v43 }
 0x40f   : > { %1767 = vmatprep.mubr.bf16.mxu0 %v8459_v16 }
 0x416   : > { %4429 = vmatmul.mubr.msk.bf16.gmra.mxu0 %vm857_vm2, %v8479_v45 }
 0x417   : > { %1777 = vmatprep.mubr.bf16.mxu0 %v8459_v16 }
 0x41e   : > { %4430 = vmatmul.mubr.msk.bf16.gmra.mxu0 %vm857_vm2, %v8481_v17 }
 0x41f   : > { %1787 = vmatprep.mubr.bf16.mxu0 %v8459_v16 }
 0x426   : > { %4431 = vmatmul.mubr.msk.bf16.gmra.mxu0 %vm857_vm2, %v8485_v44 }
 0x427   : > { %1797 = vmatprep.mubr.bf16.mxu0 %v8459_v16 }
 0x42e   : > { %4432 = vmatmul.mubr.msk.bf16.gmra.mxu0 %vm857_vm2, %v8486_v19 }
 0x42f   : > { %2914 = vmatprep.mubr.bf16.mxu0 %v2230_v12 }
 0x46e   : > { %v1512_v47 = vpop.f32.mrf.mxu0 }
 0x46f   : > { %v6234_v29 = vmul.f32 %v4691_v49, %v1512_v47 }
 0x470   : > { %v1514_v25 = vpop.f32.mrf.mxu0 }
 0x471   : > { %8489 = vst [vmem:[#allocation17_spill] sm:$0xff] %v6234_v29  ;;  %v6236_v10 = vmul.f32 %v4693_v52, %v1514_v25 }
 0x472   : > { %v1516_v27 = vpop.f32.mrf.mxu0 }
 0x473   : > { %8490 = vst [vmem:[#allocation16_spill] sm:$0xff] %v6236_v10 }
 0x474   : > { %v1517_v24 = vpop.f32.mrf.mxu0 }
 0x476   : > { %v6238_v48 = vpop.f32.mrf.mxu0 }
 0x478   : > { %v6240_v18 = vpop.f32.mrf.mxu0 }
 0x47a   : > { %v6242_v63 = vpop.f32.mrf.mxu0 }
 0x47c   : > { %v6244_v61 = vpop.f32.mrf.mxu0 }
 0x47e   : > { %v6246_v13 = vpop.f32.mrf.mxu0 }
 0x47f   : > { %v1808_v11 = vmax.f32 %v6238_v48, %v6246_v13 }
 0x480   : > { %v6248_v23 = vpop.f32.mrf.mxu0 }
 0x482   : > { %v6250_v14 = vpop.f32.mrf.mxu0 }
 0x483   : > { %v1809_v42 = vmax.f32 %v6242_v63, %v6250_v14 }
 0x484   : > { %v6252_v8 = vpop.f32.mrf.mxu0 }
 0x485   : > { %8491 = vst [vmem:[#allocation48_spill] sm:$0xff] %v6252_v8 }
 0x486   : > { %v6254_v57 = vpop.f32.mrf.mxu0 }
 0x487   : > { %v1810_v29 = vmax.f32 %v1808_v11, %v6254_v57 }
 0x488   : > { %v6256_v58 = vpop.f32.mrf.mxu0 }
 0x48a   : > { %v6258_v38 = vpop.f32.mrf.mxu0 }
 0x48b   : > { %v1811_v37 = vmax.f32 %v1809_v42, %v6258_v38 }
 0x48c   : > { %v6260_v22 = vpop.f32.mrf.mxu0 }
 0x48d   : > { %8492 = vst [vmem:[#allocation49_spill] sm:$0xff] %v6260_v22 }
 0x48e   : > { %v6262_v30 = vpop.f32.mrf.mxu0 }
 0x48f   : > { %v1812_v36 = vmax.f32 %v1810_v29, %v6262_v30 }
 0x490   : > { %v6264_v56 = vpop.f32.mrf.mxu0 }
 0x492   : > { %v6266_v41 = vpop.f32.mrf.mxu0 }
 0x493   : > { %v1813_v20 = vmax.f32 %v1811_v37, %v6266_v41 }
 0x494   : > { %v6268_v33 = vpop.f32.mrf.mxu0 }
 0x495   : > { %8493 = vst [vmem:[#allocation18_spill] sm:$0xff] %v6268_v33 }
 0x496   : > { %v6270_v59 = vpop.f32.mrf.mxu0 }
 0x497   : > { %8494 = vst [vmem:[#allocation21_spill] sm:$0xff] %v6270_v59  ;;  %v1814_v53 = vmax.f32 %v1812_v36, %v6270_v59 }
 0x498   : > { %v6272_v5 = vpop.f32.mrf.mxu0 }
 0x499   : > { %8495 = vst [vmem:[#allocation23_spill] sm:$0xff] %v6272_v5 }
 0x49a   : > { %v6274_v62 = vpop.f32.mrf.mxu0 }
 0x49b   : > { %v1815_v50 = vmax.f32 %v1813_v20, %v6274_v62 }
 0x49c   : > { %v6276_v0 = vpop.f32.mrf.mxu0 }
 0x49d   : > { %8496 = vst [vmem:[#allocation25_spill] sm:$0xff] %v6276_v0 }
 0x49e   : > { %v6278_v46 = vpop.f32.mrf.mxu0 }
 0x49f   : > { %8497 = vst [vmem:[#allocation27_spill] sm:$0xff] %v6278_v46  ;;  %v1816_v6 = vmax.f32 %v1814_v53, %v6278_v46 }
 0x4a0   : > { %v6280_v1 = vpop.f32.mrf.mxu0 }
 0x4a2   : > { %v6282_v43 = vpop.f32.mrf.mxu0 }
 0x4a3   : > { %v1817_v11 = vmax.f32 %v1815_v50, %v6282_v43 }
 0x4a4   : > { %v6284_v45 = vpop.f32.mrf.mxu0 }
 0x4a6   : > { %v6286_v17 = vpop.f32.mrf.mxu0 }
 0x4a7   : > { %8498 = vst [vmem:[#allocation29_spill] sm:$0xff] %v6286_v17  ;;  %v1818_v42 = vmax.f32 %v1816_v6, %v6286_v17 }
 0x4a8   : > { %v6288_v60 = vpop.f32.mrf.mxu0 }
 0x4aa   : > { %v6290_v44 = vpop.f32.mrf.mxu0 }
 0x4ab   : > { %v1819_v29 = vmax.f32 %v1817_v11, %v6290_v44  ;;  %v1846_v11 = vmax.f32 %v6244_v61, %v6252_v8 }
 0x4ac   : > { %v6292_v51 = vpop.f32.mrf.mxu0 }
 0x4ae   : > { %v6294_v12 = vpop.f32.mrf.mxu0 }
 0x4af   : > { %v1820_v37 = vmax.f32 %v1818_v42, %v6294_v12 }
 0x4b0   : > { %v6296_v19 = vpop.f32.mrf.mxu0 }
 0x4b2   : > { %v6298_v3 = vpop.f32.mrf.mxu0 }
 0x4b3   : > { %8499 = vst [vmem:[#allocation32_spill] sm:$0xff] %v6298_v3  ;;  %v1821_v36 = vmax.f32 %v1819_v29, %v6298_v3 }
 0x4b4   : > { %v6300_v2 = vpop.f32.mrf.mxu0 }
 0x4b6   : > { %v6302_v4 = vpop.f32.mrf.mxu0 }
 0x4b7   : > { %v1822_v20 = vmax.f32 %v1820_v37, %v6302_v4  ;;  %v1845_v37 = vmax.f32 %v6240_v18, %v6248_v23 }
 0x4b8   : > { %v6304_v31 = vpop.f32.mrf.mxu0 }
 0x4ba   : > { %v6306_v55 = vpop.f32.mrf.mxu0 }
 0x4bb   : > { %v1823_v53 = vmax.f32 %v1821_v36, %v6306_v55  ;;  %v1848_v36 = vmax.f32 %v1846_v11, %v6260_v22 }
 0x4bc   : > { %v6308_v40 = vpop.f32.mrf.mxu0 }
 0x4bd   : > { %v1850_v8 = vmax.f32 %v1848_v36, %v6268_v33 }
 0x4be   : > { %v6310_v34 = vpop.f32.mrf.mxu0 }
 0x4bf   : > { %8500 = vst [vmem:[#allocation35_spill] sm:$0xff] %v6310_v34  ;;  %v1824_v50 = vmax.f32 %v1822_v20, %v6310_v34  ;;  %v1847_v34 = vmax.f32 %v1845_v37, %v6256_v58  ;;  %v1852_v11 = vmax.f32 %v1850_v8, %v6276_v0 }
 0x4c0   : > { %v6312_v7 = vpop.f32.mrf.mxu0 }
 0x4c1   : > { %v1854_v36 = vmax.f32 %v1852_v11, %v6284_v45 }
 0x4c2   : > { %v6314_v54 = vpop.f32.mrf.mxu0 }
 0x4c3   : > { %8501 = vst [vmem:[#allocation20_spill] sm:$0xff] %v6314_v54  ;;  %v1825_v6 = vmax.f32 %v1823_v53, %v6314_v54  ;;  %v1856_v8 = vmax.f32 %v1854_v36, %v6292_v51 }
 0x4c4   : > { %v6316_v39 = vpop.f32.mrf.mxu0 }
 0x4c6   : > { %v6318_v26 = vpop.f32.mrf.mxu0 }
 0x4c7   : > { %8502 = vst [vmem:[#allocation22_spill] sm:$0xff] %v6318_v26  ;;  %v1826_v42 = vmax.f32 %v1824_v50, %v6318_v26  ;;  %v1849_v26 = vmax.f32 %v1847_v34, %v6264_v56 }
 0x4c8   : > { %v6320_v32 = vpop.f32.mrf.mxu0 }
 0x4c9   : > { %v1851_v37 = vmax.f32 %v1849_v26, %v6272_v5  ;;  %v1858_v26 = vmax.f32 %v1856_v8, %v6300_v2 }
 0x4ca   : > { %v6322_v49 = vpop.f32.mrf.mxu0 }
 0x4cb   : > { %8503 = vst [vmem:[#allocation24_spill] sm:$0xff] %v6322_v49  ;;  %v1827_v29 = vmax.f32 %v1825_v6, %v6322_v49  ;;  %v1853_v34 = vmax.f32 %v1851_v37, %v6280_v1 }
 0x4cc   : > { %v6324_v47 = vpop.f32.mrf.mxu0 }
 0x4cd   : > { %v1855_v0 = vmax.f32 %v1853_v34, %v6288_v60 }
 0x4ce   : > { %v6326_v52 = vpop.f32.mrf.mxu0 }
 0x4cf   : > { %v1828_v20 = vmax.f32 %v1826_v42, %v6326_v52  ;;  %v1857_v11 = vmax.f32 %v1855_v0, %v6296_v19 }
 0x4d0   : > { %v6328_v25 = vpop.f32.mrf.mxu0 }
 0x4d2   : > { %v6330_v27 = vpop.f32.mrf.mxu0 }
 0x4d3   : > { %v1829_v53 = vmax.f32 %v1827_v29, %v6330_v27 }
 0x4d4   : > { %v6332_v24 = vpop.f32.mrf.mxu0 }
 0x4d6   : > { %v6334_v15 = vpop.f32.mrf.mxu0 }
 0x4d7   : > { %v1830_v50 = vmax.f32 %v1828_v20, %v6334_v15 }
 0x4d8   : > { %v6340_v10 = vpop.f32.mrf.mxu0 }
 0x4da   : > { %v6344_v21 = vpop.f32.mrf.mxu0 }
 0x4db   : > { %v1831_v6 = vmax.f32 %v1829_v53, %v6344_v21 }
 0x4dc   : > { %v6348_v28 = vpop.f32.mrf.mxu0 }
 0x4de   : > { %v6352_v35 = vpop.f32.mrf.mxu0 }
 0x4df   : > { %v1832_v42 = vmax.f32 %v1830_v50, %v6352_v35 }
 0x4e0   : > { %v6356_v16 = vpop.f32.mrf.mxu0 }
 0x4e2   : > { %v6360_v9 = vpop.f32.mrf.mxu0 }
 0x4e3   : > { %v1833_v29 = vmax.f32 %v1831_v6, %v6360_v9 }
 0x4e4   : > { %v6364_v59 = vpop.f32.mrf.mxu0 }
 0x4e6   : > { %v6368_v46 = vpop.f32.mrf.mxu0 }
 0x4e7   : > { %8504 = vst [vmem:[#allocation26_spill] sm:$0xff] %v6368_v46  ;;  %v1834_v20 = vmax.f32 %v1832_v42, %v6368_v46  ;;  %v1860_v42 = vmax.f32 %v1858_v26, %v6308_v40 }
 0x4e8   : > { %v6372_v17 = vpop.f32.mrf.mxu0 }
 0x4e9   : > { %v1862_v37 = vmax.f32 %v1860_v42, %v6316_v39 }
 0x4ea   : > { %v6378_v3 = vpop.f32.mrf.mxu0 }
 0x4eb   : > { %8505 = vst [vmem:[#allocation28_spill] sm:$0xff] %v6378_v3  ;;  %v1835_v53 = vmax.f32 %v1833_v29, %v6378_v3  ;;  %v1859_v3 = vmax.f32 %v1857_v11, %v6304_v31 }
 0x4ec   : > { %v6385_v54 = vpop.f32.mrf.mxu0 }
 0x4ed   : > { %v1861_v36 = vmax.f32 %v1859_v3, %v6312_v7 }
 0x4ee   : > { %v6391_v49 = vpop.f32.mrf.mxu0 }
 0x4ef   : > { %v1836_v50 = vmax.f32 %v1834_v20, %v6391_v49  ;;  %v1864_v20 = vmax.f32 %v1862_v37, %v6324_v47  ;;  %v1863_v34 = vmax.f32 %v1861_v36, %v6320_v32 }
 0x4f0   : > { %v6397_v22 = vpop.f32.mrf.mxu0 }
 0x4f1   : > { %v1866_v8 = vmax.f32 %v1864_v20, %v6332_v24  ;;  %v1865_v0 = vmax.f32 %v1863_v34, %v6328_v25 }
 0x4f2   : > { %v6403_v33 = vpop.f32.mrf.mxu0 }
 0x4f3   : > { %v1837_v6 = vmax.f32 %v1835_v53, %v6403_v33  ;;  %v1867_v11 = vmax.f32 %v1865_v0, %v6340_v10 }
 0x4f5   : > { %v1838_v5 = vmax.f32 %v1836_v50, %v1837_v6  ;;  %v1868_v6 = vmax.f32 %v1866_v8, %v6348_v28  ;;  %v1869_v3 = vmax.f32 %v1867_v11, %v6356_v16 }
 0x4f7   : > { %v1839_v29 = vrot.slane %v1838_v5, 4  ;;  %v1870_v42 = vmax.f32 %v1868_v6, %v6364_v59  ;;  %v1871_v36 = vmax.f32 %v1869_v3, %v6372_v17 }
 0x4f9   : > { %v1840_v46 = vmax.f32 %v1838_v5, %v1839_v29  ;;  %v6423_v5 = vpop.f32.mrf.mxu0  ;;  %v1872_v29 = vmax.f32 %v1870_v42, %v6385_v54  ;;  %v1873_v20 = vmax.f32 %v1871_v36, %v6397_v22 }
 0x4fb   : > { %v1841_v53 = vrot.slane %v1840_v46, 2 }
 0x4fd   : > { %v1842_v50 = vmax.f32 %v1840_v46, %v1841_v53  ;;  %v1874_v46 = vmax.f32 %v1872_v29, %v6423_v5 }
 0x4ff   : > { %v1843_v26 = vrot.slane %v1842_v50, 1  ;;  %v1875_v0 = vmax.f32 %v1873_v20, %v1874_v46 }
 0x501   : > { %v6427_v37 = vmax.f32 %v1842_v50, %v1843_v26  ;;  %v1876_v3 = vrot.slane %v1875_v0, 4 }
 0x503   : > { %v1882_v53 = vsub.f32 %v6238_v48, %v6427_v37  ;;  %v1884_v34 = vsub.f32 %v6242_v63, %v6427_v37  ;;  %v1886_v8 = vsub.f32 %v6246_v13, %v6427_v37  ;;  %v1888_v50 = vsub.f32 %v6250_v14, %v6427_v37 }
 0x504   : > { %v1890_v11 = vsub.f32 %v6254_v57, %v6427_v37  ;;  %v1892_v48 = vsub.f32 %v6258_v38, %v6427_v37  ;;  %v1894_v13 = vsub.f32 %v6262_v30, %v6427_v37  ;;  %v1877_v36 = vmax.f32 %v1875_v0, %v1876_v3  ;;  %v8506_v57 = vld [vmem:[#allocation21_spill] sm:$0xff] }
 0x505   : > { %v1946_v6 = vmul.f32 1.442695, %v1882_v53  ;;  %v1950_v26 = vmul.f32 1.442695, %v1884_v34  ;;  %v1954_v42 = vmul.f32 1.442695, %v1886_v8  ;;  %v1896_v14 = vsub.f32 %v6266_v41, %v6427_v37 }
 0x506   : > { %v1958_v63 = vmul.f32 1.442695, %v1888_v50  ;;  %v1962_v29 = vmul.f32 1.442695, %v1890_v11  ;;  %v1966_v46 = vmul.f32 1.442695, %v1892_v48  ;;  %v1898_v20 = vsub.f32 %v8506_v57, %v6427_v37 }
 0x507   : > { %4694 = vpow2.f32 %v1946_v6  ;;  %v1970_v53 = vmul.f32 1.442695, %v1894_v13  ;;  %v1900_v38 = vsub.f32 %v6274_v62, %v6427_v37  ;;  %v1878_v34 = vrot.slane %v1877_v36, 2  ;;  %v8507_v8 = vld [vmem:[#allocation27_spill] sm:$0xff]  ;;  %v8508_v41 = vld [vmem:[#allocation29_spill] sm:$0xff] }
 0x508   : > { %4696 = vpow2.f32 %v1950_v26  ;;  %v1902_v30 = vsub.f32 %v8507_v8, %v6427_v37  ;;  %v1974_v50 = vmul.f32 1.442695, %v1896_v14  ;;  %v1904_v0 = vsub.f32 %v6282_v43, %v6427_v37 }
 0x509   : > { %4698 = vpow2.f32 %v1954_v42  ;;  %v1906_v6 = vsub.f32 %v8508_v41, %v6427_v37  ;;  %v1978_v26 = vmul.f32 1.442695, %v1898_v20  ;;  %v1908_v11 = vsub.f32 %v6290_v44, %v6427_v37 }
 0x50a   : > { %4700 = vpow2.f32 %v1958_v63  ;;  %v1982_v42 = vmul.f32 1.442695, %v1900_v38  ;;  %v1879_v3 = vmax.f32 %v1877_v36, %v1878_v34  ;;  %v1910_v48 = vsub.f32 %v6294_v12, %v6427_v37 }
 0x50b   : > { %4702 = vpow2.f32 %v1962_v29  ;;  %v1986_v63 = vmul.f32 1.442695, %v1902_v30  ;;  %v1926_v43 = vsub.f32 %v6326_v52, %v6427_v37  ;;  %v1990_v29 = vmul.f32 1.442695, %v1904_v0 }
 0x50c   : > { %4704 = vpow2.f32 %v1966_v46  ;;  %v1928_v14 = vsub.f32 %v6330_v27, %v6427_v37  ;;  %v1994_v44 = vmul.f32 1.442695, %v1906_v6  ;;  %v1930_v12 = vsub.f32 %v6334_v15, %v6427_v37 }
 0x50d   : > { %4706 = vpow2.f32 %v1970_v53  ;;  %v1998_v57 = vmul.f32 1.442695, %v1908_v11  ;;  %v1880_v20 = vrot.slane %v1879_v3, 1  ;;  %v1932_v52 = vsub.f32 %v6344_v21, %v6427_v37  ;;  %v8510_v21 = vld [vmem:[#allocation32_spill] sm:$0xff] }
 0x50e   : > { %4708 = vpow2.f32 %v1974_v50  ;;  %v2002_v53 = vmul.f32 1.442695, %v1910_v48  ;;  %v1934_v34 = vsub.f32 %v6352_v35, %v6427_v37  ;;  %v2034_v8 = vmul.f32 1.442695, %v1926_v43  ;;  %v8511_v43 = vld [vmem:[#allocation35_spill] sm:$0xff] }
 0x50f   : > { %4710 = vpow2.f32 %v1978_v26  ;;  %v1936_v15 = vsub.f32 %v6360_v9, %v6427_v37  ;;  %v2038_v30 = vmul.f32 1.442695, %v1928_v14  ;;  %v1912_v41 = vsub.f32 %v8510_v21, %v6427_v37 }
 0x510   : > { %4712 = vpow2.f32 %v1982_v42  ;;  %v2042_v6 = vmul.f32 1.442695, %v1930_v12  ;;  %v6490_v26 = vmax.f32 %v1879_v3, %v1880_v20  ;;  %v1914_v35 = vsub.f32 %v6302_v4, %v6427_v37 }
 0x511   : > { %4714 = vpow2.f32 %v1986_v63  ;;  %v2046_v11 = vmul.f32 1.442695, %v1932_v52  ;;  %v1916_v48 = vsub.f32 %v6306_v55, %v6427_v37  ;;  %v2050_v63 = vmul.f32 1.442695, %v1934_v34  ;;  %v8512_v52 = vld [vmem:[#allocation20_spill] sm:$0xff] }
 0x512   : > { %4716 = vpow2.f32 %v1990_v29  ;;  %v1918_v29 = vsub.f32 %v8511_v43, %v6427_v37  ;;  %v2054_v3 = vmul.f32 1.442695, %v1936_v15  ;;  %v2006_v4 = vmul.f32 1.442695, %v1912_v41 }
 0x513   : > { %4718 = vpow2.f32 %v1994_v44  ;;  %v2010_v12 = vmul.f32 1.442695, %v1914_v35 }
 0x514   : > { %v6460_v62 = vpop.eup %4694  ;;  %4720 = vpow2.f32 %v1998_v57  ;;  %v1885_v57 = vsub.f32 %v6244_v61, %v6490_v26  ;;  %v2018_v34 = vmul.f32 1.442695, %v1918_v29 }
 0x515   : > { %v6464_v13 = vpop.eup %4696  ;;  %4722 = vpow2.f32 %v2002_v53  ;;  %v1920_v53 = vsub.f32 %v8512_v52, %v6427_v37 }
 0x516   : > { %8509 = vst [vmem:[#allocation31_spill] sm:$0xff] %v6464_v13  ;;  %v2074_v36 = vadd.f32 %v6464_v13, %v6460_v62  ;;  %v6472_v46 = vpop.eup %4698  ;;  %4724 = vpow2.f32 %v2034_v8 }
 0x517   : > { %v6479_v38 = vpop.eup %4700  ;;  %4726 = vpow2.f32 %v2038_v30  ;;  %v8513_v30 = vld [vmem:[#allocation22_spill] sm:$0xff] }
 0x518   : > { %v2075_v27 = vadd.f32 %v6472_v46, %v2074_v36  ;;  %v6486_v0 = vpop.eup %4702  ;;  %4728 = vpow2.f32 %v2042_v6  ;;  %v1883_v36 = vsub.f32 %v6240_v18, %v6490_v26  ;;  %v1887_v18 = vsub.f32 %v6248_v23, %v6490_v26  ;;  %v8514_v6 = vld [vmem:[#allocation48_spill] sm:$0xff] }
 0x519   : > { %v6495_v42 = vpop.eup %4704  ;;  %4730 = vpow2.f32 %v2046_v11  ;;  %v1889_v35 = vsub.f32 %v8514_v6, %v6490_v26  ;;  %v1952_v11 = vmul.f32 1.442695, %v1885_v57  ;;  %v8515_v23 = vld [vmem:[#allocation24_spill] sm:$0xff] }
 0x51a   : > { %v2076_v50 = vadd.f32 %v6479_v38, %v2075_v27  ;;  %v6502_v44 = vpop.eup %4706  ;;  %v2014_v27 = vmul.f32 1.442695, %v1916_v48  ;;  %4732 = vpow2.f32 %v2050_v63  ;;  %v1948_v61 = vmul.f32 1.442695, %v1883_v36 }
 0x51b   : > { %v6509_v20 = vpop.eup %4708  ;;  %4734 = vpow2.f32 %v2054_v3  ;;  %v1924_v48 = vsub.f32 %v8515_v23, %v6427_v37  ;;  %v2022_v63 = vmul.f32 1.442695, %v1920_v53  ;;  %v1891_v3 = vsub.f32 %v6256_v58, %v6490_v26 }
 0x51c   : > { %v2077_v9 = vadd.f32 %v6486_v0, %v2076_v50  ;;  %v6516_v15 = vpop.eup %4710  ;;  %v1922_v50 = vsub.f32 %v8513_v30, %v6427_v37  ;;  %4736 = vpow2.f32 %v2006_v4  ;;  %v1895_v53 = vsub.f32 %v6264_v56, %v6490_v26 }
 0x51d   : > { %v6520_v21 = vpop.eup %4712  ;;  %4738 = vpow2.f32 %v2010_v12  ;;  %v8516_v12 = vld [vmem:[#allocation49_spill] sm:$0xff]  ;;  %v2030_v58 = vmul.f32 1.442695, %v1924_v48  ;;  %v1964_v6 = vmul.f32 1.442695, %v1891_v3  ;;  %v1907_v56 = vsub.f32 %v6288_v60, %v6490_v26 }
 0x51e   : > { %v2078_v14 = vadd.f32 %v6495_v42, %v2077_v9  ;;  %v6525_v9 = vpop.eup %4714  ;;  %4740 = vpow2.f32 %v2014_v27  ;;  %v2026_v36 = vmul.f32 1.442695, %v1922_v50  ;;  %v1960_v27 = vmul.f32 1.442695, %v1889_v35 }
 0x51f   : > { %v6529_v43 = vpop.eup %4716  ;;  %4742 = vpow2.f32 %v2018_v34  ;;  %v1909_v35 = vsub.f32 %v6292_v51, %v6490_v26  ;;  %v1913_v60 = vsub.f32 %v6300_v2, %v6490_v26 }
 0x520   : > { %v2079_v55 = vadd.f32 %v6502_v44, %v2078_v14  ;;  %v1956_v14 = vmul.f32 1.442695, %v1887_v18  ;;  %v6534_v4 = vpop.eup %4718  ;;  %4744 = vpow2.f32 %v1948_v61  ;;  %v8518_v61 = vld [vmem:[#allocation23_spill] sm:$0xff] }
 0x521   : > { %v6538_v57 = vpop.eup %4720  ;;  %4746 = vpow2.f32 %v1952_v11 }
 0x522   : > { %v2080_v8 = vadd.f32 %v6509_v20, %v2079_v55  ;;  %v1893_v55 = vsub.f32 %v8516_v12, %v6490_v26  ;;  %v6543_v34 = vpop.eup %4722  ;;  %4748 = vpow2.f32 %v2022_v63 }
 0x523   : > { %v6547_v30 = vpop.eup %4724  ;;  %4750 = vpow2.f32 %v1956_v14 }
 0x524   : > { %v2081_v41 = vadd.f32 %v6516_v15, %v2080_v8  ;;  %v8517_v8 = vld [vmem:[#allocation18_spill] sm:$0xff]  ;;  %v6552_v23 = vpop.eup %4726  ;;  %4752 = vpow2.f32 %v2026_v36  ;;  %v1968_v11 = vmul.f32 1.442695, %v1893_v55  ;;  %v1911_v36 = vsub.f32 %v6296_v19, %v6490_v26 }
 0x525   : > { %v1897_v18 = vsub.f32 %v8517_v8, %v6490_v26  ;;  %v6558_v48 = vpop.eup %4728  ;;  %4754 = vpow2.f32 %v1960_v27  ;;  %v1996_v19 = vmul.f32 1.442695, %v1907_v56 }
 0x526   : > { %v2082_v29 = vadd.f32 %v6520_v21, %v2081_v41  ;;  %v1899_v41 = vsub.f32 %v8518_v61, %v6490_v26  ;;  %v6563_v3 = vpop.eup %4730  ;;  %4756 = vpow2.f32 %v2030_v58  ;;  %v8519_v58 = vld [vmem:[#allocation25_spill] sm:$0xff] }
 0x527   : > { %v1976_v51 = vmul.f32 1.442695, %v1897_v18  ;;  %v6569_v12 = vpop.eup %4732  ;;  %4758 = vpow2.f32 %v1964_v6  ;;  %v1901_v8 = vsub.f32 %v8519_v58, %v6490_v26  ;;  %v2000_v18 = vmul.f32 1.442695, %v1909_v35 }
 0x528   : > { %v2083_v52 = vadd.f32 %v6525_v9, %v2082_v29  ;;  %v1972_v29 = vmul.f32 1.442695, %v1895_v53  ;;  %v6574_v27 = vpop.eup %4734  ;;  %4760 = vpow2.f32 %v1968_v11  ;;  %v1903_v6 = vsub.f32 %v6280_v1, %v6490_v26 }
 0x529   : > { %v1905_v11 = vsub.f32 %v6284_v45, %v6490_v26  ;;  %v1984_v53 = vmul.f32 1.442695, %v1901_v8  ;;  %v8525_v8 = vld [vmem:[#allocation28_spill] sm:$0xff] }
 0x52a   : > { %v2084_v50 = vadd.f32 %v6529_v43, %v2083_v52  ;;  %v1980_v52 = vmul.f32 1.442695, %v1899_v41  ;;  %4762 = vpow2.f32 %v1972_v29  ;;  %v2008_v29 = vmul.f32 1.442695, %v1913_v60 }
 0x52b   : > { %4764 = vpow2.f32 %v1976_v51  ;;  %v1992_v60 = vmul.f32 1.442695, %v1905_v11 }
 0x52c   : > { %v2085_v63 = vadd.f32 %v6534_v4, %v2084_v50  ;;  %v6578_v50 = vpop.eup %4736  ;;  %4766 = vpow2.f32 %v1980_v52 }
 0x52d   : > { %v6583_v41 = vpop.eup %4738  ;;  %4768 = vpow2.f32 %v1996_v19 }
 0x52e   : > { %v2086_v55 = vadd.f32 %v6538_v57, %v2085_v63  ;;  %8520 = vst [vmem:[#allocation34_spill] sm:$0xff] %v6583_v41  ;;  %v2004_v63 = vmul.f32 1.442695, %v1911_v36  ;;  %v6587_v14 = vpop.eup %4740  ;;  %4770 = vpow2.f32 %v2000_v18  ;;  %v8523_v36 = vld [vmem:[#allocation26_spill] sm:$0xff]  ;;  %v1940_v18 = vsub.f32 %v8525_v8, %v6427_v37 }
 0x52f   : > { %8521 = vst [vmem:[#allocation37_spill] sm:$0xff] %v6587_v14  ;;  %v6592_v35 = vpop.eup %4742  ;;  %v1938_v51 = vsub.f32 %v8523_v36, %v6427_v37  ;;  %v1935_v36 = vsub.f32 %v6356_v16, %v6490_v26 }
 0x530   : > { %v2087_v2 = vadd.f32 %v6543_v34, %v2086_v55  ;;  %8522 = vst [vmem:[#allocation21_spill] sm:$0xff] %v6592_v35  ;;  %v6594_v55 = vpop.eup %4744  ;;  %4772 = vpow2.f32 %v2004_v63 }
 0x531   : > { %v6597_v1 = vpop.eup %4746  ;;  %4774 = vpow2.f32 %v2008_v29  ;;  %v2058_v29 = vmul.f32 1.442695, %v1938_v51  ;;  %v1944_v51 = vsub.f32 %v6403_v33, %v6427_v37 }
 0x532   : > { %v2088_v56 = vadd.f32 %v6578_v50, %v2087_v2  ;;  %v1988_v2 = vmul.f32 1.442695, %v1903_v6  ;;  %v6601_v61 = vpop.eup %4748  ;;  %v2111_v52 = vadd.f32 %v6597_v1, %v6594_v55  ;;  %v1942_v6 = vsub.f32 %v6391_v49, %v6427_v37 }
 0x533   : > { %8524 = vst [vmem:[#allocation27_spill] sm:$0xff] %v6601_v61  ;;  %v6606_v19 = vpop.eup %4750  ;;  %4776 = vpow2.f32 %v1984_v53  ;;  %v1917_v37 = vsub.f32 %v6308_v40, %v6490_v26 }
 0x534   : > { %v2089_v58 = vadd.f32 %v6583_v41, %v2088_v56  ;;  %v6610_v56 = vpop.eup %4752  ;;  %4778 = vpow2.f32 %v1988_v2  ;;  %v1937_v41 = vsub.f32 %v6364_v59, %v6490_v26  ;;  %v2066_v16 = vmul.f32 1.442695, %v1942_v6 }
 0x535   : > { %v6616_v11 = vpop.eup %4754  ;;  %4780 = vpow2.f32 %v1992_v60  ;;  %v1915_v59 = vsub.f32 %v6304_v31, %v6490_v26  ;;  %v2052_v60 = vmul.f32 1.442695, %v1935_v36 }
 0x536   : > { %v2090_v45 = vadd.f32 %v6587_v14, %v2089_v58  ;;  %v2112_v58 = vadd.f32 %v6606_v19, %v2111_v52  ;;  %v6620_v14 = vpop.eup %4756  ;;  %4782 = vpow2.f32 %v2058_v29  ;;  %v1919_v29 = vsub.f32 %v6312_v7, %v6490_v26 }
 0x537   : > { %8526 = vst [vmem:[#allocation29_spill] sm:$0xff] %v6620_v14  ;;  %v6626_v53 = vpop.eup %4758 }
 0x538   : > { %v2091_v63 = vadd.f32 %v6592_v35, %v2090_v45  ;;  %v2113_v49 = vadd.f32 %v6616_v11, %v2112_v58  ;;  %v2062_v45 = vmul.f32 1.442695, %v1940_v18  ;;  %v6628_v52 = vpop.eup %4760 }
 0x53a   : > { %v2092_v8 = vadd.f32 %v6601_v61, %v2091_v63  ;;  %v2114_v35 = vadd.f32 %v6626_v53, %v2113_v49  ;;  %v6634_v63 = vpop.eup %4762  ;;  %v2056_v61 = vmul.f32 1.442695, %v1937_v41  ;;  %4784 = vpow2.f32 %v2062_v45 }
 0x53b   : > { %v6638_v58 = vpop.eup %4764  ;;  %4786 = vpow2.f32 %v2066_v16  ;;  %v2012_v45 = vmul.f32 1.442695, %v1915_v59  ;;  %v2016_v16 = vmul.f32 1.442695, %v1917_v37  ;;  %v2020_v59 = vmul.f32 1.442695, %v1919_v29 }
 0x53c   : > { %v2093_v2 = vadd.f32 %v6610_v56, %v2092_v8  ;;  %v2115_v13 = vadd.f32 %v6628_v52, %v2114_v35  ;;  %v6642_v33 = vpop.eup %4766  ;;  %v2070_v8 = vmul.f32 1.442695, %v1944_v51  ;;  %4788 = vpow2.f32 %v2052_v60 }
 0x53d   : > { %v4769_v6 = vpop.eup %4768  ;;  %4790 = vpow2.f32 %v2056_v61  ;;  %v1921_v51 = vsub.f32 %v6316_v39, %v6490_v26  ;;  %v1923_v61 = vsub.f32 %v6320_v32, %v6490_v26 }
 0x53e   : > { %v2094_v18 = vadd.f32 %v6620_v14, %v2093_v2  ;;  %v2116_v36 = vadd.f32 %v6634_v63, %v2115_v13  ;;  %v4771_v49 = vpop.eup %4770  ;;  %4792 = vpow2.f32 %v2070_v8  ;;  %v1927_v14 = vsub.f32 %v6328_v25, %v6490_v26 }
 0x53f   : > { %v6650_v41 = vpop.eup %4772  ;;  %4794 = vpow2.f32 %v2012_v45  ;;  %v2161_v8 = vpack.c.bf16 %v4771_v49, %v4769_v6  ;;  %v2024_v29 = vmul.f32 1.442695, %v1921_v51  ;;  %v1945_v45 = vsub.f32 %v6423_v5, %v6490_v26 }
 0x540   : > { %v2095_v31 = vadd.f32 %v6547_v30, %v2094_v18  ;;  %v2117_v40 = vadd.f32 %v6638_v58, %v2116_v36  ;;  %v6654_v2 = vpop.eup %4774  ;;  %4796 = vpow2.f32 %v2016_v16  ;;  %v1929_v51 = vsub.f32 %v6332_v24, %v6490_v26 }
 0x541   : > { %v2163_v60 = vpack.c.bf16 %v6654_v2, %v6650_v41  ;;  %v4777_v18 = vpop.eup %4776  ;;  %4798 = vpow2.f32 %v2020_v59  ;;  %v1939_v5 = vsub.f32 %v6372_v17, %v6490_v26  ;;  %v1941_v24 = vsub.f32 %v6385_v54, %v6490_v26 }
 0x542   : > { %v2096_v35 = vadd.f32 %v6552_v23, %v2095_v31  ;;  %v2118_v7 = vadd.f32 %v6642_v33, %v2117_v40  ;;  %v2162_v31 = vpack.c.bf16 %v6578_v50, %v6543_v34  ;;  %v4779_v36 = vpop.eup %4778  ;;  %v1925_v40 = vsub.f32 %v6324_v47, %v6490_v26 }
 0x543   : > { %2180 = vmatprep.subr.bf16.mxu1 %v2163_v60  ;;  %v1943_v50 = vsub.f32 %v6397_v22, %v6490_v26  ;;  %v2160_v47 = vpack.c.bf16 %v6538_v57, %v6534_v4  ;;  %v1931_v22 = vsub.f32 %v6340_v10, %v6490_v26  ;;  %4800 = vpow2.f32 %v2024_v29 }
 0x544   : > { %v2097_v13 = vadd.f32 %v6558_v48, %v2096_v35  ;;  %v2119_v37 = vadd.f32 %v4777_v18, %v2118_v7  ;;  %v4781_v35 = vpop.eup %4780  ;;  %2181 = vmatpush1.bf16.msra.mxu1 %v2162_v31  ;;  %v2032_v16 = vmul.f32 1.442695, %v1925_v40  ;;  %v2036_v57 = vmul.f32 1.442695, %v1927_v14 }
 0x545   : > { %2182 = vmatprep.subr.bf16.mxu1 %v2161_v8  ;;  %v2159_v60 = vpack.c.bf16 %v4781_v35, %v4779_v36  ;;  %v6679_v31 = vpop.eup %4782  ;;  %v2072_v10 = vmul.f32 1.442695, %v1945_v45  ;;  %v2158_v17 = vpack.c.bf16 %v6529_v43, %v6525_v9  ;;  %v2157_v14 = vpack.c.bf16 %v4777_v18, %v6642_v33 }
 0x546   : > { %v2098_v39 = vadd.f32 %v6563_v3, %v2097_v13  ;;  %v2120_v34 = vadd.f32 %v4779_v36, %v2119_v37  ;;  %v2028_v13 = vmul.f32 1.442695, %v1923_v61  ;;  %v1933_v40 = vsub.f32 %v6348_v28, %v6490_v26 }
 0x547   : > { %v6687_v61 = vpop.eup %4784  ;;  %v2040_v54 = vmul.f32 1.442695, %v1929_v51  ;;  %v2060_v33 = vmul.f32 1.442695, %v1939_v5  ;;  %v2064_v18 = vmul.f32 1.442695, %v1941_v24  ;;  %v2156_v28 = vpack.c.bf16 %v6520_v21, %v6516_v15 }
 0x548   : > { %v2099_v32 = vadd.f32 %v6569_v12, %v2098_v39  ;;  %v2121_v25 = vadd.f32 %v4781_v35, %v2120_v34  ;;  %2183 = vmatpush1.bf16.msra.mxu1 %v2160_v47  ;;  %v6690_v36 = vpop.eup %4786  ;;  %v2068_v39 = vmul.f32 1.442695, %v1943_v50  ;;  %4802 = vpow2.f32 %v2028_v13 }
 0x549   : > { %2184 = vmatprep.subr.bf16.mxu1 %v2159_v60  ;;  %v6696_v37 = vpop.eup %4788  ;;  %4804 = vpow2.f32 %v2032_v16  ;;  %v2155_v50 = vpack.c.bf16 %v6638_v58, %v6634_v63  ;;  %v2048_v45 = vmul.f32 1.442695, %v1933_v40  ;;  %v2154_v15 = vpack.c.bf16 %v6509_v20, %v6502_v44 }
 0x54a   : > { %v2100_v7 = vadd.f32 %v6574_v27, %v2099_v32  ;;  %v2122_v59 = vadd.f32 %v4769_v6, %v2121_v25  ;;  %v6700_v6 = vpop.eup %4790  ;;  %v2044_v32 = vmul.f32 1.442695, %v1931_v22  ;;  %4806 = vpow2.f32 %v2036_v57 }
 0x54b   : > { %v2175_v43 = vpack.c.bf16 %v6700_v6, %v6696_v37  ;;  %4808 = vpow2.f32 %v2068_v39  ;;  %v2153_v63 = vpack.c.bf16 %v6628_v52, %v6626_v53  ;;  %v2152_v25 = vpack.c.bf16 %v6495_v42, %v6486_v0 }
 0x54c   : > { %v2101_v4 = vadd.f32 %v6679_v31, %v2100_v7  ;;  %v2123_v35 = vadd.f32 %v4771_v49, %v2122_v59  ;;  %2185 = vmatpush1.bf16.msra.mxu1 %v2158_v17  ;;  %v4793_v49 = vpop.eup %4792  ;;  %4810 = vpow2.f32 %v2072_v10  ;;  %v2151_v51 = vpack.c.bf16 %v6616_v11, %v6606_v19  ;;  %v8527_v11 = vld [vmem:[#allocation31_spill] sm:$0xff] }
 0x54d   : > { %2186 = vmatprep.subr.bf16.mxu1 %v2157_v14  ;;  %4812 = vpow2.f32 %v2040_v54  ;;  %v2150_v53 = vpack.c.bf16 %v6479_v38, %v6472_v46  ;;  %v2148_v59 = vpack.c.bf16 %v8527_v11, %v6460_v62  ;;  %v2176_v14 = vpack.c.bf16 %v6687_v61, %v6679_v31  ;;  %v8556_v11 = vld [vmem:[#allocation14_spill] sm:$0xff] }
 0x54e   : > { %v2102_v8 = vadd.f32 %v6687_v61, %v2101_v4  ;;  %v2124_v9 = vadd.f32 %v6650_v41, %v2123_v35  ;;  %v6715_v41 = vpop.eup %4794  ;;  %4814 = vpow2.f32 %v2044_v32  ;;  %v2149_v4 = vpack.c.bf16 %v6597_v1, %v6594_v55 }
 0x54f   : > { %v6718_v47 = vpop.eup %4796  ;;  %4816 = vpow2.f32 %v2060_v33  ;;  %v8529_v31 = vpack.c.bf16 %v6563_v3, %v6558_v48  ;;  %v8535_v48 = vld [vmem:[#allocation21_spill] sm:$0xff]  ;;  %v8536_v3 = vld [vmem:[#allocation27_spill] sm:$0xff] }
 0x550   : > { %v2103_v29 = vadd.f32 %v6690_v36, %v2102_v8  ;;  %v2125_v34 = vadd.f32 %v6654_v2, %v2124_v9  ;;  %2187 = vmatpush1.bf16.msra.mxu1 %v2156_v28  ;;  %4818 = vpow2.f32 %v2064_v18  ;;  %v4799_v58 = vpop.eup %4798  ;;  %v2178_v8 = vpack.c.bf16 %v4793_v49, %v6690_v36  ;;  %v8534_v18 = vld [vmem:[#allocation11_spill] sm:$0xff] }
 0x551   : > { %2188 = vmatprep.subr.bf16.mxu1 %v2155_v50  ;;  %4820 = vpow2.f32 %v2048_v45  ;;  %v4801_v7 = vpop.eup %4800  ;;  %v8528_v36 = vpack.c.bf16 %v6574_v27, %v6569_v12  ;;  %v8532_v27 = vld [vmem:[#allocation42_spill] sm:$0xff]  ;;  %v2166_v50 = vpack.c.bf16 %v8536_v3, %v8535_v48 }
 0x552   : > { %v6710_v26 = vadd.f32 %v4793_v49, %v2103_v29  ;;  %v2126_v13 = vadd.f32 %v6715_v41, %v2125_v34  ;;  %v765_v28 = vadd.f32 %v8534_v18, %v8532_v27  ;;  %v2167_v34 = vpack.c.bf16 %v4801_v7, %v4799_v58 }
 0x554   : > { %v2127_v21 = vadd.f32 %v6718_v47, %v2126_v13  ;;  %2189 = vmatpush1.bf16.msra.mxu1 %v2154_v15  ;;  %v816_v13 = vmul.f32 0.35355338, %v765_v28 }
 0x555   : > { %2190 = vmatprep.subr.bf16.mxu1 %v2153_v63  ;;  %v4803_v44 = vpop.eup %4802  ;;  %v8540_v63 = vld [vmem:[#allocation37_spill] sm:$0xff] }
 0x556   : > { %v2128_v2 = vadd.f32 %v4799_v58, %v2127_v21  ;;  %v4805_v20 = vpop.eup %4804  ;;  %v8539_v21 = vld [vmem:[#allocation34_spill] sm:$0xff]  ;;  %v2226_v58 = vpack.c.bf16 %v816_v13, %v816_v13 }
 0x557   : > { %v4807_v5 = vpop.eup %4806  ;;  %v2169_v61 = vpack.c.bf16 %v4805_v20, %v4803_v44 }
 0x558   : > { %v2129_v60 = vadd.f32 %v4801_v7, %v2128_v2  ;;  %2191 = vmatpush1.bf16.msra.mxu1 %v2152_v25  ;;  %v4809_v52 = vpop.eup %4808  ;;  %v2164_v2 = vpack.c.bf16 %v8540_v63, %v8539_v21 }
 0x559   : > { %2192 = vmatprep.subr.bf16.mxu1 %v2151_v51  ;;  %v4811_v57 = vpop.eup %4810  ;;  %v8541_v51 = vmov 0  }
 0x55a   : > { %v2130_v22 = vadd.f32 %v4803_v44, %v2129_v60  ;;  %v4813_v0 = vpop.eup %4812  ;;  %v2179_v10 = vpack.c.bf16 %v4811_v57, %v4809_v52  ;;  %v8544_v44 = vld [vmem:[#allocation40_spill] sm:$0xff] }
 0x55b   : > { %v4815_v19 = vpop.eup %4814  ;;  %v2171_v49 = vpack.c.bf16 %v4813_v0, %v4807_v5 }
 0x55c   : > { %v2131_v16 = vadd.f32 %v4805_v20, %v2130_v22  ;;  %2193 = vmatpush1.bf16.msra.mxu1 %v2150_v53  ;;  %v4817_v24 = vpop.eup %4816  ;;  %v8545_v20 = vld [vmem:[#allocation54_spill] sm:$0xff]  ;;  %v8546_v22 = vld [vmem:[#allocation45_spill] sm:$0xff]  ;;  %v8548_v53 = vld [vmem:[#allocation47_spill] sm:$0xff] }
 0x55d   : > { %2194 = vmatprep.subr.bf16.mxu1 %v2149_v4  ;;  %v4819_v17 = vpop.eup %4818 }
 0x55e   : > { %v2132_v42 = vadd.f32 %v4807_v5, %v2131_v16  ;;  %v4821_v38 = vpop.eup %4820  ;;  %v2177_v1 = vpack.c.bf16 %v4819_v17, %v4817_v24  ;;  %v8547_v5 = vld [vmem:[#allocation46_spill] sm:$0xff]  ;;  %v6795_v16 = vpop.permute.xlu0 %626 }
 0x55f   : > { %v2173_v32 = vpack.c.bf16 %v4821_v38, %v4815_v19  ;;  %8550 = vst [vmem:[#allocation32_spill] sm:$0xff] %v6795_v16 }
 0x560   : > { %v2133_v39 = vadd.f32 %v4813_v0, %v2132_v42  ;;  %2195 = vmatpush1.bf16.msra.mxu1 %v2148_v59  ;;  %v8554_v42 = vld [vmem:[#allocation51_spill] sm:$0xff] }
 0x561   : > { %2196 = vmatprep.subr.bf16.mxu1 %v2179_v10 }
 0x562   : > { %v2134_v46 = vadd.f32 %v4815_v19, %v2133_v39  ;;  %v6797_v4 = vpop.trf.xlu0  ;;  %v8559_v39 = vld [vmem:[#allocation15_spill] sm:$0xff] }
 0x563   : > { %8551 = vst [vmem:[#allocation35_spill] sm:$0xff] %v6797_v4 }
 0x564   : > { %v2135_v55 = vadd.f32 %v4821_v38, %v2134_v46  ;;  %2197 = vmatpush2.bf16.msra.mxu1 %v2178_v8  ;;  %v8563_v38 = vld [vmem:[#allocation43_spill] sm:$0xff] }
 0x565   : > { %2198 = vmatprep.subr.bf16.mxu1 %v2177_v1  ;;  %v8566_v1 = vld [vmem:[#allocation44_spill] sm:$0xff] }
 0x566   : > { %v2136_v35 = vadd.f32 %v6696_v37, %v2135_v55  ;;  %v8530_v37 = vpack.c.bf16 %v6552_v23, %v6547_v30  ;;  %v2165_v30 = vpack.c.bf16 %v6718_v47, %v6715_v41  ;;  %v8537_v23 = vld [vmem:[#allocation38_spill] sm:$0xff]  ;;  %v8542_v41 = vld [vmem:[#allocation52_spill] sm:$0xff]  ;;  %v8543_v47 = vld [vmem:[#allocation53_spill] sm:$0xff]  ;;  %v6802_v0 = vpop.trf.xlu0 }
 0x567   : > { %8553 = vst [vmem:[#allocation20_spill] sm:$0xff] %v6802_v0 }
 0x568   : > { %v2137_v62 = vadd.f32 %v6700_v6, %v2136_v35  ;;  %2199 = vmatpush2.bf16.msra.mxu1 %v2176_v14  ;;  %v8531_v6 = vld [vmem:[#allocation29_spill] sm:$0xff] }
 0x569   : > { %2200 = vmatprep.subr.bf16.mxu1 %v2175_v43  ;;  %v2168_v12 = vpack.c.bf16 %v8531_v6, %v6610_v56  ;;  %v8533_v43 = vld [vmem:[#allocation10_spill] sm:$0xff]  ;;  %v8538_v56 = vld [vmem:[#allocation36_spill] sm:$0xff]  ;;  %v8567_v35 = vld [vmem:[#allocation41_spill] sm:$0xff] }
 0x56a   : > { %v2138_v40 = vadd.f32 %v4817_v24, %v2137_v62  ;;  %v763_v33 = vadd.f32 %v8533_v43, %v8532_v27  ;;  %v797_v15 = vadd.f32 %v8538_v56, %v8537_v23  ;;  %v6807_v19 = vpop.trf.xlu0 }
 0x56b   : > { %8555 = vst [vmem:[#allocation22_spill] sm:$0xff] %v6807_v19 }
 0x56c   : > { %v2139_v54 = vadd.f32 %v4819_v17, %v2138_v40  ;;  %2201 = vmatpush2.bf16.msra.mxu1 %v8528_v36  ;;  %v815_v45 = vmul.f32 0.35355338, %v763_v33  ;;  %v1527_v7 = vpack.c.bf16 %v797_v15, %v797_v15  ;;  %v8561_v17 = vld [vmem:[#allocation39_spill] sm:$0xff] }
 0x56d   : > { %2202 = vmatprep.subr.bf16.mxu1 %v2173_v32  ;;  %v8568_v40 = vld [vmem:[#allocation19_spill] sm:$0xff] }
 0x56e   : > { %v2140_v29 = vadd.f32 %v4809_v52, %v2139_v54  ;;  %v2225_v25 = vpack.c.bf16 %v815_v45, %v815_v45  ;;  %v8549_v52 = vld [vmem:[#allocation30_spill] sm:$0xff]  ;;  %v6812_v59 = vpop.trf.xlu0  ;;  %v2105_v54 = vrot.slane %v6710_v26, 4 }
 0x56f   : > { %8557 = vst [vmem:[#allocation48_spill] sm:$0xff] %v6812_v59 }
 0x570   : > { %v6746_v9 = vadd.f32 %v4811_v57, %v2140_v29  ;;  %2203 = vmatpush2.bf16.msra.mxu1 %v8529_v31  ;;  %v2312_v60 = vsel %vm906_vm1, %v2225_v25, 0  ;;  %v8552_v57 = vld [vmem:[#allocation50_spill] sm:$0xff]  ;;  %v2106_v36 = vadd.f32 %v2105_v54, %v6710_v26 }
 0x571   : > { %2204 = vmatprep.subr.bf16.mxu1 %v2171_v49 }
 0x572   : > { %v6814_v24 = vpop.trf.xlu0  ;;  %v2142_v32 = vrot.slane %v6746_v9, 4  ;;  %v2107_v49 = vrot.slane %v2106_v36, 2 }
 0x573   : > { %8558 = vst [vmem:[#allocation24_spill] sm:$0xff] %v6814_v24 }
 0x574   : > { %2205 = vmatpush2.bf16.msra.mxu1 %v8530_v37  ;;  %v2143_v29 = vadd.f32 %v2142_v32, %v6746_v9 }
 0x575   : > { %2206 = vmatprep.subr.bf16.mxu1 %v2169_v61  ;;  %v2108_v61 = vadd.f32 %v2107_v49, %v2106_v36 }
 0x576   : > { %v6819_v10 = vpop.trf.xlu0  ;;  %v2144_v31 = vrot.slane %v2143_v29, 2 }
 0x577   : > { %8560 = vst [vmem:[#allocation49_spill] sm:$0xff] %v6819_v10  ;;  %v2109_v6 = vrot.slane %v2108_v61, 1 }
 0x578   : > { %2207 = vmatpush2.bf16.msra.mxu1 %v2168_v12  ;;  %v2145_v37 = vadd.f32 %v2144_v31, %v2143_v29 }
 0x579   : > { %2208 = vmatprep.subr.bf16.mxu1 %v2167_v34  ;;  %v2110_v27 = vadd.f32 %v2109_v6, %v2108_v61 }
 0x57a   : > { %v6824_v46 = vpop.trf.xlu0  ;;  %v2146_v12 = vrot.slane %v2145_v37, 1 }
 0x57b   : > { %8562 = vst [vmem:[#allocation18_spill] sm:$0xff] %v6824_v46  ;;  %4822 = vrcp.f32 %v2110_v27 }
 0x57c   : > { %2209 = vmatpush2.bf16.msra.mxu1 %v2166_v50  ;;  %v2147_v43 = vadd.f32 %v2146_v12, %v2145_v37 }
 0x57d   : > { %2210 = vmatprep.subr.bf16.mxu1 %v2165_v30 }
 0x57e   : > { %v6829_v8 = vpop.trf.xlu0  ;;  %4824 = vrcp.f32 %v2147_v43 }
 0x57f   : > { %8564 = vst [vmem:[#allocation23_spill] sm:$0xff] %v6829_v8 }
 0x580   : > { %2211 = vmatpush2.bf16.msra.mxu1 %v2164_v2 }
 0x581   : > { %4433 = vmatprep.subr.msk.bf16.mxu1 %vm906_vm1, %v2226_v58 }
 0x582   : > { %v6831_v55 = vpop.permute.xlu0 %666 }
 0x583   : > { %2213 = vmatmul.mubr.bf16.vlgmr.msra.gmra.mxu1 %v1527_v7  ;;  %8565 = vst [vmem:[#allocation25_spill] sm:$0xff] %v6831_v55  ;;  %v809_v14 = vadd.f32 %v8567_v35, %v6831_v55 }
 0x584   : > { %2332 = vmatpush1.bf16.msra.mxu1 %v2312_v60  ;;  %2349 = vmatprep.mubr.bf16.mxu1 %v8541_v51 }
 0x585   : > { %v2932_v62 = vpack.c.bf16 %v809_v14, %v809_v14 }
 0x588   : > { %v4823_v33 = vpop.eup %4822 }
 0x58b   : > { %4434 = vmatmul.mubr.msk.bf16.vlgmr.msra.gmra.mxu1 %vm857_vm2, %v8542_v41  ;;  %v4825_v34 = vpop.eup %4824 }
 0x58c   : > { %2359 = vmatprep.mubr.bf16.mxu1 %v8541_v51 }
 0x593   : > { %4435 = vmatmul.mubr.msk.bf16.gmra.mxu1 %vm857_vm2, %v8543_v47 }
 0x594   : > { %2369 = vmatprep.mubr.bf16.mxu1 %v8541_v51 }
 0x59b   : > { %4436 = vmatmul.mubr.msk.bf16.gmra.mxu1 %vm857_vm2, %v8544_v44 }
 0x59c   : > { %2379 = vmatprep.mubr.bf16.mxu1 %v8541_v51 }
 0x5a3   : > { %4437 = vmatmul.mubr.msk.bf16.gmra.mxu1 %vm857_vm2, %v8545_v20 }
 0x5a4   : > { %2389 = vmatprep.mubr.bf16.mxu1 %v8541_v51 }
 0x5ab   : > { %4438 = vmatmul.mubr.msk.bf16.gmra.mxu1 %vm857_vm2, %v8546_v22 }
 0x5ac   : > { %2399 = vmatprep.mubr.bf16.mxu1 %v8541_v51 }
 0x5b3   : > { %4439 = vmatmul.mubr.msk.bf16.gmra.mxu1 %vm857_vm2, %v8547_v5 }
 0x5b4   : > { %2409 = vmatprep.mubr.bf16.mxu1 %v8541_v51 }
 0x5bb   : > { %4440 = vmatmul.mubr.msk.bf16.gmra.mxu1 %vm857_vm2, %v8548_v53 }
 0x5bc   : > { %2419 = vmatprep.mubr.bf16.mxu1 %v8541_v51 }
 0x5c3   : > { %4441 = vmatmul.mubr.msk.bf16.gmra.mxu1 %vm857_vm2, %v8549_v52 }
 0x5c4   : > { %2429 = vmatprep.mubr.bf16.mxu1 %v8541_v51 }
 0x5cb   : > { %4442 = vmatmul.mubr.msk.bf16.gmra.mxu1 %vm857_vm2, %v8552_v57 }
 0x5cc   : > { %2439 = vmatprep.mubr.bf16.mxu1 %v8541_v51 }
 0x5d3   : > { %4443 = vmatmul.mubr.msk.bf16.gmra.mxu1 %vm857_vm2, %v8554_v42 }
 0x5d4   : > { %2449 = vmatprep.mubr.bf16.mxu1 %v8541_v51 }
 0x5db   : > { %4444 = vmatmul.mubr.msk.bf16.gmra.mxu1 %vm857_vm2, %v8556_v11 }
 0x5dc   : > { %2459 = vmatprep.mubr.bf16.mxu1 %v8541_v51 }
 0x5e3   : > { %4445 = vmatmul.mubr.msk.bf16.gmra.mxu1 %vm857_vm2, %v8559_v39 }
 0x5e4   : > { %2469 = vmatprep.mubr.bf16.mxu1 %v8541_v51 }
 0x5eb   : > { %4446 = vmatmul.mubr.msk.bf16.gmra.mxu1 %vm857_vm2, %v8561_v17 }
 0x5ec   : > { %2479 = vmatprep.mubr.bf16.mxu1 %v8541_v51 }
 0x5f3   : > { %4447 = vmatmul.mubr.msk.bf16.gmra.mxu1 %vm857_vm2, %v8563_v38 }
 0x5f4   : > { %2489 = vmatprep.mubr.bf16.mxu1 %v8541_v51 }
 0x5fb   : > { %4448 = vmatmul.mubr.msk.bf16.gmra.mxu1 %vm857_vm2, %v8566_v1 }
 0x5fc   : > { %2499 = vmatprep.mubr.bf16.mxu1 %v8541_v51 }
 0x603   : > { %4449 = vmatmul.mubr.msk.bf16.gmra.mxu1 %vm857_vm2, %v8568_v40 }
 0x604   : > { %3616 = vmatprep.mubr.bf16.mxu1 %v2932_v62 }
 0x643   : > { %v2214_v18 = vpop.f32.mrf.mxu1 }
 0x644   : > { %v6844_v28 = vmul.f32 %v4823_v33, %v2214_v18 }
 0x645   : > { %v2216_v48 = vpop.f32.mrf.mxu1 }
 0x646   : > { %8569 = vst [vmem:[#allocation26_spill] sm:$0xff] %v6844_v28  ;;  %v6848_v9 = vmul.f32 %v4825_v34, %v2216_v48 }
 0x647   : > { %v2218_v50 = vpop.f32.mrf.mxu1 }
 0x648   : > { %8571 = vst [vmem:[#allocation28_spill] sm:$0xff] %v6848_v9 }
 0x649   : > { %v2219_v30 = vpop.f32.mrf.mxu1 }
 0x64b   : > { %v6852_v23 = vpop.f32.mrf.mxu1 }
 0x64d   : > { %v6854_v56 = vpop.f32.mrf.mxu1 }
 0x64f   : > { %v6856_v15 = vpop.f32.mrf.mxu1 }
 0x651   : > { %v6858_v21 = vpop.f32.mrf.mxu1 }
 0x653   : > { %v6860_v63 = vpop.f32.mrf.mxu1 }
 0x654   : > { %v2510_v3 = vmax.f32 %v6852_v23, %v6860_v63 }
 0x655   : > { %v6862_v2 = vpop.f32.mrf.mxu1 }
 0x657   : > { %v6864_v25 = vpop.f32.mrf.mxu1 }
 0x658   : > { %v2511_v28 = vmax.f32 %v6856_v15, %v6864_v25 }
 0x659   : > { %v6866_v58 = vpop.f32.mrf.mxu1 }
 0x65a   : > { %8573 = vst [vmem:[#allocation31_spill] sm:$0xff] %v6866_v58 }
 0x65b   : > { %v6868_v7 = vpop.f32.mrf.mxu1 }
 0x65c   : > { %v2512_v9 = vmax.f32 %v2510_v3, %v6868_v7 }
 0x65d   : > { %v6870_v60 = vpop.f32.mrf.mxu1 }
 0x65f   : > { %v6872_v41 = vpop.f32.mrf.mxu1 }
 0x660   : > { %v2513_v55 = vmax.f32 %v2511_v28, %v6872_v41 }
 0x661   : > { %v6874_v47 = vpop.f32.mrf.mxu1 }
 0x662   : > { %8574 = vst [vmem:[#allocation29_spill] sm:$0xff] %v6874_v47 }
 0x663   : > { %v6876_v44 = vpop.f32.mrf.mxu1 }
 0x664   : > { %v2514_v46 = vmax.f32 %v2512_v9, %v6876_v44 }
 0x665   : > { %v6878_v20 = vpop.f32.mrf.mxu1 }
 0x667   : > { %v6880_v22 = vpop.f32.mrf.mxu1 }
 0x668   : > { %v2515_v10 = vmax.f32 %v2513_v55, %v6880_v22 }
 0x669   : > { %v6882_v5 = vpop.f32.mrf.mxu1 }
 0x66a   : > { %8575 = vst [vmem:[#allocation42_spill] sm:$0xff] %v6882_v5 }
 0x66b   : > { %v6884_v53 = vpop.f32.mrf.mxu1 }
 0x66c   : > { %8576 = vst [vmem:[#allocation10_spill] sm:$0xff] %v6884_v53  ;;  %v2516_v59 = vmax.f32 %v2514_v46, %v6884_v53 }
 0x66d   : > { %v6886_v52 = vpop.f32.mrf.mxu1 }
 0x66e   : > { %8577 = vst [vmem:[#allocation11_spill] sm:$0xff] %v6886_v52 }
 0x66f   : > { %v6888_v57 = vpop.f32.mrf.mxu1 }
 0x670   : > { %v2517_v19 = vmax.f32 %v2515_v10, %v6888_v57 }
 0x671   : > { %v6890_v42 = vpop.f32.mrf.mxu1 }
 0x672   : > { %8578 = vst [vmem:[#allocation21_spill] sm:$0xff] %v6890_v42 }
 0x673   : > { %v6892_v11 = vpop.f32.mrf.mxu1 }
 0x674   : > { %8579 = vst [vmem:[#allocation27_spill] sm:$0xff] %v6892_v11  ;;  %v2518_v4 = vmax.f32 %v2516_v59, %v6892_v11 }
 0x675   : > { %v6894_v39 = vpop.f32.mrf.mxu1 }
 0x677   : > { %v6896_v17 = vpop.f32.mrf.mxu1 }
 0x678   : > { %v2519_v3 = vmax.f32 %v2517_v19, %v6896_v17 }
 0x679   : > { %v6898_v38 = vpop.f32.mrf.mxu1 }
 0x67b   : > { %v6900_v1 = vpop.f32.mrf.mxu1 }
 0x67c   : > { %8580 = vst [vmem:[#allocation38_spill] sm:$0xff] %v6900_v1  ;;  %v2520_v28 = vmax.f32 %v2518_v4, %v6900_v1 }
 0x67d   : > { %v6902_v35 = vpop.f32.mrf.mxu1 }
 0x67f   : > { %v6904_v14 = vpop.f32.mrf.mxu1 }
 0x680   : > { %v2521_v9 = vmax.f32 %v2519_v3, %v6904_v14  ;;  %v2548_v3 = vmax.f32 %v6858_v21, %v6866_v58 }
 0x681   : > { %v6906_v62 = vpop.f32.mrf.mxu1 }
 0x683   : > { %v6908_v40 = vpop.f32.mrf.mxu1 }
 0x684   : > { %v2522_v55 = vmax.f32 %v2520_v28, %v6908_v40 }
 0x685   : > { %v6910_v54 = vpop.f32.mrf.mxu1 }
 0x687   : > { %v6912_v32 = vpop.f32.mrf.mxu1 }
 0x688   : > { %8581 = vst [vmem:[#allocation36_spill] sm:$0xff] %v6912_v32  ;;  %v2523_v46 = vmax.f32 %v2521_v9, %v6912_v32 }
 0x689   : > { %v6914_v36 = vpop.f32.mrf.mxu1 }
 0x68b   : > { %v6916_v29 = vpop.f32.mrf.mxu1 }
 0x68c   : > { %v2524_v10 = vmax.f32 %v2522_v55, %v6916_v29  ;;  %v2547_v55 = vmax.f32 %v6854_v56, %v6862_v2 }
 0x68d   : > { %v6918_v49 = vpop.f32.mrf.mxu1 }
 0x68f   : > { %v6920_v31 = vpop.f32.mrf.mxu1 }
 0x690   : > { %v2525_v59 = vmax.f32 %v2523_v46, %v6920_v31  ;;  %v2550_v46 = vmax.f32 %v2548_v3, %v6874_v47 }
 0x691   : > { %v6922_v61 = vpop.f32.mrf.mxu1 }
 0x692   : > { %v2552_v58 = vmax.f32 %v2550_v46, %v6882_v5 }
 0x693   : > { %v6924_v37 = vpop.f32.mrf.mxu1 }
 0x694   : > { %8582 = vst [vmem:[#allocation34_spill] sm:$0xff] %v6924_v37  ;;  %v2526_v19 = vmax.f32 %v2524_v10, %v6924_v37  ;;  %v2549_v37 = vmax.f32 %v2547_v55, %v6870_v60  ;;  %v2554_v3 = vmax.f32 %v2552_v58, %v6890_v42 }
 0x695   : > { %v6926_v6 = vpop.f32.mrf.mxu1 }
 0x696   : > { %v2556_v46 = vmax.f32 %v2554_v3, %v6898_v38 }
 0x697   : > { %v6928_v12 = vpop.f32.mrf.mxu1 }
 0x698   : > { %8583 = vst [vmem:[#allocation37_spill] sm:$0xff] %v6928_v12  ;;  %v2527_v4 = vmax.f32 %v2525_v59, %v6928_v12  ;;  %v2558_v58 = vmax.f32 %v2556_v46, %v6906_v62 }
 0x699   : > { %v6930_v27 = vpop.f32.mrf.mxu1 }
 0x69b   : > { %v6932_v43 = vpop.f32.mrf.mxu1 }
 0x69c   : > { %8584 = vst [vmem:[#allocation52_spill] sm:$0xff] %v6932_v43  ;;  %v2528_v28 = vmax.f32 %v2526_v19, %v6932_v43  ;;  %v2551_v43 = vmax.f32 %v2549_v37, %v6878_v20 }
 0x69d   : > { %v6934_v33 = vpop.f32.mrf.mxu1 }
 0x69e   : > { %v2553_v55 = vmax.f32 %v2551_v43, %v6886_v52  ;;  %v2560_v43 = vmax.f32 %v2558_v58, %v6914_v36 }
 0x69f   : > { %v6936_v18 = vpop.f32.mrf.mxu1 }
 0x6a0   : > { %8585 = vst [vmem:[#allocation53_spill] sm:$0xff] %v6936_v18  ;;  %v2529_v9 = vmax.f32 %v2527_v4, %v6936_v18  ;;  %v2555_v37 = vmax.f32 %v2553_v55, %v6894_v39 }
 0x6a1   : > { %v6938_v34 = vpop.f32.mrf.mxu1 }
 0x6a2   : > { %v2557_v42 = vmax.f32 %v2555_v37, %v6902_v35 }
 0x6a3   : > { %v6940_v48 = vpop.f32.mrf.mxu1 }
 0x6a4   : > { %v2530_v10 = vmax.f32 %v2528_v28, %v6940_v48  ;;  %v2559_v3 = vmax.f32 %v2557_v42, %v6910_v54 }
 0x6a5   : > { %v6942_v50 = vpop.f32.mrf.mxu1 }
 0x6a7   : > { %v6944_v30 = vpop.f32.mrf.mxu1 }
 0x6a8   : > { %v2531_v59 = vmax.f32 %v2529_v9, %v6944_v30 }
 0x6a9   : > { %v6946_v26 = vpop.f32.mrf.mxu1 }
 0x6ab   : > { %v6948_v13 = vpop.f32.mrf.mxu1 }
 0x6ac   : > { %v2532_v19 = vmax.f32 %v2530_v10, %v6948_v13 }
 0x6ad   : > { %v6954_v45 = vpop.f32.mrf.mxu1 }
 0x6af   : > { %v6958_v8 = vpop.f32.mrf.mxu1 }
 0x6b0   : > { %v2533_v4 = vmax.f32 %v2531_v59, %v6958_v8 }
 0x6b1   : > { %v6962_v24 = vpop.f32.mrf.mxu1 }
 0x6b3   : > { %v6966_v0 = vpop.f32.mrf.mxu1 }
 0x6b4   : > { %v2534_v28 = vmax.f32 %v2532_v19, %v6966_v0 }
 0x6b5   : > { %v6970_v51 = vpop.f32.mrf.mxu1 }
 0x6b7   : > { %v6974_v16 = vpop.f32.mrf.mxu1 }
 0x6b8   : > { %v2535_v9 = vmax.f32 %v2533_v4, %v6974_v16 }
 0x6b9   : > { %v6978_v53 = vpop.f32.mrf.mxu1 }
 0x6bb   : > { %v6982_v11 = vpop.f32.mrf.mxu1 }
 0x6bc   : > { %8586 = vst [vmem:[#allocation40_spill] sm:$0xff] %v6982_v11  ;;  %v2536_v10 = vmax.f32 %v2534_v28, %v6982_v11  ;;  %v2562_v28 = vmax.f32 %v2560_v43, %v6922_v61 }
 0x6bd   : > { %v6986_v1 = vpop.f32.mrf.mxu1 }
 0x6be   : > { %v2564_v55 = vmax.f32 %v2562_v28, %v6930_v27 }
 0x6bf   : > { %v6992_v32 = vpop.f32.mrf.mxu1 }
 0x6c0   : > { %8587 = vst [vmem:[#allocation54_spill] sm:$0xff] %v6992_v32  ;;  %v2537_v59 = vmax.f32 %v2535_v9, %v6992_v32  ;;  %v2561_v32 = vmax.f32 %v2559_v3, %v6918_v49 }
 0x6c1   : > { %v6999_v12 = vpop.f32.mrf.mxu1 }
 0x6c2   : > { %v2563_v46 = vmax.f32 %v2561_v32, %v6926_v6 }
 0x6c3   : > { %v7005_v18 = vpop.f32.mrf.mxu1 }
 0x6c4   : > { %v2538_v19 = vmax.f32 %v2536_v10, %v7005_v18  ;;  %v2566_v10 = vmax.f32 %v2564_v55, %v6938_v34  ;;  %v2565_v37 = vmax.f32 %v2563_v46, %v6934_v33 }
 0x6c5   : > { %v7011_v47 = vpop.f32.mrf.mxu1 }
 0x6c6   : > { %v2568_v58 = vmax.f32 %v2566_v10, %v6946_v26  ;;  %v2567_v42 = vmax.f32 %v2565_v37, %v6942_v50 }
 0x6c7   : > { %v7017_v5 = vpop.f32.mrf.mxu1 }
 0x6c8   : > { %v2539_v4 = vmax.f32 %v2537_v59, %v7017_v5  ;;  %v2569_v3 = vmax.f32 %v2567_v42, %v6954_v45 }
 0x6ca   : > { %v2540_v52 = vmax.f32 %v2538_v19, %v2539_v4  ;;  %v2570_v4 = vmax.f32 %v2568_v58, %v6962_v24  ;;  %v2571_v32 = vmax.f32 %v2569_v3, %v6970_v51 }
 0x6cc   : > { %v2541_v9 = vrot.slane %v2540_v52, 4  ;;  %v2572_v28 = vmax.f32 %v2570_v4, %v6978_v53  ;;  %v2573_v46 = vmax.f32 %v2571_v32, %v6986_v1 }
 0x6ce   : > { %v2542_v11 = vmax.f32 %v2540_v52, %v2541_v9  ;;  %v7037_v52 = vpop.f32.mrf.mxu1  ;;  %v2574_v9 = vmax.f32 %v2572_v28, %v6999_v12  ;;  %v2575_v10 = vmax.f32 %v2573_v46, %v7011_v47 }
 0x6d0   : > { %v2543_v59 = vrot.slane %v2542_v11, 2 }
 0x6d2   : > { %v2544_v19 = vmax.f32 %v2542_v11, %v2543_v59  ;;  %v2576_v11 = vmax.f32 %v2574_v9, %v7037_v52 }
 0x6d4   : > { %v2545_v43 = vrot.slane %v2544_v19, 1  ;;  %v2577_v42 = vmax.f32 %v2575_v10, %v2576_v11 }
 0x6d6   : > { %v7041_v55 = vmax.f32 %v2544_v19, %v2545_v43  ;;  %v2578_v32 = vrot.slane %v2577_v42, 4 }
 0x6d8   : > { %v2584_v59 = vsub.f32 %v6852_v23, %v7041_v55  ;;  %v2586_v37 = vsub.f32 %v6856_v15, %v7041_v55  ;;  %v2588_v58 = vsub.f32 %v6860_v63, %v7041_v55  ;;  %v2590_v19 = vsub.f32 %v6864_v25, %v7041_v55 }
 0x6d9   : > { %v2592_v3 = vsub.f32 %v6868_v7, %v7041_v55  ;;  %v2594_v23 = vsub.f32 %v6872_v41, %v7041_v55  ;;  %v2596_v63 = vsub.f32 %v6876_v44, %v7041_v55  ;;  %v2579_v46 = vmax.f32 %v2577_v42, %v2578_v32  ;;  %v8588_v7 = vld [vmem:[#allocation10_spill] sm:$0xff] }
 0x6da   : > { %v2648_v4 = vmul.f32 1.442695, %v2584_v59  ;;  %v2652_v43 = vmul.f32 1.442695, %v2586_v37  ;;  %v2656_v28 = vmul.f32 1.442695, %v2588_v58  ;;  %v2598_v25 = vsub.f32 %v6880_v22, %v7041_v55 }
 0x6db   : > { %v2660_v15 = vmul.f32 1.442695, %v2590_v19  ;;  %v2664_v9 = vmul.f32 1.442695, %v2592_v3  ;;  %v2668_v11 = vmul.f32 1.442695, %v2594_v23  ;;  %v2600_v10 = vsub.f32 %v8588_v7, %v7041_v55 }
 0x6dc   : > { %4826 = vpow2.f32 %v2648_v4  ;;  %v2672_v59 = vmul.f32 1.442695, %v2596_v63  ;;  %v2602_v41 = vsub.f32 %v6888_v57, %v7041_v55  ;;  %v2580_v37 = vrot.slane %v2579_v46, 2  ;;  %v8589_v58 = vld [vmem:[#allocation27_spill] sm:$0xff]  ;;  %v8590_v22 = vld [vmem:[#allocation38_spill] sm:$0xff] }
 0x6dd   : > { %4828 = vpow2.f32 %v2652_v43  ;;  %v2604_v44 = vsub.f32 %v8589_v58, %v7041_v55  ;;  %v2676_v19 = vmul.f32 1.442695, %v2598_v25  ;;  %v2606_v42 = vsub.f32 %v6896_v17, %v7041_v55 }
 0x6de   : > { %4830 = vpow2.f32 %v2656_v28  ;;  %v2608_v4 = vsub.f32 %v8590_v22, %v7041_v55  ;;  %v2680_v43 = vmul.f32 1.442695, %v2600_v10  ;;  %v2610_v3 = vsub.f32 %v6904_v14, %v7041_v55 }
 0x6df   : > { %4832 = vpow2.f32 %v2660_v15  ;;  %v2684_v28 = vmul.f32 1.442695, %v2602_v41  ;;  %v2581_v32 = vmax.f32 %v2579_v46, %v2580_v37  ;;  %v2612_v23 = vsub.f32 %v6908_v40, %v7041_v55 }
 0x6e0   : > { %4834 = vpow2.f32 %v2664_v9  ;;  %v2688_v15 = vmul.f32 1.442695, %v2604_v44  ;;  %v2628_v17 = vsub.f32 %v6940_v48, %v7041_v55  ;;  %v2692_v9 = vmul.f32 1.442695, %v2606_v42 }
 0x6e1   : > { %4836 = vpow2.f32 %v2668_v11  ;;  %v2630_v25 = vsub.f32 %v6944_v30, %v7041_v55  ;;  %v2696_v14 = vmul.f32 1.442695, %v2608_v4  ;;  %v2632_v40 = vsub.f32 %v6948_v13, %v7041_v55 }
 0x6e2   : > { %4838 = vpow2.f32 %v2672_v59  ;;  %v2700_v7 = vmul.f32 1.442695, %v2610_v3  ;;  %v2582_v10 = vrot.slane %v2581_v32, 1  ;;  %v2634_v48 = vsub.f32 %v6958_v8, %v7041_v55  ;;  %v8592_v8 = vld [vmem:[#allocation36_spill] sm:$0xff] }
 0x6e3   : > { %4840 = vpow2.f32 %v2676_v19  ;;  %v2704_v59 = vmul.f32 1.442695, %v2612_v23  ;;  %v2636_v37 = vsub.f32 %v6966_v0, %v7041_v55  ;;  %v2736_v58 = vmul.f32 1.442695, %v2628_v17  ;;  %v8593_v17 = vld [vmem:[#allocation34_spill] sm:$0xff] }
 0x6e4   : > { %4842 = vpow2.f32 %v2680_v43  ;;  %v2638_v13 = vsub.f32 %v6974_v16, %v7041_v55  ;;  %v2740_v44 = vmul.f32 1.442695, %v2630_v25  ;;  %v2614_v22 = vsub.f32 %v8592_v8, %v7041_v55 }
 0x6e5   : > { %4844 = vpow2.f32 %v2684_v28  ;;  %v2744_v4 = vmul.f32 1.442695, %v2632_v40  ;;  %v7104_v43 = vmax.f32 %v2581_v32, %v2582_v10  ;;  %v2616_v0 = vsub.f32 %v6916_v29, %v7041_v55 }
 0x6e6   : > { %4846 = vpow2.f32 %v2688_v15  ;;  %v2748_v3 = vmul.f32 1.442695, %v2634_v48  ;;  %v2618_v23 = vsub.f32 %v6920_v31, %v7041_v55  ;;  %v2752_v15 = vmul.f32 1.442695, %v2636_v37  ;;  %v8594_v48 = vld [vmem:[#allocation37_spill] sm:$0xff] }
 0x6e7   : > { %4848 = vpow2.f32 %v2692_v9  ;;  %v2620_v9 = vsub.f32 %v8593_v17, %v7041_v55  ;;  %v2756_v32 = vmul.f32 1.442695, %v2638_v13  ;;  %v2708_v29 = vmul.f32 1.442695, %v2614_v22 }
 0x6e8   : > { %4850 = vpow2.f32 %v2696_v14  ;;  %v2712_v40 = vmul.f32 1.442695, %v2616_v0 }
 0x6e9   : > { %v7074_v57 = vpop.eup %4826  ;;  %4852 = vpow2.f32 %v2700_v7  ;;  %v2587_v7 = vsub.f32 %v6858_v21, %v7104_v43  ;;  %v2720_v37 = vmul.f32 1.442695, %v2620_v9 }
 0x6ea   : > { %v7078_v63 = vpop.eup %4828  ;;  %4854 = vpow2.f32 %v2704_v59  ;;  %v2622_v59 = vsub.f32 %v8594_v48, %v7041_v55 }
 0x6eb   : > { %8591 = vst [vmem:[#allocation45_spill] sm:$0xff] %v7078_v63  ;;  %v2776_v46 = vadd.f32 %v7078_v63, %v7074_v57  ;;  %v7086_v11 = vpop.eup %4830  ;;  %4856 = vpow2.f32 %v2736_v58 }
 0x6ec   : > { %v7093_v41 = vpop.eup %4832  ;;  %4858 = vpow2.f32 %v2740_v44  ;;  %v8595_v44 = vld [vmem:[#allocation52_spill] sm:$0xff] }
 0x6ed   : > { %v2777_v30 = vadd.f32 %v7086_v11, %v2776_v46  ;;  %v7100_v42 = vpop.eup %4834  ;;  %4860 = vpow2.f32 %v2744_v4  ;;  %v2585_v46 = vsub.f32 %v6854_v56, %v7104_v43  ;;  %v2589_v56 = vsub.f32 %v6862_v2, %v7104_v43  ;;  %v8596_v4 = vld [vmem:[#allocation31_spill] sm:$0xff]  ;;  %v8597_v2 = vld [vmem:[#allocation53_spill] sm:$0xff] }
 0x6ee   : > { %v7109_v28 = vpop.eup %4836  ;;  %4862 = vpow2.f32 %v2748_v3  ;;  %v2591_v0 = vsub.f32 %v8596_v4, %v7104_v43  ;;  %v2654_v3 = vmul.f32 1.442695, %v2587_v7 }
 0x6ef   : > { %v2778_v19 = vadd.f32 %v7093_v41, %v2777_v30  ;;  %v7116_v14 = vpop.eup %4838  ;;  %v2716_v30 = vmul.f32 1.442695, %v2618_v23  ;;  %4864 = vpow2.f32 %v2752_v15  ;;  %v2650_v21 = vmul.f32 1.442695, %v2585_v46 }
 0x6f0   : > { %v7123_v10 = vpop.eup %4840  ;;  %4866 = vpow2.f32 %v2756_v32  ;;  %v2626_v23 = vsub.f32 %v8597_v2, %v7041_v55  ;;  %v2724_v15 = vmul.f32 1.442695, %v2622_v59  ;;  %v2593_v32 = vsub.f32 %v6870_v60, %v7104_v43 }
 0x6f1   : > { %v2779_v16 = vadd.f32 %v7100_v42, %v2778_v19  ;;  %v7130_v13 = vpop.eup %4842  ;;  %v2624_v19 = vsub.f32 %v8595_v44, %v7041_v55  ;;  %4868 = vpow2.f32 %v2708_v29  ;;  %v2597_v59 = vsub.f32 %v6878_v20, %v7104_v43 }
 0x6f2   : > { %v7134_v8 = vpop.eup %4844  ;;  %4870 = vpow2.f32 %v2712_v40  ;;  %v8598_v40 = vld [vmem:[#allocation29_spill] sm:$0xff]  ;;  %v2732_v60 = vmul.f32 1.442695, %v2626_v23  ;;  %v2666_v4 = vmul.f32 1.442695, %v2593_v32  ;;  %v2609_v20 = vsub.f32 %v6902_v35, %v7104_v43 }
 0x6f3   : > { %v2780_v25 = vadd.f32 %v7109_v28, %v2779_v16  ;;  %v7139_v16 = vpop.eup %4846  ;;  %4872 = vpow2.f32 %v2716_v30  ;;  %v2728_v46 = vmul.f32 1.442695, %v2624_v19  ;;  %v2662_v30 = vmul.f32 1.442695, %v2591_v0 }
 0x6f4   : > { %v7143_v17 = vpop.eup %4848  ;;  %4874 = vpow2.f32 %v2720_v37  ;;  %v2611_v0 = vsub.f32 %v6906_v62, %v7104_v43  ;;  %v2615_v35 = vsub.f32 %v6914_v36, %v7104_v43 }
 0x6f5   : > { %v2781_v31 = vadd.f32 %v7116_v14, %v2780_v25  ;;  %v2658_v25 = vmul.f32 1.442695, %v2589_v56  ;;  %v7148_v29 = vpop.eup %4850  ;;  %4876 = vpow2.f32 %v2650_v21  ;;  %v8600_v21 = vld [vmem:[#allocation11_spill] sm:$0xff] }
 0x6f6   : > { %v7152_v7 = vpop.eup %4852  ;;  %4878 = vpow2.f32 %v2654_v3 }
 0x6f7   : > { %v2782_v58 = vadd.f32 %v7123_v10, %v2781_v31  ;;  %v2595_v31 = vsub.f32 %v8598_v40, %v7104_v43  ;;  %v7157_v37 = vpop.eup %4854  ;;  %4880 = vpow2.f32 %v2724_v15 }
 0x6f8   : > { %v7161_v44 = vpop.eup %4856  ;;  %4882 = vpow2.f32 %v2658_v25 }
 0x6f9   : > { %v2783_v22 = vadd.f32 %v7130_v13, %v2782_v58  ;;  %v8599_v58 = vld [vmem:[#allocation42_spill] sm:$0xff]  ;;  %v7166_v2 = vpop.eup %4858  ;;  %4884 = vpow2.f32 %v2728_v46  ;;  %v2670_v3 = vmul.f32 1.442695, %v2595_v31  ;;  %v2613_v46 = vsub.f32 %v6910_v54, %v7104_v43 }
 0x6fa   : > { %v2599_v56 = vsub.f32 %v8599_v58, %v7104_v43  ;;  %v7172_v23 = vpop.eup %4860  ;;  %4886 = vpow2.f32 %v2662_v30  ;;  %v2698_v54 = vmul.f32 1.442695, %v2609_v20 }
 0x6fb   : > { %v2784_v9 = vadd.f32 %v7134_v8, %v2783_v22  ;;  %v2601_v22 = vsub.f32 %v8600_v21, %v7104_v43  ;;  %v7177_v32 = vpop.eup %4862  ;;  %4888 = vpow2.f32 %v2732_v60  ;;  %v8601_v60 = vld [vmem:[#allocation21_spill] sm:$0xff] }
 0x6fc   : > { %v2678_v62 = vmul.f32 1.442695, %v2599_v56  ;;  %v7183_v40 = vpop.eup %4864  ;;  %4890 = vpow2.f32 %v2666_v4  ;;  %v2603_v58 = vsub.f32 %v8601_v60, %v7104_v43  ;;  %v2702_v56 = vmul.f32 1.442695, %v2611_v0 }
 0x6fd   : > { %v2785_v48 = vadd.f32 %v7139_v16, %v2784_v9  ;;  %v2674_v9 = vmul.f32 1.442695, %v2597_v59  ;;  %v7188_v30 = vpop.eup %4866  ;;  %4892 = vpow2.f32 %v2670_v3  ;;  %v2605_v4 = vsub.f32 %v6894_v39, %v7104_v43 }
 0x6fe   : > { %v2607_v3 = vsub.f32 %v6898_v38, %v7104_v43  ;;  %v2686_v59 = vmul.f32 1.442695, %v2603_v58  ;;  %v8607_v58 = vld [vmem:[#allocation54_spill] sm:$0xff] }
 0x6ff   : > { %v2786_v19 = vadd.f32 %v7143_v17, %v2785_v48  ;;  %v2682_v48 = vmul.f32 1.442695, %v2601_v22  ;;  %4894 = vpow2.f32 %v2674_v9  ;;  %v2710_v9 = vmul.f32 1.442695, %v2615_v35 }
 0x700   : > { %4896 = vpow2.f32 %v2678_v62  ;;  %v2694_v35 = vmul.f32 1.442695, %v2607_v3 }
 0x701   : > { %v2787_v15 = vadd.f32 %v7148_v29, %v2786_v19  ;;  %v7192_v19 = vpop.eup %4868  ;;  %4898 = vpow2.f32 %v2682_v48 }
 0x702   : > { %v7197_v22 = vpop.eup %4870  ;;  %4900 = vpow2.f32 %v2698_v54 }
 0x703   : > { %v2788_v31 = vadd.f32 %v7152_v7, %v2787_v15  ;;  %8602 = vst [vmem:[#allocation46_spill] sm:$0xff] %v7197_v22  ;;  %v2706_v15 = vmul.f32 1.442695, %v2613_v46  ;;  %v7201_v25 = vpop.eup %4872  ;;  %4902 = vpow2.f32 %v2702_v56  ;;  %v8605_v46 = vld [vmem:[#allocation40_spill] sm:$0xff]  ;;  %v2642_v56 = vsub.f32 %v8607_v58, %v7041_v55 }
 0x704   : > { %8603 = vst [vmem:[#allocation47_spill] sm:$0xff] %v7201_v25  ;;  %v7206_v0 = vpop.eup %4874  ;;  %v2640_v62 = vsub.f32 %v8605_v46, %v7041_v55  ;;  %v2637_v46 = vsub.f32 %v6970_v51, %v7104_v43 }
 0x705   : > { %v2789_v36 = vadd.f32 %v7157_v37, %v2788_v31  ;;  %8604 = vst [vmem:[#allocation30_spill] sm:$0xff] %v7206_v0  ;;  %v7208_v31 = vpop.eup %4876  ;;  %4904 = vpow2.f32 %v2706_v15 }
 0x706   : > { %v7211_v39 = vpop.eup %4878  ;;  %4906 = vpow2.f32 %v2710_v9  ;;  %v2760_v9 = vmul.f32 1.442695, %v2640_v62  ;;  %v2646_v62 = vsub.f32 %v7017_v5, %v7041_v55 }
 0x707   : > { %v2790_v20 = vadd.f32 %v7192_v19, %v2789_v36  ;;  %v2690_v36 = vmul.f32 1.442695, %v2605_v4  ;;  %v7215_v21 = vpop.eup %4880  ;;  %v2813_v48 = vadd.f32 %v7211_v39, %v7208_v31  ;;  %v2644_v4 = vsub.f32 %v7005_v18, %v7041_v55 }
 0x708   : > { %8606 = vst [vmem:[#allocation50_spill] sm:$0xff] %v7215_v21  ;;  %v7220_v54 = vpop.eup %4882  ;;  %4908 = vpow2.f32 %v2686_v59  ;;  %v2619_v55 = vsub.f32 %v6922_v61, %v7104_v43 }
 0x709   : > { %v2791_v60 = vadd.f32 %v7197_v22, %v2790_v20  ;;  %v7224_v20 = vpop.eup %4884  ;;  %4910 = vpow2.f32 %v2690_v36  ;;  %v2639_v22 = vsub.f32 %v6978_v53, %v7104_v43  ;;  %v2768_v51 = vmul.f32 1.442695, %v2644_v4 }
 0x70a   : > { %v7230_v3 = vpop.eup %4886  ;;  %4912 = vpow2.f32 %v2694_v35  ;;  %v2617_v53 = vsub.f32 %v6918_v49, %v7104_v43  ;;  %v2754_v35 = vmul.f32 1.442695, %v2637_v46 }
 0x70b   : > { %v2792_v38 = vadd.f32 %v7201_v25, %v2791_v60  ;;  %v2814_v60 = vadd.f32 %v7220_v54, %v2813_v48  ;;  %v7234_v25 = vpop.eup %4888  ;;  %4914 = vpow2.f32 %v2760_v9  ;;  %v2621_v9 = vsub.f32 %v6926_v6, %v7104_v43 }
 0x70c   : > { %8608 = vst [vmem:[#allocation51_spill] sm:$0xff] %v7234_v25  ;;  %v7240_v59 = vpop.eup %4890 }
 0x70d   : > { %v2793_v15 = vadd.f32 %v7206_v0, %v2792_v38  ;;  %v2815_v18 = vadd.f32 %v7230_v3, %v2814_v60  ;;  %v2764_v38 = vmul.f32 1.442695, %v2642_v56  ;;  %v7242_v48 = vpop.eup %4892 }
 0x70f   : > { %v2794_v58 = vadd.f32 %v7215_v21, %v2793_v15  ;;  %v2816_v0 = vadd.f32 %v7240_v59, %v2815_v18  ;;  %v7248_v15 = vpop.eup %4894  ;;  %v2758_v21 = vmul.f32 1.442695, %v2639_v22  ;;  %4916 = vpow2.f32 %v2764_v38 }
 0x710   : > { %v7252_v60 = vpop.eup %4896  ;;  %4918 = vpow2.f32 %v2768_v51  ;;  %v2714_v38 = vmul.f32 1.442695, %v2617_v53  ;;  %v2718_v51 = vmul.f32 1.442695, %v2619_v55  ;;  %v2722_v53 = vmul.f32 1.442695, %v2621_v9 }
 0x711   : > { %v2795_v36 = vadd.f32 %v7224_v20, %v2794_v58  ;;  %v2817_v63 = vadd.f32 %v7242_v48, %v2816_v0  ;;  %v7256_v5 = vpop.eup %4898  ;;  %v2772_v58 = vmul.f32 1.442695, %v2646_v62  ;;  %4920 = vpow2.f32 %v2754_v35 }
 0x712   : > { %v4901_v4 = vpop.eup %4900  ;;  %4922 = vpow2.f32 %v2758_v21  ;;  %v2623_v62 = vsub.f32 %v6930_v27, %v7104_v43  ;;  %v2625_v21 = vsub.f32 %v6934_v33, %v7104_v43 }
 0x713   : > { %v2796_v56 = vadd.f32 %v7234_v25, %v2795_v36  ;;  %v2818_v46 = vadd.f32 %v7248_v15, %v2817_v63  ;;  %v4903_v18 = vpop.eup %4902  ;;  %4924 = vpow2.f32 %v2772_v58  ;;  %v2629_v25 = vsub.f32 %v6942_v50, %v7104_v43 }
 0x714   : > { %v7264_v22 = vpop.eup %4904  ;;  %4926 = vpow2.f32 %v2714_v38  ;;  %v2863_v58 = vpack.c.bf16 %v4903_v18, %v4901_v4  ;;  %v2726_v9 = vmul.f32 1.442695, %v2623_v62  ;;  %v2647_v38 = vsub.f32 %v7037_v52, %v7104_v43 }
 0x715   : > { %v2797_v49 = vadd.f32 %v7161_v44, %v2796_v56  ;;  %v2819_v61 = vadd.f32 %v7252_v60, %v2818_v46  ;;  %v7268_v36 = vpop.eup %4906  ;;  %4928 = vpow2.f32 %v2718_v51  ;;  %v2631_v62 = vsub.f32 %v6946_v26, %v7104_v43 }
 0x716   : > { %v2865_v35 = vpack.c.bf16 %v7268_v36, %v7264_v22  ;;  %v4909_v56 = vpop.eup %4908  ;;  %4930 = vpow2.f32 %v2722_v53  ;;  %v2641_v52 = vsub.f32 %v6986_v1, %v7104_v43  ;;  %v2643_v26 = vsub.f32 %v6999_v12, %v7104_v43 }
 0x717   : > { %v2798_v0 = vadd.f32 %v7166_v2, %v2797_v49  ;;  %v2820_v6 = vadd.f32 %v7256_v5, %v2819_v61  ;;  %v2864_v49 = vpack.c.bf16 %v7192_v19, %v7157_v37  ;;  %v4911_v46 = vpop.eup %4910  ;;  %v2627_v61 = vsub.f32 %v6938_v34, %v7104_v43 }
 0x718   : > { %2882 = vmatprep.subr.bf16.mxu0 %v2865_v35  ;;  %v2645_v19 = vsub.f32 %v7011_v47, %v7104_v43  ;;  %v2862_v34 = vpack.c.bf16 %v7152_v7, %v7148_v29  ;;  %v2633_v47 = vsub.f32 %v6954_v45, %v7104_v43  ;;  %4932 = vpow2.f32 %v2726_v9 }
 0x719   : > { %v2799_v63 = vadd.f32 %v7172_v23, %v2798_v0  ;;  %v2821_v55 = vadd.f32 %v4909_v56, %v2820_v6  ;;  %v4913_v0 = vpop.eup %4912  ;;  %2883 = vmatpush1.bf16.msra.mxu0 %v2864_v49  ;;  %v2734_v51 = vmul.f32 1.442695, %v2627_v61  ;;  %v2738_v7 = vmul.f32 1.442695, %v2629_v25 }
 0x71a   : > { %2884 = vmatprep.subr.bf16.mxu0 %v2863_v58  ;;  %v2861_v35 = vpack.c.bf16 %v4913_v0, %v4911_v46  ;;  %v7293_v49 = vpop.eup %4914  ;;  %v2774_v45 = vmul.f32 1.442695, %v2647_v38  ;;  %v2860_v1 = vpack.c.bf16 %v7143_v17, %v7139_v16  ;;  %v2859_v25 = vpack.c.bf16 %v4909_v56, %v7256_v5 }
 0x71b   : > { %v2800_v27 = vadd.f32 %v7177_v32, %v2799_v63  ;;  %v2822_v37 = vadd.f32 %v4911_v46, %v2821_v55  ;;  %v2730_v63 = vmul.f32 1.442695, %v2625_v21  ;;  %v2635_v61 = vsub.f32 %v6962_v24, %v7104_v43 }
 0x71c   : > { %v7301_v21 = vpop.eup %4916  ;;  %v2742_v12 = vmul.f32 1.442695, %v2631_v62  ;;  %v2762_v5 = vmul.f32 1.442695, %v2641_v52  ;;  %v2766_v56 = vmul.f32 1.442695, %v2643_v26  ;;  %v2858_v24 = vpack.c.bf16 %v7134_v8, %v7130_v13 }
 0x71d   : > { %v2801_v33 = vadd.f32 %v7183_v40, %v2800_v27  ;;  %v2823_v50 = vadd.f32 %v4913_v0, %v2822_v37  ;;  %2885 = vmatpush1.bf16.msra.mxu0 %v2862_v34  ;;  %v7304_v46 = vpop.eup %4918  ;;  %v2770_v27 = vmul.f32 1.442695, %v2645_v19  ;;  %4934 = vpow2.f32 %v2730_v63 }
 0x71e   : > { %2886 = vmatprep.subr.bf16.mxu0 %v2861_v35  ;;  %v7310_v55 = vpop.eup %4920  ;;  %4936 = vpow2.f32 %v2734_v51  ;;  %v2857_v19 = vpack.c.bf16 %v7252_v60, %v7248_v15  ;;  %v2750_v38 = vmul.f32 1.442695, %v2635_v61  ;;  %v2856_v13 = vpack.c.bf16 %v7123_v10, %v7116_v14 }
 0x71f   : > { %v2802_v6 = vadd.f32 %v7188_v30, %v2801_v33  ;;  %v2824_v53 = vadd.f32 %v4901_v4, %v2823_v50  ;;  %v7314_v4 = vpop.eup %4922  ;;  %v2746_v33 = vmul.f32 1.442695, %v2633_v47  ;;  %4938 = vpow2.f32 %v2738_v7 }
 0x720   : > { %v2877_v17 = vpack.c.bf16 %v7314_v4, %v7310_v55  ;;  %4940 = vpow2.f32 %v2770_v27  ;;  %v2855_v15 = vpack.c.bf16 %v7242_v48, %v7240_v59  ;;  %v2854_v50 = vpack.c.bf16 %v7109_v28, %v7100_v42 }
 0x721   : > { %v2803_v29 = vadd.f32 %v7293_v49, %v2802_v6  ;;  %v2825_v0 = vadd.f32 %v4903_v18, %v2824_v53  ;;  %2887 = vmatpush1.bf16.msra.mxu0 %v2860_v1  ;;  %v4925_v18 = vpop.eup %4924  ;;  %4942 = vpow2.f32 %v2774_v45  ;;  %v2853_v62 = vpack.c.bf16 %v7230_v3, %v7220_v54  ;;  %v8609_v3 = vld [vmem:[#allocation45_spill] sm:$0xff] }
 0x722   : > { %2888 = vmatprep.subr.bf16.mxu0 %v2859_v25  ;;  %4944 = vpow2.f32 %v2742_v12  ;;  %v2852_v59 = vpack.c.bf16 %v7093_v41, %v7086_v11  ;;  %v2850_v53 = vpack.c.bf16 %v8609_v3, %v7074_v57  ;;  %v2878_v25 = vpack.c.bf16 %v7301_v21, %v7293_v49  ;;  %v8630_v3 = vld [vmem:[#allocation18_spill] sm:$0xff] }
 0x723   : > { %v2804_v58 = vadd.f32 %v7301_v21, %v2803_v29  ;;  %v2826_v16 = vadd.f32 %v7264_v22, %v2825_v0  ;;  %v7329_v22 = vpop.eup %4926  ;;  %4946 = vpow2.f32 %v2746_v33  ;;  %v2851_v29 = vpack.c.bf16 %v7211_v39, %v7208_v31 }
 0x724   : > { %v7332_v34 = vpop.eup %4928  ;;  %4948 = vpow2.f32 %v2762_v5  ;;  %v8611_v49 = vpack.c.bf16 %v7177_v32, %v7172_v23  ;;  %v8617_v23 = vld [vmem:[#allocation30_spill] sm:$0xff] }
 0x725   : > { %v2805_v9 = vadd.f32 %v7304_v46, %v2804_v58  ;;  %v2827_v37 = vadd.f32 %v7268_v36, %v2826_v16  ;;  %2889 = vmatpush1.bf16.msra.mxu0 %v2858_v24  ;;  %4950 = vpow2.f32 %v2766_v56  ;;  %v4931_v60 = vpop.eup %4930  ;;  %v2880_v58 = vpack.c.bf16 %v4925_v18, %v7304_v46  ;;  %v8616_v56 = vld [vmem:[#allocation13_spill] sm:$0xff]  ;;  %v8618_v32 = vld [vmem:[#allocation50_spill] sm:$0xff] }
 0x726   : > { %2890 = vmatprep.subr.bf16.mxu0 %v2857_v19  ;;  %4952 = vpow2.f32 %v2750_v38  ;;  %v4933_v6 = vpop.eup %4932  ;;  %v8610_v46 = vpack.c.bf16 %v7188_v30, %v7183_v40  ;;  %v8614_v30 = vld [vmem:[#allocation32_spill] sm:$0xff]  ;;  %v2868_v19 = vpack.c.bf16 %v8618_v32, %v8617_v23 }
 0x727   : > { %v7324_v43 = vadd.f32 %v4925_v18, %v2805_v9  ;;  %v2828_v63 = vadd.f32 %v7329_v22, %v2827_v37  ;;  %v769_v24 = vadd.f32 %v8616_v56, %v8614_v30  ;;  %v2869_v37 = vpack.c.bf16 %v4933_v6, %v4931_v60 }
 0x729   : > { %v2829_v8 = vadd.f32 %v7332_v34, %v2828_v63  ;;  %2891 = vmatpush1.bf16.msra.mxu0 %v2856_v13  ;;  %v818_v63 = vmul.f32 0.35355338, %v769_v24 }
 0x72a   : > { %2892 = vmatprep.subr.bf16.mxu0 %v2855_v15  ;;  %v4935_v14 = vpop.eup %4934  ;;  %v8622_v15 = vld [vmem:[#allocation47_spill] sm:$0xff] }
 0x72b   : > { %v2830_v36 = vadd.f32 %v4931_v60, %v2829_v8  ;;  %v4937_v10 = vpop.eup %4936  ;;  %v8621_v8 = vld [vmem:[#allocation46_spill] sm:$0xff]  ;;  %v2928_v60 = vpack.c.bf16 %v818_v63, %v818_v63 }
 0x72c   : > { %v4939_v52 = vpop.eup %4938  ;;  %v2871_v21 = vpack.c.bf16 %v4937_v10, %v4935_v14 }
 0x72d   : > { %v2831_v35 = vadd.f32 %v4933_v6, %v2830_v36  ;;  %2893 = vmatpush1.bf16.msra.mxu0 %v2854_v50  ;;  %v4941_v48 = vpop.eup %4940  ;;  %v2866_v36 = vpack.c.bf16 %v8622_v15, %v8621_v8 }
 0x72e   : > { %2894 = vmatprep.subr.bf16.mxu0 %v2853_v62  ;;  %v4943_v7 = vpop.eup %4942  ;;  %v8623_v62 = vmov 0  }
 0x72f   : > { %v2832_v47 = vadd.f32 %v4935_v14, %v2831_v35  ;;  %v4945_v42 = vpop.eup %4944  ;;  %v2881_v45 = vpack.c.bf16 %v4943_v7, %v4941_v48 }
 0x730   : > { %v4947_v54 = vpop.eup %4946  ;;  %v2873_v18 = vpack.c.bf16 %v4945_v42, %v4939_v52 }
 0x731   : > { %v2833_v51 = vadd.f32 %v4937_v10, %v2832_v47  ;;  %2895 = vmatpush1.bf16.msra.mxu0 %v2852_v59  ;;  %v4949_v26 = vpop.eup %4948 }
 0x732   : > { %2896 = vmatprep.subr.bf16.mxu0 %v2851_v29  ;;  %v4951_v1 = vpop.eup %4950  ;;  %v8625_v29 = vld [vmem:[#allocation20_spill] sm:$0xff] }
 0x733   : > { %v2834_v28 = vadd.f32 %v4939_v52, %v2833_v51  ;;  %v4953_v41 = vpop.eup %4952  ;;  %v2879_v39 = vpack.c.bf16 %v4951_v1, %v4949_v26  ;;  %v8624_v51 = vld [vmem:[#allocation35_spill] sm:$0xff] }
 0x734   : > { %v2875_v33 = vpack.c.bf16 %v4953_v41, %v4947_v54 }
 0x735   : > { %v2835_v27 = vadd.f32 %v4945_v42, %v2834_v28  ;;  %2897 = vmatpush1.bf16.msra.mxu0 %v2850_v53  ;;  %v8627_v42 = vld [vmem:[#allocation48_spill] sm:$0xff]  ;;  %v8631_v53 = vld [vmem:[#allocation23_spill] sm:$0xff] }
 0x736   : > { %2898 = vmatprep.subr.bf16.mxu0 %v2881_v45  ;;  %v8628_v28 = vld [vmem:[#allocation24_spill] sm:$0xff] }
 0x737   : > { %v2836_v11 = vadd.f32 %v4947_v54, %v2835_v27  ;;  %v8629_v54 = vld [vmem:[#allocation49_spill] sm:$0xff] }
 0x739   : > { %v2837_v31 = vadd.f32 %v4953_v41, %v2836_v11  ;;  %2899 = vmatpush2.bf16.msra.mxu0 %v2880_v58 }
 0x73a   : > { %2900 = vmatprep.subr.bf16.mxu0 %v2879_v39 }
 0x73b   : > { %v2838_v0 = vadd.f32 %v7310_v55, %v2837_v31  ;;  %v8612_v55 = vpack.c.bf16 %v7166_v2, %v7161_v44  ;;  %v2867_v44 = vpack.c.bf16 %v7332_v34, %v7329_v22  ;;  %v8619_v2 = vld [vmem:[#allocation9_spill] sm:$0xff]  ;;  %v2941_v22 = vpop.trf.xlu1 }
 0x73d   : > { %v2839_v57 = vadd.f32 %v7314_v4, %v2838_v0  ;;  %2901 = vmatpush2.bf16.msra.mxu0 %v2878_v25  ;;  %v8613_v4 = vld [vmem:[#allocation51_spill] sm:$0xff] }
 0x73e   : > { %2902 = vmatprep.subr.bf16.mxu0 %v2877_v17  ;;  %v2870_v40 = vpack.c.bf16 %v8613_v4, %v7224_v20  ;;  %v8615_v17 = vld [vmem:[#allocation12_spill] sm:$0xff] }
 0x73f   : > { %v2840_v61 = vadd.f32 %v4949_v26, %v2839_v57  ;;  %v767_v5 = vadd.f32 %v8615_v17, %v8614_v30  ;;  %v8620_v20 = vld [vmem:[#allocation8_spill] sm:$0xff]  ;;  %v2942_v34 = vpop.trf.xlu1  ;;  %v2807_v26 = vrot.slane %v7324_v43, 4 }
 0x740   : > { %v803_v13 = vadd.f32 %v8620_v20, %v8619_v2 }
 0x741   : > { %v2841_v12 = vadd.f32 %v4951_v1, %v2840_v61  ;;  %2903 = vmatpush2.bf16.msra.mxu0 %v8610_v46  ;;  %v817_v38 = vmul.f32 0.35355338, %v767_v5  ;;  %v2808_v45 = vadd.f32 %v2807_v26, %v7324_v43 }
 0x742   : > { %2904 = vmatprep.subr.bf16.mxu0 %v2875_v33  ;;  %v2229_v6 = vpack.c.bf16 %v803_v13, %v803_v13 }
 0x743   : > { %v2842_v9 = vadd.f32 %v4941_v48, %v2841_v12  ;;  %v2927_v50 = vpack.c.bf16 %v817_v38, %v817_v38  ;;  %v2943_v14 = vpop.trf.xlu1  ;;  %v2809_v11 = vrot.slane %v2808_v45, 2 }
 0x745   : > { %v7360_v16 = vadd.f32 %v4943_v7, %v2842_v9  ;;  %2905 = vmatpush2.bf16.msra.mxu0 %v8611_v49  ;;  %v3014_v35 = vsel %vm906_vm1, %v2927_v50, 0  ;;  %v8626_v7 = vld [vmem:[#allocation22_spill] sm:$0xff]  ;;  %v2810_v58 = vadd.f32 %v2809_v11, %v2808_v45 }
 0x746   : > { %2906 = vmatprep.subr.bf16.mxu0 %v2873_v18 }
 0x747   : > { %v2944_v10 = vpop.trf.xlu1  ;;  %v2844_v27 = vrot.slane %v7360_v16, 4  ;;  %v2811_v39 = vrot.slane %v2810_v58, 1 }
 0x749   : > { %2907 = vmatpush2.bf16.msra.mxu0 %v8612_v55  ;;  %v2845_v1 = vadd.f32 %v2844_v27, %v7360_v16  ;;  %v2812_v25 = vadd.f32 %v2811_v39, %v2810_v58 }
 0x74a   : > { %2908 = vmatprep.subr.bf16.mxu0 %v2871_v21 }
 0x74b   : > { %v2945_v47 = vpop.trf.xlu1  ;;  %v2846_v41 = vrot.slane %v2845_v1, 2  ;;  %4954 = vrcp.f32 %v2812_v25 }
 0x74d   : > { %2909 = vmatpush2.bf16.msra.mxu0 %v2870_v40  ;;  %v2847_v31 = vadd.f32 %v2846_v41, %v2845_v1 }
 0x74e   : > { %2910 = vmatprep.subr.bf16.mxu0 %v2869_v37 }
 0x74f   : > { %v2946_v52 = vpop.trf.xlu1  ;;  %v2848_v0 = vrot.slane %v2847_v31, 1 }
 0x751   : > { %2911 = vmatpush2.bf16.msra.mxu0 %v2868_v19  ;;  %v2849_v57 = vadd.f32 %v2848_v0, %v2847_v31 }
 0x752   : > { %2912 = vmatprep.subr.bf16.mxu0 %v2867_v44 }
 0x753   : > { %v2947_v59 = vpop.trf.xlu1  ;;  %4956 = vrcp.f32 %v2849_v57 }
 0x755   : > { %2913 = vmatpush2.bf16.msra.mxu0 %v2866_v36 }
 0x756   : > { %4450 = vmatprep.subr.msk.bf16.mxu0 %vm906_vm1, %v2928_v60 }
 0x757   : > { %v2948_v48 = vpop.trf.xlu1 }
 0x758   : > { %2915 = vmatmul.mubr.bf16.vlgmr.msra.gmra.mxu0 %v2229_v6  ;;  %v4955_v61 = vpop.eup %4954 }
 0x759   : > { %3034 = vmatpush1.bf16.msra.mxu0 %v3014_v35  ;;  %3051 = vmatprep.mubr.bf16.mxu0 %v8623_v62 }
 0x760   : > { %4451 = vmatmul.mubr.msk.bf16.vlgmr.msra.gmra.mxu0 %vm857_vm2, %v2941_v22  ;;  %v4957_v46 = vpop.eup %4956 }
 0x761   : > { %3061 = vmatprep.mubr.bf16.mxu0 %v8623_v62 }
 0x768   : > { %4452 = vmatmul.mubr.msk.bf16.gmra.mxu0 %vm857_vm2, %v2942_v34 }
 0x769   : > { %3071 = vmatprep.mubr.bf16.mxu0 %v8623_v62 }
 0x770   : > { %4453 = vmatmul.mubr.msk.bf16.gmra.mxu0 %vm857_vm2, %v2943_v14 }
 0x771   : > { %3081 = vmatprep.mubr.bf16.mxu0 %v8623_v62 }
 0x778   : > { %4454 = vmatmul.mubr.msk.bf16.gmra.mxu0 %vm857_vm2, %v2944_v10 }
 0x779   : > { %3091 = vmatprep.mubr.bf16.mxu0 %v8623_v62 }
 0x780   : > { %4455 = vmatmul.mubr.msk.bf16.gmra.mxu0 %vm857_vm2, %v2945_v47 }
 0x781   : > { %3101 = vmatprep.mubr.bf16.mxu0 %v8623_v62 }
 0x788   : > { %4456 = vmatmul.mubr.msk.bf16.gmra.mxu0 %vm857_vm2, %v2946_v52 }
 0x789   : > { %3111 = vmatprep.mubr.bf16.mxu0 %v8623_v62 }
 0x790   : > { %4457 = vmatmul.mubr.msk.bf16.gmra.mxu0 %vm857_vm2, %v2947_v59 }
 0x791   : > { %3121 = vmatprep.mubr.bf16.mxu0 %v8623_v62 }
 0x798   : > { %4458 = vmatmul.mubr.msk.bf16.gmra.mxu0 %vm857_vm2, %v2948_v48 }
 0x799   : > { %3131 = vmatprep.mubr.bf16.mxu0 %v8623_v62 }
 0x7a0   : > { %4459 = vmatmul.mubr.msk.bf16.gmra.mxu0 %vm857_vm2, %v8624_v51 }
 0x7a1   : > { %3141 = vmatprep.mubr.bf16.mxu0 %v8623_v62 }
 0x7a8   : > { %4460 = vmatmul.mubr.msk.bf16.gmra.mxu0 %vm857_vm2, %v8625_v29 }
 0x7a9   : > { %3151 = vmatprep.mubr.bf16.mxu0 %v8623_v62 }
 0x7b0   : > { %4461 = vmatmul.mubr.msk.bf16.gmra.mxu0 %vm857_vm2, %v8626_v7 }
 0x7b1   : > { %3161 = vmatprep.mubr.bf16.mxu0 %v8623_v62 }
 0x7b8   : > { %4462 = vmatmul.mubr.msk.bf16.gmra.mxu0 %vm857_vm2, %v8627_v42 }
 0x7b9   : > { %3171 = vmatprep.mubr.bf16.mxu0 %v8623_v62 }
 0x7c0   : > { %4463 = vmatmul.mubr.msk.bf16.gmra.mxu0 %vm857_vm2, %v8628_v28 }
 0x7c1   : > { %3181 = vmatprep.mubr.bf16.mxu0 %v8623_v62 }
 0x7c8   : > { %4464 = vmatmul.mubr.msk.bf16.gmra.mxu0 %vm857_vm2, %v8629_v54 }
 0x7c9   : > { %3191 = vmatprep.mubr.bf16.mxu0 %v8623_v62 }
 0x7d0   : > { %4465 = vmatmul.mubr.msk.bf16.gmra.mxu0 %vm857_vm2, %v8630_v3 }
 0x7d1   : > { %3201 = vmatprep.mubr.bf16.mxu0 %v8623_v62 }
 0x7d8   : > { %4466 = vmatmul.mubr.msk.bf16.gmra.mxu0 %vm857_vm2, %v8631_v53 }
 0x818   : > { %v2916_v12 = vpop.f32.mrf.mxu0 }
 0x819   : > { %v7428_v33 = vmul.f32 %v4955_v61, %v2916_v12 }
 0x81a   : > { %v2918_v9 = vpop.f32.mrf.mxu0 }
 0x81b   : > { %8632 = vst [vmem:[#allocation14_spill] sm:$0xff] %v7428_v33  ;;  %v7430_v18 = vmul.f32 %v4957_v46, %v2918_v9 }
 0x81c   : > { %v2920_v43 = vpop.f32.mrf.mxu0 }
 0x81d   : > { %8633 = vst [vmem:[#allocation15_spill] sm:$0xff] %v7430_v18 }
 0x81e   : > { %v2921_v16 = vpop.f32.mrf.mxu0 }
 0x820   : > { %v7432_v49 = vpop.f32.mrf.mxu0 }
 0x822   : > { %v7434_v21 = vpop.f32.mrf.mxu0 }
 0x824   : > { %v7436_v55 = vpop.f32.mrf.mxu0 }
 0x826   : > { %v7438_v4 = vpop.f32.mrf.mxu0 }
 0x828   : > { %v7440_v40 = vpop.f32.mrf.mxu0 }
 0x829   : > { %v3212_v58 = vmax.f32 %v7432_v49, %v7440_v40 }
 0x82a   : > { %v7442_v30 = vpop.f32.mrf.mxu0 }
 0x82c   : > { %v7444_v17 = vpop.f32.mrf.mxu0 }
 0x82d   : > { %v3213_v31 = vmax.f32 %v7436_v55, %v7444_v17 }
 0x82e   : > { %v7446_v5 = vpop.f32.mrf.mxu0 }
 0x82f   : > { %8634 = vst [vmem:[#allocation39_spill] sm:$0xff] %v7446_v5 }
 0x830   : > { %v7448_v56 = vpop.f32.mrf.mxu0 }
 0x831   : > { %v3214_v0 = vmax.f32 %v3212_v58, %v7448_v56 }
 0x832   : > { %v7450_v24 = vpop.f32.mrf.mxu0 }
 0x834   : > { %v7452_v37 = vpop.f32.mrf.mxu0 }
 0x835   : > { %v3215_v25 = vmax.f32 %v3213_v31, %v7452_v37 }
 0x836   : > { %v7454_v23 = vpop.f32.mrf.mxu0 }
 0x837   : > { %8635 = vst [vmem:[#allocation43_spill] sm:$0xff] %v7454_v23 }
 0x838   : > { %v7456_v32 = vpop.f32.mrf.mxu0 }
 0x839   : > { %v3216_v61 = vmax.f32 %v3214_v0, %v7456_v32 }
 0x83a   : > { %v7458_v19 = vpop.f32.mrf.mxu0 }
 0x83c   : > { %v7460_v38 = vpop.f32.mrf.mxu0 }
 0x83d   : > { %v3217_v12 = vmax.f32 %v3215_v25, %v7460_v38 }
 0x83e   : > { %v7462_v63 = vpop.f32.mrf.mxu0 }
 0x83f   : > { %8636 = vst [vmem:[#allocation44_spill] sm:$0xff] %v7462_v63 }
 0x840   : > { %v7464_v44 = vpop.f32.mrf.mxu0 }
 0x841   : > { %8637 = vst [vmem:[#allocation41_spill] sm:$0xff] %v7464_v44  ;;  %v3218_v9 = vmax.f32 %v3216_v61, %v7464_v44 }
 0x842   : > { %v7466_v2 = vpop.f32.mrf.mxu0 }
 0x843   : > { %8638 = vst [vmem:[#allocation19_spill] sm:$0xff] %v7466_v2 }
 0x844   : > { %v7468_v20 = vpop.f32.mrf.mxu0 }
 0x845   : > { %v3219_v43 = vmax.f32 %v3217_v12, %v7468_v20 }
 0x846   : > { %v7470_v13 = vpop.f32.mrf.mxu0 }
 0x847   : > { %8639 = vst [vmem:[#allocation10_spill] sm:$0xff] %v7470_v13 }
 0x848   : > { %v7472_v8 = vpop.f32.mrf.mxu0 }
 0x849   : > { %8640 = vst [vmem:[#allocation27_spill] sm:$0xff] %v7472_v8  ;;  %v3220_v18 = vmax.f32 %v3218_v9, %v7472_v8 }
 0x84a   : > { %v7474_v15 = vpop.f32.mrf.mxu0 }
 0x84c   : > { %v7476_v36 = vpop.f32.mrf.mxu0 }
 0x84d   : > { %v3221_v58 = vmax.f32 %v3219_v43, %v7476_v36 }
 0x84e   : > { %v7478_v50 = vpop.f32.mrf.mxu0 }
 0x850   : > { %v7480_v60 = vpop.f32.mrf.mxu0 }
 0x851   : > { %8641 = vst [vmem:[#allocation38_spill] sm:$0xff] %v7480_v60  ;;  %v3222_v31 = vmax.f32 %v3220_v18, %v7480_v60 }
 0x852   : > { %v7482_v6 = vpop.f32.mrf.mxu0 }
 0x854   : > { %v7484_v35 = vpop.f32.mrf.mxu0 }
 0x855   : > { %v3223_v0 = vmax.f32 %v3221_v58, %v7484_v35  ;;  %v3250_v58 = vmax.f32 %v7438_v4, %v7446_v5 }
 0x856   : > { %v7486_v22 = vpop.f32.mrf.mxu0 }
 0x858   : > { %v7488_v34 = vpop.f32.mrf.mxu0 }
 0x859   : > { %v3224_v25 = vmax.f32 %v3222_v31, %v7488_v34 }
 0x85a   : > { %v7490_v14 = vpop.f32.mrf.mxu0 }
 0x85c   : > { %v7492_v10 = vpop.f32.mrf.mxu0 }
 0x85d   : > { %8642 = vst [vmem:[#allocation36_spill] sm:$0xff] %v7492_v10  ;;  %v3225_v61 = vmax.f32 %v3223_v0, %v7492_v10 }
 0x85e   : > { %v7494_v47 = vpop.f32.mrf.mxu0 }
 0x860   : > { %v7496_v52 = vpop.f32.mrf.mxu0 }
 0x861   : > { %v3226_v12 = vmax.f32 %v3224_v25, %v7496_v52  ;;  %v3249_v25 = vmax.f32 %v7434_v21, %v7442_v30 }
 0x862   : > { %v7498_v59 = vpop.f32.mrf.mxu0 }
 0x864   : > { %v7500_v48 = vpop.f32.mrf.mxu0 }
 0x865   : > { %v3227_v9 = vmax.f32 %v3225_v61, %v7500_v48  ;;  %v3252_v61 = vmax.f32 %v3250_v58, %v7454_v23 }
 0x866   : > { %v7502_v51 = vpop.f32.mrf.mxu0 }
 0x867   : > { %v3254_v5 = vmax.f32 %v3252_v61, %v7462_v63 }
 0x868   : > { %v7504_v29 = vpop.f32.mrf.mxu0 }
 0x869   : > { %8643 = vst [vmem:[#allocation34_spill] sm:$0xff] %v7504_v29  ;;  %v3228_v43 = vmax.f32 %v3226_v12, %v7504_v29  ;;  %v3251_v29 = vmax.f32 %v3249_v25, %v7450_v24  ;;  %v3256_v58 = vmax.f32 %v3254_v5, %v7470_v13 }
 0x86a   : > { %v7506_v7 = vpop.f32.mrf.mxu0 }
 0x86b   : > { %v3258_v61 = vmax.f32 %v3256_v58, %v7478_v50 }
 0x86c   : > { %v7508_v42 = vpop.f32.mrf.mxu0 }
 0x86d   : > { %8644 = vst [vmem:[#allocation37_spill] sm:$0xff] %v7508_v42  ;;  %v3229_v18 = vmax.f32 %v3227_v9, %v7508_v42  ;;  %v3260_v5 = vmax.f32 %v3258_v61, %v7486_v22 }
 0x86e   : > { %v7510_v28 = vpop.f32.mrf.mxu0 }
 0x870   : > { %v7512_v54 = vpop.f32.mrf.mxu0 }
 0x871   : > { %8645 = vst [vmem:[#allocation52_spill] sm:$0xff] %v7512_v54  ;;  %v3230_v31 = vmax.f32 %v3228_v43, %v7512_v54  ;;  %v3253_v54 = vmax.f32 %v3251_v29, %v7458_v19 }
 0x872   : > { %v7514_v3 = vpop.f32.mrf.mxu0 }
 0x873   : > { %v3255_v25 = vmax.f32 %v3253_v54, %v7466_v2  ;;  %v3262_v54 = vmax.f32 %v3260_v5, %v7494_v47 }
 0x874   : > { %v7516_v53 = vpop.f32.mrf.mxu0 }
 0x875   : > { %8646 = vst [vmem:[#allocation31_spill] sm:$0xff] %v7516_v53  ;;  %v3231_v0 = vmax.f32 %v3229_v18, %v7516_v53  ;;  %v3257_v29 = vmax.f32 %v3255_v25, %v7474_v15 }
 0x876   : > { %v7518_v26 = vpop.f32.mrf.mxu0 }
 0x877   : > { %v3259_v13 = vmax.f32 %v3257_v29, %v7482_v6 }
 0x878   : > { %v7520_v27 = vpop.f32.mrf.mxu0 }
 0x879   : > { %v3232_v12 = vmax.f32 %v3230_v31, %v7520_v27  ;;  %v3261_v58 = vmax.f32 %v3259_v13, %v7490_v14 }
 0x87a   : > { %v7522_v45 = vpop.f32.mrf.mxu0 }
 0x87c   : > { %v7524_v1 = vpop.f32.mrf.mxu0 }
 0x87d   : > { %v3233_v9 = vmax.f32 %v3231_v0, %v7524_v1 }
 0x87e   : > { %v7526_v11 = vpop.f32.mrf.mxu0 }
 0x880   : > { %v7528_v41 = vpop.f32.mrf.mxu0 }
 0x881   : > { %v3234_v43 = vmax.f32 %v3232_v12, %v7528_v41 }
 0x882   : > { %v7534_v39 = vpop.f32.mrf.mxu0 }
 0x884   : > { %v7538_v57 = vpop.f32.mrf.mxu0 }
 0x885   : > { %v3235_v18 = vmax.f32 %v3233_v9, %v7538_v57 }
 0x886   : > { %v7542_v46 = vpop.f32.mrf.mxu0 }
 0x888   : > { %v7546_v16 = vpop.f32.mrf.mxu0 }
 0x889   : > { %v3236_v31 = vmax.f32 %v3234_v43, %v7546_v16 }
 0x88a   : > { %v7550_v33 = vpop.f32.mrf.mxu0 }
 0x88c   : > { %v7554_v62 = vpop.f32.mrf.mxu0 }
 0x88d   : > { %v3237_v0 = vmax.f32 %v3235_v18, %v7554_v62 }
 0x88e   : > { %v7558_v44 = vpop.f32.mrf.mxu0 }
 0x890   : > { %v7562_v8 = vpop.f32.mrf.mxu0 }
 0x891   : > { %8647 = vst [vmem:[#allocation53_spill] sm:$0xff] %v7562_v8  ;;  %v3238_v12 = vmax.f32 %v3236_v31, %v7562_v8  ;;  %v3264_v31 = vmax.f32 %v3262_v54, %v7502_v51 }
 0x892   : > { %v7566_v60 = vpop.f32.mrf.mxu0 }
 0x893   : > { %v3266_v25 = vmax.f32 %v3264_v31, %v7510_v28 }
 0x894   : > { %v7572_v10 = vpop.f32.mrf.mxu0 }
 0x895   : > { %8648 = vst [vmem:[#allocation29_spill] sm:$0xff] %v7572_v10  ;;  %v3239_v9 = vmax.f32 %v3237_v0, %v7572_v10  ;;  %v3263_v10 = vmax.f32 %v3261_v58, %v7498_v59 }
 0x896   : > { %v7579_v42 = vpop.f32.mrf.mxu0 }
 0x897   : > { %v3265_v61 = vmax.f32 %v3263_v10, %v7506_v7 }
 0x898   : > { %v7585_v53 = vpop.f32.mrf.mxu0 }
 0x899   : > { %v3240_v43 = vmax.f32 %v3238_v12, %v7585_v53  ;;  %v3268_v12 = vmax.f32 %v3266_v25, %v7518_v26  ;;  %v3267_v29 = vmax.f32 %v3265_v61, %v7514_v3 }
 0x89a   : > { %v7591_v23 = vpop.f32.mrf.mxu0 }
 0x89b   : > { %v3270_v5 = vmax.f32 %v3268_v12, %v7526_v11  ;;  %v3269_v13 = vmax.f32 %v3267_v29, %v7522_v45 }
 0x89c   : > { %v7597_v63 = vpop.f32.mrf.mxu0 }
 0x89d   : > { %v3241_v18 = vmax.f32 %v3239_v9, %v7597_v63  ;;  %v3271_v58 = vmax.f32 %v3269_v13, %v7534_v39 }
 0x89f   : > { %v3242_v2 = vmax.f32 %v3240_v43, %v3241_v18  ;;  %v3272_v18 = vmax.f32 %v3270_v5, %v7542_v46  ;;  %v3273_v10 = vmax.f32 %v3271_v58, %v7550_v33 }
 0x8a1   : > { %v3243_v0 = vrot.slane %v3242_v2, 4  ;;  %v3274_v31 = vmax.f32 %v3272_v18, %v7558_v44  ;;  %v3275_v61 = vmax.f32 %v3273_v10, %v7566_v60 }
 0x8a3   : > { %v3244_v8 = vmax.f32 %v3242_v2, %v3243_v0  ;;  %v7617_v2 = vpop.f32.mrf.mxu0  ;;  %v3276_v0 = vmax.f32 %v3274_v31, %v7579_v42  ;;  %v3277_v12 = vmax.f32 %v3275_v61, %v7591_v23 }
 0x8a5   : > { %v3245_v9 = vrot.slane %v3244_v8, 2 }
 0x8a7   : > { %v3246_v43 = vmax.f32 %v3244_v8, %v3245_v9  ;;  %v3278_v8 = vmax.f32 %v3276_v0, %v7617_v2 }
 0x8a9   : > { %v3247_v54 = vrot.slane %v3246_v43, 1  ;;  %v3279_v13 = vmax.f32 %v3277_v12, %v3278_v8 }
 0x8ab   : > { %v7621_v25 = vmax.f32 %v3246_v43, %v3247_v54  ;;  %v3280_v10 = vrot.slane %v3279_v13, 4 }
 0x8ad   : > { %v3286_v9 = vsub.f32 %v7432_v49, %v7621_v25  ;;  %v3288_v29 = vsub.f32 %v7436_v55, %v7621_v25  ;;  %v3290_v5 = vsub.f32 %v7440_v40, %v7621_v25  ;;  %v3292_v43 = vsub.f32 %v7444_v17, %v7621_v25 }
 0x8ae   : > { %v3294_v58 = vsub.f32 %v7448_v56, %v7621_v25  ;;  %v3296_v49 = vsub.f32 %v7452_v37, %v7621_v25  ;;  %v3298_v40 = vsub.f32 %v7456_v32, %v7621_v25  ;;  %v3281_v61 = vmax.f32 %v3279_v13, %v3280_v10  ;;  %v8649_v56 = vld [vmem:[#allocation41_spill] sm:$0xff] }
 0x8af   : > { %v3350_v18 = vmul.f32 1.442695, %v3286_v9  ;;  %v3354_v54 = vmul.f32 1.442695, %v3288_v29  ;;  %v3358_v31 = vmul.f32 1.442695, %v3290_v5  ;;  %v3300_v17 = vsub.f32 %v7460_v38, %v7621_v25 }
 0x8b0   : > { %v3362_v55 = vmul.f32 1.442695, %v3292_v43  ;;  %v3366_v0 = vmul.f32 1.442695, %v3294_v58  ;;  %v3370_v8 = vmul.f32 1.442695, %v3296_v49  ;;  %v3302_v12 = vsub.f32 %v8649_v56, %v7621_v25 }
 0x8b1   : > { %4958 = vpow2.f32 %v3350_v18  ;;  %v3374_v9 = vmul.f32 1.442695, %v3298_v40  ;;  %v3304_v37 = vsub.f32 %v7468_v20, %v7621_v25  ;;  %v3282_v29 = vrot.slane %v3281_v61, 2  ;;  %v8650_v5 = vld [vmem:[#allocation27_spill] sm:$0xff]  ;;  %v8651_v38 = vld [vmem:[#allocation38_spill] sm:$0xff] }
 0x8b2   : > { %4960 = vpow2.f32 %v3354_v54  ;;  %v3306_v32 = vsub.f32 %v8650_v5, %v7621_v25  ;;  %v3378_v43 = vmul.f32 1.442695, %v3300_v17  ;;  %v3308_v13 = vsub.f32 %v7476_v36, %v7621_v25 }
 0x8b3   : > { %4962 = vpow2.f32 %v3358_v31  ;;  %v3310_v18 = vsub.f32 %v8651_v38, %v7621_v25  ;;  %v3382_v54 = vmul.f32 1.442695, %v3302_v12  ;;  %v3312_v58 = vsub.f32 %v7484_v35, %v7621_v25 }
 0x8b4   : > { %4964 = vpow2.f32 %v3362_v55  ;;  %v3386_v31 = vmul.f32 1.442695, %v3304_v37  ;;  %v3283_v10 = vmax.f32 %v3281_v61, %v3282_v29  ;;  %v3314_v49 = vsub.f32 %v7488_v34, %v7621_v25 }
 0x8b5   : > { %4966 = vpow2.f32 %v3366_v0  ;;  %v3390_v55 = vmul.f32 1.442695, %v3306_v32  ;;  %v3330_v36 = vsub.f32 %v7520_v27, %v7621_v25  ;;  %v3394_v0 = vmul.f32 1.442695, %v3308_v13 }
 0x8b6   : > { %4968 = vpow2.f32 %v3370_v8  ;;  %v3332_v17 = vsub.f32 %v7524_v1, %v7621_v25  ;;  %v3398_v35 = vmul.f32 1.442695, %v3310_v18  ;;  %v3334_v34 = vsub.f32 %v7528_v41, %v7621_v25 }
 0x8b7   : > { %4970 = vpow2.f32 %v3374_v9  ;;  %v3402_v56 = vmul.f32 1.442695, %v3312_v58  ;;  %v3284_v12 = vrot.slane %v3283_v10, 1  ;;  %v3336_v27 = vsub.f32 %v7538_v57, %v7621_v25  ;;  %v8653_v57 = vld [vmem:[#allocation36_spill] sm:$0xff] }
 0x8b8   : > { %4972 = vpow2.f32 %v3378_v43  ;;  %v3406_v9 = vmul.f32 1.442695, %v3314_v49  ;;  %v3338_v29 = vsub.f32 %v7546_v16, %v7621_v25  ;;  %v3438_v5 = vmul.f32 1.442695, %v3330_v36  ;;  %v8654_v36 = vld [vmem:[#allocation34_spill] sm:$0xff] }
 0x8b9   : > { %4974 = vpow2.f32 %v3382_v54  ;;  %v3340_v41 = vsub.f32 %v7554_v62, %v7621_v25  ;;  %v3442_v32 = vmul.f32 1.442695, %v3332_v17  ;;  %v3316_v38 = vsub.f32 %v8653_v57, %v7621_v25 }
 0x8ba   : > { %4976 = vpow2.f32 %v3386_v31  ;;  %v3446_v18 = vmul.f32 1.442695, %v3334_v34  ;;  %v7684_v54 = vmax.f32 %v3283_v10, %v3284_v12  ;;  %v3318_v16 = vsub.f32 %v7496_v52, %v7621_v25 }
 0x8bb   : > { %4978 = vpow2.f32 %v3390_v55  ;;  %v3450_v58 = vmul.f32 1.442695, %v3336_v27  ;;  %v3320_v49 = vsub.f32 %v7500_v48, %v7621_v25  ;;  %v3454_v55 = vmul.f32 1.442695, %v3338_v29  ;;  %v8655_v27 = vld [vmem:[#allocation37_spill] sm:$0xff] }
 0x8bc   : > { %4980 = vpow2.f32 %v3394_v0  ;;  %v3322_v0 = vsub.f32 %v8654_v36, %v7621_v25  ;;  %v3458_v10 = vmul.f32 1.442695, %v3340_v41  ;;  %v3410_v52 = vmul.f32 1.442695, %v3316_v38 }
 0x8bd   : > { %4982 = vpow2.f32 %v3398_v35  ;;  %v3414_v34 = vmul.f32 1.442695, %v3318_v16 }
 0x8be   : > { %v7654_v20 = vpop.eup %4958  ;;  %4984 = vpow2.f32 %v3402_v56  ;;  %v3289_v56 = vsub.f32 %v7438_v4, %v7684_v54  ;;  %v3422_v29 = vmul.f32 1.442695, %v3322_v0 }
 0x8bf   : > { %v7658_v40 = vpop.eup %4960  ;;  %4986 = vpow2.f32 %v3406_v9  ;;  %v3324_v9 = vsub.f32 %v8655_v27, %v7621_v25 }
 0x8c0   : > { %8652 = vst [vmem:[#allocation42_spill] sm:$0xff] %v7658_v40  ;;  %v3478_v61 = vadd.f32 %v7658_v40, %v7654_v20  ;;  %v7666_v8 = vpop.eup %4962  ;;  %4988 = vpow2.f32 %v3438_v5 }
 0x8c1   : > { %v7673_v37 = vpop.eup %4964  ;;  %4990 = vpow2.f32 %v3442_v32  ;;  %v8656_v32 = vld [vmem:[#allocation52_spill] sm:$0xff] }
 0x8c2   : > { %v3479_v1 = vadd.f32 %v7666_v8, %v3478_v61  ;;  %v7680_v13 = vpop.eup %4966  ;;  %4992 = vpow2.f32 %v3446_v18  ;;  %v3287_v61 = vsub.f32 %v7434_v21, %v7684_v54  ;;  %v3291_v21 = vsub.f32 %v7442_v30, %v7684_v54  ;;  %v8657_v18 = vld [vmem:[#allocation39_spill] sm:$0xff] }
 0x8c3   : > { %v7689_v31 = vpop.eup %4968  ;;  %4994 = vpow2.f32 %v3450_v58  ;;  %v3293_v16 = vsub.f32 %v8657_v18, %v7684_v54  ;;  %v3356_v58 = vmul.f32 1.442695, %v3289_v56  ;;  %v8658_v30 = vld [vmem:[#allocation31_spill] sm:$0xff] }
 0x8c4   : > { %v3480_v43 = vadd.f32 %v7673_v37, %v3479_v1  ;;  %v7696_v35 = vpop.eup %4970  ;;  %v3418_v1 = vmul.f32 1.442695, %v3320_v49  ;;  %4996 = vpow2.f32 %v3454_v55  ;;  %v3352_v4 = vmul.f32 1.442695, %v3287_v61 }
 0x8c5   : > { %v7703_v12 = vpop.eup %4972  ;;  %4998 = vpow2.f32 %v3458_v10  ;;  %v3328_v49 = vsub.f32 %v8658_v30, %v7621_v25  ;;  %v3426_v55 = vmul.f32 1.442695, %v3324_v9  ;;  %v3295_v10 = vsub.f32 %v7450_v24, %v7684_v54 }
 0x8c6   : > { %v3481_v62 = vadd.f32 %v7680_v13, %v3480_v43  ;;  %v7710_v41 = vpop.eup %4974  ;;  %v3326_v43 = vsub.f32 %v8656_v32, %v7621_v25  ;;  %5000 = vpow2.f32 %v3410_v52  ;;  %v3299_v9 = vsub.f32 %v7458_v19, %v7684_v54 }
 0x8c7   : > { %v7714_v57 = vpop.eup %4976  ;;  %5002 = vpow2.f32 %v3414_v34  ;;  %v8659_v34 = vld [vmem:[#allocation43_spill] sm:$0xff]  ;;  %v3434_v24 = vmul.f32 1.442695, %v3328_v49  ;;  %v3368_v18 = vmul.f32 1.442695, %v3295_v10  ;;  %v3311_v19 = vsub.f32 %v7482_v6, %v7684_v54 }
 0x8c8   : > { %v3482_v17 = vadd.f32 %v7689_v31, %v3481_v62  ;;  %v7719_v62 = vpop.eup %4978  ;;  %5004 = vpow2.f32 %v3418_v1  ;;  %v3430_v61 = vmul.f32 1.442695, %v3326_v43  ;;  %v3364_v1 = vmul.f32 1.442695, %v3293_v16 }
 0x8c9   : > { %v7723_v36 = vpop.eup %4980  ;;  %5006 = vpow2.f32 %v3422_v29  ;;  %v3313_v16 = vsub.f32 %v7486_v22, %v7684_v54  ;;  %v3317_v6 = vsub.f32 %v7494_v47, %v7684_v54 }
 0x8ca   : > { %v3483_v48 = vadd.f32 %v7696_v35, %v3482_v17  ;;  %v3360_v17 = vmul.f32 1.442695, %v3291_v21  ;;  %v7728_v52 = vpop.eup %4982  ;;  %5008 = vpow2.f32 %v3352_v4  ;;  %v8661_v4 = vld [vmem:[#allocation19_spill] sm:$0xff] }
 0x8cb   : > { %v7732_v56 = vpop.eup %4984  ;;  %5010 = vpow2.f32 %v3356_v58 }
 0x8cc   : > { %v3484_v5 = vadd.f32 %v7703_v12, %v3483_v48  ;;  %v3297_v48 = vsub.f32 %v8659_v34, %v7684_v54  ;;  %v7737_v29 = vpop.eup %4986  ;;  %5012 = vpow2.f32 %v3426_v55 }
 0x8cd   : > { %v7741_v32 = vpop.eup %4988  ;;  %5014 = vpow2.f32 %v3360_v17 }
 0x8ce   : > { %v3485_v38 = vadd.f32 %v7710_v41, %v3484_v5  ;;  %v8660_v5 = vld [vmem:[#allocation44_spill] sm:$0xff]  ;;  %v7746_v30 = vpop.eup %4990  ;;  %5016 = vpow2.f32 %v3430_v61  ;;  %v3372_v58 = vmul.f32 1.442695, %v3297_v48  ;;  %v3315_v61 = vsub.f32 %v7490_v14, %v7684_v54 }
 0x8cf   : > { %v3301_v21 = vsub.f32 %v8660_v5, %v7684_v54  ;;  %v7752_v49 = vpop.eup %4992  ;;  %5018 = vpow2.f32 %v3364_v1  ;;  %v3400_v14 = vmul.f32 1.442695, %v3311_v19 }
 0x8d0   : > { %v3486_v0 = vadd.f32 %v7714_v57, %v3485_v38  ;;  %v3303_v38 = vsub.f32 %v8661_v4, %v7684_v54  ;;  %v7757_v10 = vpop.eup %4994  ;;  %5020 = vpow2.f32 %v3434_v24  ;;  %v8662_v24 = vld [vmem:[#allocation10_spill] sm:$0xff] }
 0x8d1   : > { %v3380_v22 = vmul.f32 1.442695, %v3301_v21  ;;  %v7763_v34 = vpop.eup %4996  ;;  %5022 = vpow2.f32 %v3368_v18  ;;  %v3305_v5 = vsub.f32 %v8662_v24, %v7684_v54  ;;  %v3404_v21 = vmul.f32 1.442695, %v3313_v16 }
 0x8d2   : > { %v3487_v27 = vadd.f32 %v7719_v62, %v3486_v0  ;;  %v3376_v0 = vmul.f32 1.442695, %v3299_v9  ;;  %v7768_v1 = vpop.eup %4998  ;;  %5024 = vpow2.f32 %v3372_v58  ;;  %v3307_v18 = vsub.f32 %v7474_v15, %v7684_v54 }
 0x8d3   : > { %v3309_v58 = vsub.f32 %v7478_v50, %v7684_v54  ;;  %v3388_v9 = vmul.f32 1.442695, %v3305_v5  ;;  %v8668_v5 = vld [vmem:[#allocation29_spill] sm:$0xff] }
 0x8d4   : > { %v3488_v43 = vadd.f32 %v7723_v36, %v3487_v27  ;;  %v3384_v27 = vmul.f32 1.442695, %v3303_v38  ;;  %5026 = vpow2.f32 %v3376_v0  ;;  %v3412_v0 = vmul.f32 1.442695, %v3317_v6 }
 0x8d5   : > { %5028 = vpow2.f32 %v3380_v22  ;;  %v3396_v6 = vmul.f32 1.442695, %v3309_v58 }
 0x8d6   : > { %v3489_v55 = vadd.f32 %v7728_v52, %v3488_v43  ;;  %v7772_v43 = vpop.eup %5000  ;;  %5030 = vpow2.f32 %v3384_v27 }
 0x8d7   : > { %v7777_v38 = vpop.eup %5002  ;;  %5032 = vpow2.f32 %v3400_v14 }
 0x8d8   : > { %v3490_v48 = vadd.f32 %v7732_v56, %v3489_v55  ;;  %8663 = vst [vmem:[#allocation11_spill] sm:$0xff] %v7777_v38  ;;  %v3408_v55 = vmul.f32 1.442695, %v3315_v61  ;;  %v7781_v17 = vpop.eup %5004  ;;  %5034 = vpow2.f32 %v3404_v21  ;;  %v8666_v61 = vld [vmem:[#allocation53_spill] sm:$0xff]  ;;  %v3344_v21 = vsub.f32 %v8668_v5, %v7621_v25 }
 0x8d9   : > { %8664 = vst [vmem:[#allocation21_spill] sm:$0xff] %v7781_v17  ;;  %v7786_v16 = vpop.eup %5006  ;;  %v3342_v22 = vsub.f32 %v8666_v61, %v7621_v25  ;;  %v3339_v61 = vsub.f32 %v7550_v33, %v7684_v54 }
 0x8da   : > { %v3491_v47 = vadd.f32 %v7737_v29, %v3490_v48  ;;  %8665 = vst [vmem:[#allocation40_spill] sm:$0xff] %v7786_v16  ;;  %v7788_v48 = vpop.eup %5008  ;;  %5036 = vpow2.f32 %v3408_v55 }
 0x8db   : > { %v7791_v15 = vpop.eup %5010  ;;  %5038 = vpow2.f32 %v3412_v0  ;;  %v3462_v0 = vmul.f32 1.442695, %v3342_v22  ;;  %v3348_v22 = vsub.f32 %v7597_v63, %v7621_v25 }
 0x8dc   : > { %v3492_v19 = vadd.f32 %v7772_v43, %v3491_v47  ;;  %v3392_v47 = vmul.f32 1.442695, %v3307_v18  ;;  %v7795_v4 = vpop.eup %5012  ;;  %v3515_v27 = vadd.f32 %v7791_v15, %v7788_v48  ;;  %v3346_v18 = vsub.f32 %v7585_v53, %v7621_v25 }
 0x8dd   : > { %8667 = vst [vmem:[#allocation54_spill] sm:$0xff] %v7795_v4  ;;  %v7800_v14 = vpop.eup %5014  ;;  %5040 = vpow2.f32 %v3388_v9  ;;  %v3321_v25 = vsub.f32 %v7502_v51, %v7684_v54 }
 0x8de   : > { %v3493_v24 = vadd.f32 %v7777_v38, %v3492_v19  ;;  %v7804_v19 = vpop.eup %5016  ;;  %5042 = vpow2.f32 %v3392_v47  ;;  %v3341_v38 = vsub.f32 %v7558_v44, %v7684_v54  ;;  %v3470_v33 = vmul.f32 1.442695, %v3346_v18 }
 0x8df   : > { %v7810_v58 = vpop.eup %5018  ;;  %5044 = vpow2.f32 %v3396_v6  ;;  %v3319_v44 = vsub.f32 %v7498_v59, %v7684_v54  ;;  %v3456_v6 = vmul.f32 1.442695, %v3339_v61 }
 0x8e0   : > { %v3494_v50 = vadd.f32 %v7781_v17, %v3493_v24  ;;  %v3516_v24 = vadd.f32 %v7800_v14, %v3515_v27  ;;  %v7814_v17 = vpop.eup %5020  ;;  %5046 = vpow2.f32 %v3462_v0  ;;  %v3323_v0 = vsub.f32 %v7506_v7, %v7684_v54 }
 0x8e1   : > { %8669 = vst [vmem:[#allocation45_spill] sm:$0xff] %v7814_v17  ;;  %v7820_v9 = vpop.eup %5022 }
 0x8e2   : > { %v3495_v55 = vadd.f32 %v7786_v16, %v3494_v50  ;;  %v3517_v53 = vadd.f32 %v7810_v58, %v3516_v24  ;;  %v3466_v50 = vmul.f32 1.442695, %v3344_v21  ;;  %v7822_v27 = vpop.eup %5024 }
 0x8e4   : > { %v3496_v5 = vadd.f32 %v7795_v4, %v3495_v55  ;;  %v3518_v16 = vadd.f32 %v7820_v9, %v3517_v53  ;;  %v7828_v55 = vpop.eup %5026  ;;  %v3460_v4 = vmul.f32 1.442695, %v3341_v38  ;;  %5048 = vpow2.f32 %v3466_v50 }
 0x8e5   : > { %v7832_v24 = vpop.eup %5028  ;;  %5050 = vpow2.f32 %v3470_v33  ;;  %v3416_v50 = vmul.f32 1.442695, %v3319_v44  ;;  %v3420_v33 = vmul.f32 1.442695, %v3321_v25  ;;  %v3424_v44 = vmul.f32 1.442695, %v3323_v0 }
 0x8e6   : > { %v3497_v47 = vadd.f32 %v7804_v19, %v3496_v5  ;;  %v3519_v40 = vadd.f32 %v7822_v27, %v3518_v16  ;;  %v7836_v63 = vpop.eup %5030  ;;  %v3474_v5 = vmul.f32 1.442695, %v3348_v22  ;;  %5052 = vpow2.f32 %v3456_v6 }
 0x8e7   : > { %v5033_v18 = vpop.eup %5032  ;;  %5054 = vpow2.f32 %v3460_v4  ;;  %v3325_v22 = vsub.f32 %v7510_v28, %v7684_v54  ;;  %v3327_v4 = vsub.f32 %v7514_v3, %v7684_v54 }
 0x8e8   : > { %v3498_v21 = vadd.f32 %v7814_v17, %v3497_v47  ;;  %v3520_v61 = vadd.f32 %v7828_v55, %v3519_v40  ;;  %v5035_v53 = vpop.eup %5034  ;;  %5056 = vpow2.f32 %v3474_v5  ;;  %v3331_v17 = vsub.f32 %v7522_v45, %v7684_v54 }
 0x8e9   : > { %v7844_v38 = vpop.eup %5036  ;;  %5058 = vpow2.f32 %v3416_v50  ;;  %v3565_v5 = vpack.c.bf16 %v5035_v53, %v5033_v18  ;;  %v3428_v0 = vmul.f32 1.442695, %v3325_v22  ;;  %v3349_v50 = vsub.f32 %v7617_v2, %v7684_v54 }
 0x8ea   : > { %v3499_v59 = vadd.f32 %v7741_v32, %v3498_v21  ;;  %v3521_v51 = vadd.f32 %v7832_v24, %v3520_v61  ;;  %v7848_v47 = vpop.eup %5038  ;;  %5060 = vpow2.f32 %v3420_v33  ;;  %v3333_v22 = vsub.f32 %v7526_v11, %v7684_v54 }
 0x8eb   : > { %v3567_v6 = vpack.c.bf16 %v7848_v47, %v7844_v38  ;;  %v5041_v21 = vpop.eup %5040  ;;  %5062 = vpow2.f32 %v3424_v44  ;;  %v3343_v2 = vsub.f32 %v7566_v60, %v7684_v54  ;;  %v3345_v11 = vsub.f32 %v7579_v42, %v7684_v54 }
 0x8ec   : > { %v3500_v16 = vadd.f32 %v7746_v30, %v3499_v59  ;;  %v3522_v7 = vadd.f32 %v7836_v63, %v3521_v51  ;;  %v3566_v59 = vpack.c.bf16 %v7772_v43, %v7737_v29  ;;  %v5043_v61 = vpop.eup %5042  ;;  %v3329_v51 = vsub.f32 %v7518_v26, %v7684_v54 }
 0x8ed   : > { %3584 = vmatprep.subr.bf16.mxu1 %v3567_v6  ;;  %v3347_v43 = vsub.f32 %v7591_v23, %v7684_v54  ;;  %v3564_v26 = vpack.c.bf16 %v7732_v56, %v7728_v52  ;;  %v3335_v23 = vsub.f32 %v7534_v39, %v7684_v54  ;;  %5064 = vpow2.f32 %v3428_v0 }
 0x8ee   : > { %v3501_v40 = vadd.f32 %v7752_v49, %v3500_v16  ;;  %v3523_v25 = vadd.f32 %v5041_v21, %v3522_v7  ;;  %v5045_v16 = vpop.eup %5044  ;;  %3585 = vmatpush1.bf16.msra.mxu1 %v3566_v59  ;;  %v3436_v33 = vmul.f32 1.442695, %v3329_v51  ;;  %v3440_v56 = vmul.f32 1.442695, %v3331_v17 }
 0x8ef   : > { %3586 = vmatprep.subr.bf16.mxu1 %v3565_v5  ;;  %v3563_v6 = vpack.c.bf16 %v5045_v16, %v5043_v61  ;;  %v7873_v59 = vpop.eup %5046  ;;  %v3476_v39 = vmul.f32 1.442695, %v3349_v50  ;;  %v3562_v60 = vpack.c.bf16 %v7723_v36, %v7719_v62  ;;  %v3561_v17 = vpack.c.bf16 %v5041_v21, %v7836_v63 }
 0x8f0   : > { %v3502_v28 = vadd.f32 %v7757_v10, %v3501_v40  ;;  %v3524_v29 = vadd.f32 %v5043_v61, %v3523_v25  ;;  %v3432_v40 = vmul.f32 1.442695, %v3327_v4  ;;  %v3337_v51 = vsub.f32 %v7542_v46, %v7684_v54 }
 0x8f1   : > { %v7881_v4 = vpop.eup %5048  ;;  %v3444_v42 = vmul.f32 1.442695, %v3333_v22  ;;  %v3464_v63 = vmul.f32 1.442695, %v3343_v2  ;;  %v3468_v21 = vmul.f32 1.442695, %v3345_v11  ;;  %v3560_v46 = vpack.c.bf16 %v7714_v57, %v7710_v41 }
 0x8f2   : > { %v3503_v3 = vadd.f32 %v7763_v34, %v3502_v28  ;;  %v3525_v45 = vadd.f32 %v5045_v16, %v3524_v29  ;;  %3587 = vmatpush1.bf16.msra.mxu1 %v3564_v26  ;;  %v7884_v61 = vpop.eup %5050  ;;  %v3472_v28 = vmul.f32 1.442695, %v3347_v43  ;;  %5066 = vpow2.f32 %v3432_v40 }
 0x8f3   : > { %3588 = vmatprep.subr.bf16.mxu1 %v3563_v6  ;;  %v7890_v25 = vpop.eup %5052  ;;  %5068 = vpow2.f32 %v3436_v33  ;;  %v3559_v43 = vpack.c.bf16 %v7832_v24, %v7828_v55  ;;  %v3452_v50 = vmul.f32 1.442695, %v3337_v51  ;;  %v3558_v41 = vpack.c.bf16 %v7703_v12, %v7696_v35 }
 0x8f4   : > { %v3504_v7 = vadd.f32 %v7768_v1, %v3503_v3  ;;  %v3526_v44 = vadd.f32 %v5033_v18, %v3525_v45  ;;  %v7894_v18 = vpop.eup %5054  ;;  %v3448_v3 = vmul.f32 1.442695, %v3335_v23  ;;  %5070 = vpow2.f32 %v3440_v56 }
 0x8f5   : > { %v3579_v36 = vpack.c.bf16 %v7894_v18, %v7890_v25  ;;  %5072 = vpow2.f32 %v3472_v28  ;;  %v3557_v55 = vpack.c.bf16 %v7822_v27, %v7820_v9  ;;  %v3556_v45 = vpack.c.bf16 %v7689_v31, %v7680_v13 }
 0x8f6   : > { %v3505_v52 = vadd.f32 %v7873_v59, %v3504_v7  ;;  %v3527_v16 = vadd.f32 %v5035_v53, %v3526_v44  ;;  %3589 = vmatpush1.bf16.msra.mxu1 %v3562_v60  ;;  %v5057_v53 = vpop.eup %5056  ;;  %5074 = vpow2.f32 %v3476_v39  ;;  %v3555_v22 = vpack.c.bf16 %v7810_v58, %v7800_v14  ;;  %v8670_v58 = vld [vmem:[#allocation42_spill] sm:$0xff] }
 0x8f7   : > { %3590 = vmatprep.subr.bf16.mxu1 %v3561_v17  ;;  %5076 = vpow2.f32 %v3444_v42  ;;  %v3554_v9 = vpack.c.bf16 %v7673_v37, %v7666_v8  ;;  %v3552_v44 = vpack.c.bf16 %v8670_v58, %v7654_v20  ;;  %v3580_v17 = vpack.c.bf16 %v7881_v4, %v7873_v59  ;;  %v8685_v58 = vld [vmem:[#allocation16_spill] sm:$0xff] }
 0x8f8   : > { %v3506_v5 = vadd.f32 %v7881_v4, %v3505_v52  ;;  %v3528_v62 = vadd.f32 %v7844_v38, %v3527_v16  ;;  %v7909_v38 = vpop.eup %5058  ;;  %5078 = vpow2.f32 %v3448_v3  ;;  %v3553_v52 = vpack.c.bf16 %v7791_v15, %v7788_v48 }
 0x8f9   : > { %v7912_v26 = vpop.eup %5060  ;;  %5080 = vpow2.f32 %v3464_v63  ;;  %v8672_v59 = vpack.c.bf16 %v7757_v10, %v7752_v49  ;;  %v8676_v63 = vld [vmem:[#allocation54_spill] sm:$0xff]  ;;  %v8677_v10 = vld [vmem:[#allocation25_spill] sm:$0xff] }
 0x8fa   : > { %v3507_v0 = vadd.f32 %v7884_v61, %v3506_v5  ;;  %v3529_v29 = vadd.f32 %v7848_v47, %v3528_v62  ;;  %3591 = vmatpush1.bf16.msra.mxu1 %v3560_v46  ;;  %5082 = vpow2.f32 %v3468_v21  ;;  %v5063_v24 = vpop.eup %5062  ;;  %v3582_v5 = vpack.c.bf16 %v5057_v53, %v7884_v61  ;;  %v8678_v46 = vld [vmem:[#allocation33_spill] sm:$0xff] }
 0x8fb   : > { %3592 = vmatprep.subr.bf16.mxu1 %v3559_v43  ;;  %5084 = vpow2.f32 %v3452_v50  ;;  %v5065_v7 = vpop.eup %5064  ;;  %v8671_v61 = vpack.c.bf16 %v7768_v1, %v7763_v34  ;;  %v8675_v1 = vld [vmem:[#allocation40_spill] sm:$0xff]  ;;  %v3569_v49 = vpack.c.bf16 %v7912_v26, %v7909_v38 }
 0x8fc   : > { %v7904_v54 = vadd.f32 %v5057_v53, %v3507_v0  ;;  %v3530_v40 = vadd.f32 %v7909_v38, %v3529_v29  ;;  %v3571_v34 = vpack.c.bf16 %v5065_v7, %v5063_v24  ;;  %v3570_v21 = vpack.c.bf16 %v8676_v63, %v8675_v1  ;;  %v5129_v1 = vld [vmem:[%s5345_s16 + $0x20] sm:$0xff] }
 0x8fd   : > { %v807_v29 = vadd.f32 %v8678_v46, %v8677_v10  ;;  %v5130_v46 = vld [vmem:[%s5345_s16 + $0x8] sm:$0xff] }
 0x8fe   : > { %v3531_v57 = vadd.f32 %v7912_v26, %v3530_v40  ;;  %3593 = vmatpush1.bf16.msra.mxu1 %v3558_v41  ;;  %v3509_v40 = vrot.slane %v7904_v54, 4 }
 0x8ff   : > { %3594 = vmatprep.subr.bf16.mxu1 %v3557_v55  ;;  %v5067_v35 = vpop.eup %5066  ;;  %v2931_v50 = vpack.c.bf16 %v807_v29, %v807_v29 }
 0x900   : > { %v3532_v47 = vadd.f32 %v5063_v24, %v3531_v57  ;;  %v5069_v12 = vpop.eup %5068  ;;  %v3510_v57 = vadd.f32 %v3509_v40, %v7904_v54 }
 0x901   : > { %v5071_v2 = vpop.eup %5070  ;;  %v3573_v4 = vpack.c.bf16 %v5069_v12, %v5067_v35 }
 0x902   : > { %v3533_v6 = vadd.f32 %v5065_v7, %v3532_v47  ;;  %3595 = vmatpush1.bf16.msra.mxu1 %v3556_v45  ;;  %v5073_v27 = vpop.eup %5072  ;;  %v3511_v38 = vrot.slane %v3510_v57, 2 }
 0x903   : > { %3596 = vmatprep.subr.bf16.mxu1 %v3555_v22  ;;  %v5075_v56 = vpop.eup %5074 }
 0x904   : > { %v3534_v23 = vadd.f32 %v5067_v35, %v3533_v6  ;;  %v5077_v13 = vpop.eup %5076  ;;  %v3583_v39 = vpack.c.bf16 %v5075_v56, %v5073_v27  ;;  %v3512_v24 = vadd.f32 %v3511_v38, %v3510_v57 }
 0x905   : > { %v5079_v14 = vpop.eup %5078  ;;  %v3575_v53 = vpack.c.bf16 %v5077_v13, %v5071_v2 }
 0x906   : > { %v3535_v33 = vadd.f32 %v5069_v12, %v3534_v23  ;;  %3597 = vmatpush1.bf16.msra.mxu1 %v3554_v9  ;;  %v5081_v11 = vpop.eup %5080  ;;  %v3513_v7 = vrot.slane %v3512_v24, 1 }
 0x907   : > { %3598 = vmatprep.subr.bf16.mxu1 %v3553_v52  ;;  %v5083_v60 = vpop.eup %5082 }
 0x908   : > { %v3536_v31 = vadd.f32 %v5071_v2, %v3535_v33  ;;  %v5085_v37 = vpop.eup %5084  ;;  %v3581_v15 = vpack.c.bf16 %v5083_v60, %v5081_v11  ;;  %v3514_v6 = vadd.f32 %v3513_v7, %v3512_v24  ;;  %v5133_v7 = vld [vmem:[%s5345_s16 + $0x38] sm:$0xff] }
 0x909   : > { %v3577_v3 = vpack.c.bf16 %v5085_v37, %v5079_v14 }
 0x90a   : > { %v3537_v28 = vadd.f32 %v5077_v13, %v3536_v31  ;;  %3599 = vmatpush1.bf16.msra.mxu1 %v3552_v44  ;;  %5086 = vrcp.f32 %v3514_v6 }
 0x90b   : > { %3600 = vmatprep.subr.bf16.mxu1 %v3583_v39  ;;  %v8688_v39 = vld [vmem:[#allocation17_spill] sm:$0xff] }
 0x90c   : > { %v3538_v8 = vadd.f32 %v5079_v14, %v3537_v28  ;;  %v8684_v14 = vld [vmem:[#allocation28_spill] sm:$0xff]  ;;  %v8687_v28 = vld [vmem:[#allocation26_spill] sm:$0xff] }
 0x90d   : > { %v8686_v44 = vpack.c.bf16 %v8684_v14, %v8685_v58 }
 0x90e   : > { %v3539_v48 = vadd.f32 %v5085_v37, %v3538_v8  ;;  %3601 = vmatpush2.bf16.msra.mxu1 %v3582_v5  ;;  %v4553_v8 = vld [vmem:[%s8250_s5 + $0x8] sm:$0xff]   ;;  %v3644_v37 = vpop.permute.xlu1 %3643 }
 0x90f   : > { %3602 = vmatprep.subr.bf16.mxu1 %v3581_v15 }
 0x910   : > { %v3540_v16 = vadd.f32 %v7890_v25, %v3539_v48  ;;  %v8673_v25 = vpack.c.bf16 %v7746_v30, %v7741_v32  ;;  %v8679_v32 = vld [vmem:[#allocation11_spill] sm:$0xff]  ;;  %v8680_v30 = vld [vmem:[#allocation21_spill] sm:$0xff] }
 0x911   : > { %v3568_v43 = vpack.c.bf16 %v8680_v30, %v8679_v32  ;;  %v5131_v30 = vld [vmem:[%s5345_s16 + $0x28] sm:$0xff] }
 0x912   : > { %v3541_v20 = vadd.f32 %v7894_v18, %v3540_v16  ;;  %3603 = vmatpush2.bf16.msra.mxu1 %v3580_v17  ;;  %v8674_v18 = vld [vmem:[#allocation45_spill] sm:$0xff]  ;;  %v3649_v15 = vpop.permute.xlu1 %3648 }
 0x913   : > { %3604 = vmatprep.subr.bf16.mxu1 %v3579_v36  ;;  %v3572_v36 = vpack.c.bf16 %v8674_v18, %v7804_v19  ;;  %v8681_v19 = vmov 0  }
 0x914   : > { %v3542_v51 = vadd.f32 %v5081_v11, %v3541_v20  ;;  %v4552_v11 = vld [vmem:[%s8250_s5] sm:$0xff]  }
 0x916   : > { %v3543_v42 = vadd.f32 %v5083_v60, %v3542_v51  ;;  %3605 = vmatpush2.bf16.msra.mxu1 %v8671_v61  ;;  %v8689_v60 = vpack.c.bf16 %v8687_v28, %v8688_v39 }
 0x917   : > { %3606 = vmatprep.subr.bf16.mxu1 %v3577_v3  ;;  %v5087_v35 = vpop.eup %5086  ;;  %v3654_v3 = vpop.permute.xlu0 %3653 }
 0x918   : > { %v3544_v0 = vadd.f32 %v5073_v27, %v3543_v42  ;;  %v8682_v27 = vld [vmem:[#allocation14_spill] sm:$0xff] }
 0x91a   : > { %v3545_v62 = vadd.f32 %v5075_v56, %v3544_v0  ;;  %3607 = vmatpush2.bf16.msra.mxu1 %v8672_v59  ;;  %v8683_v56 = vld [vmem:[#allocation15_spill] sm:$0xff] }
 0x91b   : > { %3608 = vmatprep.subr.bf16.mxu1 %v3575_v53 }
 0x91c   : > { %v3546_v41 = vrot.slane %v3545_v62, 4 }
 0x91e   : > { %3609 = vmatpush2.bf16.msra.mxu1 %v8673_v25  ;;  %v3547_v55 = vadd.f32 %v3546_v41, %v3545_v62  ;;  %v5126_v62 = vld [vmem:[%s5345_s16 + $0x10] sm:$0xff]  ;;  %v5127_v25 = vld [vmem:[%s5345_s16] sm:$0xff] }
 0x91f   : > { %3610 = vmatprep.subr.bf16.mxu1 %v3573_v4 }
 0x920   : > { %v3548_v26 = vrot.slane %v3547_v55, 2 }
 0x922   : > { %3611 = vmatpush2.bf16.msra.mxu1 %v3572_v36  ;;  %v3549_v47 = vadd.f32 %v3548_v26, %v3547_v55  ;;  %v5128_v36 = vld [vmem:[%s5345_s16 + $0x18] sm:$0xff]  ;;  %v5132_v55 = vld [vmem:[%s5345_s16 + $0x30] sm:$0xff]  ;;  %s4501_s16 = sshll.u32 %s5291_s29, 10  ;;  %s8205_s29 = scalar_lea.sflag [#allocation3], %s431_s20 }
 0x923   : > { %3612 = vmatprep.subr.bf16.mxu1 %v3571_v34  ;;  %s8196_s21 = scalar_lea.hbm %s8258_s13, %s4501_s16 }
 0x924   : > { %v3550_v45 = vrot.slane %v3549_v47, 1 }
 0x926   : > { %3613 = vmatpush2.bf16.msra.mxu1 %v3570_v21  ;;  %v3551_v22 = vadd.f32 %v3550_v45, %v3549_v47 }
 0x927   : > { %3614 = vmatprep.subr.bf16.mxu1 %v3569_v49  ;;  %v3659_v49 = vpop.permute.xlu1 %3658 }
 0x928   : > { %5088 = vrcp.f32 %v3551_v22 }
 0x92a   : > { %3615 = vmatpush2.bf16.msra.mxu1 %v3568_v43 }
 0x92d   : > { %3617 = vmatmul.mubr.bf16.vlgmr.msra.gmra.mxu1 %v2931_v50 }
 0x92e   : > { %3709 = vmatprep.mubr.bf16.mxu1 %v8681_v19 }
 0x935   : > { %v5089_v2 = vpop.eup %5088 }
 0x9ed   : > { %v3618_v12 = vpop.f32.mrf.mxu1 }
 0x9ee   : > { %v3627_v23 = vmul.f32 %v5087_v35, %v3618_v12 }
 0x9ef   : > { %v3620_v9 = vpop.f32.mrf.mxu1 }
 0x9f0   : > { %v3635_v33 = vpack.c.bf16 %v3627_v23, %v8682_v27  ;;  %v3628_v52 = vmul.f32 %v5089_v2, %v3620_v9 }
 0x9f1   : > { %v3622_v54 = vpop.f32.mrf.mxu1 }
 0x9f2   : > { %v3636_v13 = vpack.c.bf16 %v3628_v52, %v8683_v56 }
 0x9f3   : > { %v3623_v31 = vpop.f32.mrf.mxu1 }
 0x9f4   : > { %3689 = vmatprep.subr.bf16.mxu1 %v3636_v13 }
 0x9f5   : > { %3690 = vmatpush1.bf16.msra.mxu1 %v3635_v33 }
 0x9f6   : > { %3691 = vmatprep.subr.bf16.mxu1 %v8686_v44 }
 0x9f9   : > { %3692 = vmatpush1.bf16.msra.mxu1 %v8689_v60 }
 0x9fc   : > { %4469 = vmatmul.mubr.msk.bf16.vlgmr.msra.gmra.mxu1 %vm699_vm0, %v4552_v11 }
 0x9fd   : > { %3719 = vmatprep.mubr.bf16.mxu1 %v8681_v19 }
 0xa04   : > { %4470 = vmatmul.mubr.msk.bf16.gmra.mxu1 %vm699_vm0, %v4553_v8 }
 0xa05   : > { %3950 = vmatprep.mubr.bf16.mxu1 %v8681_v19 }
 0xabc   : > { %v3711_v5 = vpop.f32.mrf.mxu1 }
 0xabd   : > { %v3712_v51 = vadd.f32 %v3711_v5, %v3644_v37 }
 0xabe   : > { %v3713_v48 = vpop.f32.mrf.mxu1 }
 0xabf   : > { %v3714_v0 = vadd.f32 %v3713_v48, %v3644_v37  ;;  %v7981_v18 = vadd.f32 %v5127_v25, %v3712_v51 }
 0xac0   : > { %v3715_v16 = vpop.f32.mrf.mxu1 }
 0xac1   : > { %v3716_v17 = vadd.f32 %v3715_v16, %v3649_v15  ;;  %v7990_v29 = vadd.f32 %v5130_v46, %v3714_v0 }
 0xac2   : > { %v3717_v20 = vpop.f32.mrf.mxu1 }
 0xac3   : > { %v3718_v42 = vadd.f32 %v3717_v20, %v3649_v15  ;;  %v7978_v53 = vadd.f32 %v5126_v62, %v3716_v17 }
 0xac4   : > { %v3721_v61 = vpop.f32.mrf.mxu1 }
 0xac5   : > { %v3722_v59 = vadd.f32 %v3721_v61, %v3654_v3  ;;  %v7984_v34 = vadd.f32 %v5128_v36, %v3718_v42  ;;  %v3746_v32 = vadd.f32 %v7978_v53, %v7981_v18 }
 0xac6   : > { %v3723_v4 = vpop.f32.mrf.mxu1 }
 0xac7   : > { %v7987_v63 = vadd.f32 %v5129_v1, %v3722_v59  ;;  %v3724_v21 = vadd.f32 %v3723_v4, %v3654_v3  ;;  %v3755_v41 = vadd.f32 %v7984_v34, %v7990_v29 }
 0xac8   : > { %v3725_v10 = vpop.f32.mrf.mxu1 }
 0xac9   : > { %v7995_v43 = vadd.f32 %v5131_v30, %v3724_v21  ;;  %v3726_v50 = vadd.f32 %v3725_v10, %v3659_v49  ;;  %v3747_v57 = vadd.f32 %v3746_v32, %v7987_v63 }
 0xaca   : > { %v3727_v40 = vpop.f32.mrf.mxu1 }
 0xacb   : > { %v8001_v38 = vadd.f32 %v5132_v55, %v3726_v50  ;;  %v3728_v26 = vadd.f32 %v3727_v40, %v3659_v49  ;;  %v3756_v24 = vadd.f32 %v3755_v41, %v7995_v43 }
 0xacd   : > { %v3748_v47 = vadd.f32 %v3747_v57, %v8001_v38  ;;  %v8006_v45 = vadd.f32 %v5133_v7, %v3728_v26  ;;  %v3827_v7 = vpop.permute.xlu0 %3826 }
 0xacf   : > { %v3749_v6 = vrot.slane %v3748_v47, 4  ;;  %v3757_v22 = vadd.f32 %v3756_v24, %v8006_v45 }
 0xad1   : > { %v3750_v35 = vadd.f32 %v3749_v6, %v3748_v47  ;;  %v3758_v12 = vrot.slane %v3757_v22, 4  ;;  %v3832_v47 = vpop.permute.xlu1 %3831 }
 0xad3   : > { %v3751_v23 = vrot.slane %v3750_v35, 2  ;;  %v3759_v2 = vadd.f32 %v3758_v12, %v3757_v22  ;;  %v3855_v22 = vpop.permute.xlu0 %3854 }
 0xad5   : > { %v3752_v9 = vadd.f32 %v3751_v23, %v3750_v35  ;;  %v3760_v27 = vrot.slane %v3759_v2, 2  ;;  %v3860_v6 = vpop.permute.xlu1 %3859 }
 0xad7   : > { %v3753_v33 = vrot.slane %v3752_v9, 1  ;;  %v3761_v52 = vadd.f32 %v3760_v27, %v3759_v2  ;;  %v3817_v23 = vpop.permute.xlu0 %3816 }
 0xad9   : > { %v3754_v54 = vadd.f32 %v3753_v33, %v3752_v9  ;;  %v3762_v56 = vrot.slane %v3761_v52, 1  ;;  %v3822_v12 = vpop.permute.xlu1 %3821 }
 0xadb   : > { %v3764_v13 = vmul.f32 0.03125, %v3754_v54  ;;  %v3763_v31 = vadd.f32 %v3762_v56, %v3761_v52 }
 0xadd   : > { %v3766_v14 = vsub.f32 %v7981_v18, %v3764_v13  ;;  %v3768_v58 = vsub.f32 %v7978_v53, %v3764_v13  ;;  %v3770_v44 = vsub.f32 %v7987_v63, %v3764_v13  ;;  %v3765_v11 = vmul.f32 0.03125, %v3763_v31 }
 0xade   : > { %v3772_v28 = vsub.f32 %v8001_v38, %v3764_v13 }
 0xadf   : > { %v3774_v39 = vmul.f32 %v3766_v14, %v3766_v14  ;;  %v3776_v60 = vmul.f32 %v3768_v58, %v3768_v58  ;;  %v3767_v8 = vsub.f32 %v7990_v29, %v3765_v11  ;;  %v3769_v37 = vsub.f32 %v7984_v34, %v3765_v11 }
 0xae0   : > { %v3771_v5 = vsub.f32 %v7995_v43, %v3765_v11  ;;  %v3778_v48 = vmul.f32 %v3770_v44, %v3770_v44  ;;  %v3773_v16 = vsub.f32 %v8006_v45, %v3765_v11  ;;  %v3780_v51 = vmul.f32 %v3772_v28, %v3772_v28 }
 0xae1   : > { %v3782_v15 = vadd.f32 %v3776_v60, %v3774_v39  ;;  %v3775_v17 = vmul.f32 %v3767_v8, %v3767_v8  ;;  %v3777_v20 = vmul.f32 %v3769_v37, %v3769_v37 }
 0xae2   : > { %v3779_v3 = vmul.f32 %v3771_v5, %v3771_v5  ;;  %v3781_v62 = vmul.f32 %v3773_v16, %v3773_v16 }
 0xae3   : > { %v3783_v42 = vadd.f32 %v3782_v15, %v3778_v48  ;;  %v3791_v61 = vadd.f32 %v3777_v20, %v3775_v17  ;;  %v3850_v20 = vpop.permute.xlu1 %3849 }
 0xae5   : > { %v3784_v0 = vadd.f32 %v3783_v42, %v3780_v51  ;;  %v3792_v59 = vadd.f32 %v3791_v61, %v3779_v3  ;;  %v3845_v51 = vpop.permute.xlu0 %3844 }
 0xae7   : > { %v3785_v4 = vrot.slane %v3784_v0, 4  ;;  %v3793_v25 = vadd.f32 %v3792_v59, %v3781_v62 }
 0xae9   : > { %v3786_v36 = vadd.f32 %v3785_v4, %v3784_v0  ;;  %v3794_v1 = vrot.slane %v3793_v25, 4  ;;  %v4554_v4 = vld [vmem:[%s8254_s9] sm:$0xff]  }
 0xaeb   : > { %v3787_v21 = vrot.slane %v3786_v36, 2  ;;  %v3795_v49 = vadd.f32 %v3794_v1, %v3793_v25  ;;  %v4555_v25 = vld [vmem:[%s8254_s9 + $0x8] sm:$0xff]   ;;  %v3900_v1 = vpop.permute.xlu1 %3899 }
 0xaed   : > { %v3788_v10 = vadd.f32 %v3787_v21, %v3786_v36  ;;  %v3796_v46 = vrot.slane %v3795_v49, 2  ;;  %v3895_v36 = vpop.permute.xlu0 %3894 }
 0xaef   : > { %v3789_v32 = vrot.slane %v3788_v10, 1  ;;  %v3797_v30 = vadd.f32 %v3796_v46, %v3795_v49 }
 0xaf1   : > { %v3790_v50 = vadd.f32 %v3789_v32, %v3788_v10  ;;  %v3798_v40 = vrot.slane %v3797_v30, 1  ;;  %v3885_v21 = vpop.permute.xlu0 %3884 }
 0xaf3   : > { %v3800_v41 = vmul.f32 0.03125, %v3790_v50  ;;  %v3799_v57 = vadd.f32 %v3798_v40, %v3797_v30  ;;  %v3890_v40 = vpop.permute.xlu1 %3889 }
 0xaf5   : > { %v3802_v55 = vadd.f32 1e-05, %v3800_v41  ;;  %v3801_v26 = vmul.f32 0.03125, %v3799_v57 }
 0xaf7   : > { %5090 = vrsqrt.f32 %v3802_v55  ;;  %v3803_v24 = vadd.f32 1e-05, %v3801_v26 }
 0xaf9   : > { %5092 = vrsqrt.f32 %v3803_v24 }
 0xb04   : > { %v5091_v35 = vpop.eup %5090 }
 0xb05   : > { %v3812_v2 = vmul.f32 %v5091_v35, %v3772_v28  ;;  %v3810_v9 = vmul.f32 %v5091_v35, %v3770_v44  ;;  %v3806_v54 = vmul.f32 %v5091_v35, %v3766_v14  ;;  %v3808_v56 = vmul.f32 %v5091_v35, %v3768_v58 }
 0xb06   : > { %v5093_v27 = vpop.eup %5092 }
 0xb07   : > { %v3840_v33 = vmul.f32 %v3832_v47, %v3812_v2  ;;  %v3838_v52 = vmul.f32 %v3827_v7, %v3810_v9  ;;  %v3813_v13 = vmul.f32 %v5093_v27, %v3773_v16  ;;  %v3811_v31 = vmul.f32 %v5093_v27, %v3771_v5 }
 0xb08   : > { %v3807_v11 = vmul.f32 %v5093_v27, %v3767_v8  ;;  %v3809_v39 = vmul.f32 %v5093_v27, %v3769_v37  ;;  %v3834_v61 = vmul.f32 %v3817_v23, %v3806_v54  ;;  %v3836_v28 = vmul.f32 %v3822_v12, %v3808_v56 }
 0xb09   : > { %v3839_v60 = vmul.f32 %v3827_v7, %v3811_v31  ;;  %v3841_v48 = vmul.f32 %v3832_v47, %v3813_v13  ;;  %v3866_v42 = vadd.f32 %v3855_v22, %v3838_v52  ;;  %v3868_v3 = vadd.f32 %v3860_v6, %v3840_v33 }
 0xb0a   : > { %v3835_v15 = vmul.f32 %v3817_v23, %v3807_v11  ;;  %v3837_v17 = vmul.f32 %v3822_v12, %v3809_v39  ;;  %v3862_v16 = vadd.f32 %v3845_v51, %v3834_v61  ;;  %v3864_v5 = vadd.f32 %v3850_v20, %v3836_v28 }
 0xb0b   : > { %v3867_v44 = vadd.f32 %v3855_v22, %v3839_v60  ;;  %v3869_v0 = vadd.f32 %v3860_v6, %v3841_v48  ;;  %v3876_v58 = vpack.c.bf16 %v3868_v3, %v3866_v42 }
 0xb0c   : > { %v3863_v62 = vadd.f32 %v3845_v51, %v3835_v15  ;;  %v3865_v59 = vadd.f32 %v3850_v20, %v3837_v17  ;;  %v3874_v37 = vpack.c.bf16 %v3864_v5, %v3862_v16 }
 0xb0d   : > { %v3877_v14 = vpack.c.bf16 %v3869_v0, %v3867_v44 }
 0xb0e   : > { %v3875_v8 = vpack.c.bf16 %v3865_v59, %v3863_v62 }
 0xb0f   : > { %3930 = vmatprep.subr.bf16.mxu1 %v3877_v14 }
 0xb10   : > { %3931 = vmatpush1.bf16.msra.mxu1 %v3876_v58 }
 0xb11   : > { %3932 = vmatprep.subr.bf16.mxu1 %v3875_v8 }
 0xb14   : > { %3933 = vmatpush1.bf16.msra.mxu1 %v3874_v37 }
 0xb17   : > { %4473 = vmatmul.mubr.msk.bf16.vlgmr.msra.gmra.mxu1 %vm699_vm0, %v4554_v4 }
 0xb18   : > { %3960 = vmatprep.mubr.bf16.mxu1 %v8681_v19 }
 0xb1f   : > { %4474 = vmatmul.mubr.msk.bf16.gmra.mxu1 %vm699_vm0, %v4555_v25 }
 0xb20   : > { %4267 = vmatprep.mubr.bf16.mxu1 %v8681_v19 }
 0xbd7   : > { %v3952_v49 = vpop.f32.mrf.mxu1 }
 0xbd8   : > { %v8027_v10 = vadd.f32 %v3952_v49, %v3885_v21 }
 0xbd9   : > { %v3954_v46 = vpop.f32.mrf.mxu1 }
 0xbda   : > { %v8030_v32 = vmul.f32 0.70710677, %v8027_v10  ;;  %v8032_v30 = vadd.f32 %v3954_v46, %v3885_v21 }
 0xbdb   : > { %v3956_v50 = vpop.f32.mrf.mxu1 }
 0xbdc   : > { %v8035_v41 = vand.u32 2147483647, %v8030_v32  ;;  %v8038_v57 = vmul.f32 0.70710677, %v8032_v30  ;;  %v8040_v55 = vadd.f32 %v3956_v50, %v3890_v40  ;;  %vm4139_vm3 = vcmp.ge.f32.partialorder %v8030_v32, 0.0 }
 0xbdd   : > { %v3958_v26 = vpop.f32.mrf.mxu1 }
 0xbde   : > { %v3987_v24 = vmul.f32 0.3275911, %v8035_v41  ;;  %v3980_v47 = vand.u32 2147483647, %v8038_v57  ;;  %v8045_v7 = vmul.f32 0.70710677, %v8040_v55  ;;  %v8047_v6 = vadd.f32 %v3958_v26, %v3890_v40 }
 0xbdf   : > { %v3962_v22 = vpop.f32.mrf.mxu1  ;;  %v4091_v25 = vsub.f32 0.0, %v8035_v41  ;;  %vm4140_vm8 = vcmp.ge.f32.partialorder %v8038_v57, 0.0 }
 0xbe0   : > { %v3995_v35 = vadd.f32 1.0, %v3987_v24  ;;  %v3988_v12 = vmul.f32 0.3275911, %v3980_v47  ;;  %v8050_v23 = vand.u32 2147483647, %v8045_v7  ;;  %v8057_v54 = vadd.f32 %v3962_v22, %v3895_v36 }
 0xbe1   : > { %v8053_v2 = vmul.f32 0.70710677, %v8047_v6  ;;  %v3964_v9 = vpop.f32.mrf.mxu1  ;;  %v4092_v8 = vsub.f32 0.0, %v3980_v47  ;;  %vm4141_vm9 = vcmp.ge.f32.partialorder %v8045_v7, 0.0 }
 0xbe2   : > { %5094 = vrcp.f32 %v3995_v35  ;;  %v3996_v27 = vadd.f32 1.0, %v3988_v12  ;;  %v3989_v33 = vmul.f32 0.3275911, %v8050_v23  ;;  %v8059_v56 = vadd.f32 %v3964_v9, %v3895_v36 }
 0xbe3   : > { %v3982_v52 = vand.u32 2147483647, %v8053_v2  ;;  %v3966_v11 = vpop.f32.mrf.mxu1  ;;  %v8062_v39 = vmul.f32 0.70710677, %v8057_v54  ;;  %v4100_v24 = vmul.f32 %v4092_v8, %v3980_v47  ;;  %v4099_v12 = vmul.f32 %v4091_v25, %v8035_v41 }
 0xbe4   : > { %5096 = vrcp.f32 %v3996_v27  ;;  %v3997_v13 = vadd.f32 1.0, %v3989_v33  ;;  %v8065_v48 = vmul.f32 0.70710677, %v8059_v56  ;;  %v8069_v20 = vadd.f32 %v3966_v11, %v3900_v1 }
 0xbe5   : > { %v3990_v31 = vmul.f32 0.3275911, %v3982_v52  ;;  %v3983_v15 = vand.u32 2147483647, %v8062_v39  ;;  %v3968_v51 = vpop.f32.mrf.mxu1  ;;  %v4094_v21 = vsub.f32 0.0, %v3982_v52  ;;  %vm4142_vm4 = vcmp.ge.f32.partialorder %v8053_v2, 0.0 }
 0xbe6   : > { %5098 = vrcp.f32 %v3997_v13  ;;  %v3984_v17 = vand.u32 2147483647, %v8065_v48  ;;  %v8072_v61 = vmul.f32 0.70710677, %v8069_v20  ;;  %v8074_v44 = vadd.f32 %v3968_v51, %v3900_v1 }
 0xbe7   : > { %v3998_v60 = vadd.f32 1.0, %v3990_v31  ;;  %v3991_v42 = vmul.f32 0.3275911, %v3983_v15  ;;  %v4095_v50 = vsub.f32 0.0, %v3983_v15  ;;  %v4093_v13 = vsub.f32 0.0, %v8050_v23 }
 0xbe8   : > { %v3992_v3 = vmul.f32 0.3275911, %v3984_v17  ;;  %v3985_v62 = vand.u32 2147483647, %v8072_v61  ;;  %v8078_v59 = vmul.f32 0.70710677, %v8074_v44  ;;  %v4102_v31 = vmul.f32 %v4094_v21, %v3982_v52 }
 0xbe9   : > { %5100 = vrcp.f32 %v3998_v60  ;;  %v3999_v28 = vadd.f32 1.0, %v3991_v42  ;;  %v4096_v35 = vsub.f32 0.0, %v3984_v17  ;;  %v4103_v51 = vmul.f32 %v4095_v50, %v3983_v15 }
 0xbea   : > { %v4000_v0 = vadd.f32 1.0, %v3992_v3  ;;  %v3993_v58 = vmul.f32 0.3275911, %v3985_v62  ;;  %v8084_v5 = vand.u32 2147483647, %v8078_v59  ;;  %v4101_v8 = vmul.f32 %v4093_v13, %v8050_v23 }
 0xbeb   : > { %5102 = vrcp.f32 %v3999_v28  ;;  %v4109_v42 = vmul.f32 1.442695, %v4100_v24  ;;  %v4104_v28 = vmul.f32 %v4096_v35, %v3984_v17  ;;  %v4107_v41 = vmul.f32 1.442695, %v4099_v12 }
 0xbec   : > { %5104 = vrcp.f32 %v4000_v0  ;;  %v4001_v37 = vadd.f32 1.0, %v3993_v58  ;;  %v3994_v36 = vmul.f32 0.3275911, %v8084_v5  ;;  %v4097_v25 = vsub.f32 0.0, %v3985_v62 }
 0xbed   : > { %v4115_v21 = vmul.f32 1.442695, %v4103_v51  ;;  %v4117_v50 = vmul.f32 1.442695, %v4104_v28  ;;  %v4098_v24 = vsub.f32 0.0, %v8084_v5  ;;  %vm4143_vm5 = vcmp.ge.f32.partialorder %v8062_v39, 0.0 }
 0xbee   : > { %5106 = vrcp.f32 %v4001_v37  ;;  %v4002_v40 = vadd.f32 1.0, %v3994_v36  ;;  %v4113_v37 = vmul.f32 1.442695, %v4102_v31  ;;  %v4105_v12 = vmul.f32 %v4097_v25, %v3985_v62 }
 0xbef   : > { %v8080_v14 = vpop.eup %5094  ;;  %v4106_v62 = vmul.f32 %v4098_v24, %v8084_v5  ;;  %vm4144_vm6 = vcmp.ge.f32.partialorder %v8065_v48, 0.0  ;;  %vm4145_vm7 = vcmp.ge.f32.partialorder %v8072_v61, 0.0  ;;  %vm4146_vm10 = vcmp.ge.f32.partialorder %v8078_v59, 0.0 }
 0xbf0   : > { %v4019_v16 = vmul.f32 1.0614054, %v8080_v14  ;;  %5108 = vrcp.f32 %v4002_v40 }
 0xbf1   : > { %v8086_v4 = vpop.eup %5096  ;;  %5110 = vpow2.f32 %v4109_v42 }
 0xbf2   : > { %v4020_v1 = vmul.f32 1.0614054, %v8086_v4  ;;  %v4475_v46 = vadd.f32 -1.4531521, %v4019_v16  ;;  %5112 = vpow2.f32 %v4113_v37 }
 0xbf3   : > { %v8091_v49 = vpop.eup %5098  ;;  %5114 = vpow2.f32 %v4115_v21 }
 0xbf4   : > { %v4476_v26 = vadd.f32 -1.4531521, %v4020_v1  ;;  %v4021_v22 = vmul.f32 1.0614054, %v8091_v49  ;;  %v4035_v11 = vmul.f32 %v8080_v14, %v4475_v46  ;;  %5116 = vpow2.f32 %v4117_v50 }
 0xbf5   : > { %v4121_v50 = vmul.f32 1.442695, %v4106_v62 }
 0xbf6   : > { %v8095_v9 = vpop.eup %5100  ;;  %v4036_v27 = vmul.f32 %v8086_v4, %v4476_v26  ;;  %v4477_v33 = vadd.f32 -1.4531521, %v4021_v22  ;;  %v4043_v36 = vadd.f32 1.4214138, %v4035_v11  ;;  %v4111_v22 = vmul.f32 1.442695, %v4101_v8 }
 0xbf7   : > { %v4022_v60 = vmul.f32 1.0614054, %v8095_v9  ;;  %v4119_v8 = vmul.f32 1.442695, %v4105_v12 }
 0xbf8   : > { %v4044_v47 = vadd.f32 1.4214138, %v4036_v27  ;;  %v4037_v3 = vmul.f32 %v8091_v49, %v4477_v33  ;;  %v8102_v58 = vpop.eup %5102  ;;  %v4051_v33 = vmul.f32 %v8080_v14, %v4043_v36  ;;  %5118 = vpow2.f32 %v4111_v22 }
 0xbf9   : > { %v4478_v0 = vadd.f32 -1.4531521, %v4022_v60  ;;  %v8105_v52 = vpop.eup %5104  ;;  %v4023_v15 = vmul.f32 1.0614054, %v8102_v58  ;;  %5120 = vpow2.f32 %v4107_v41 }
 0xbfa   : > { %v4045_v16 = vadd.f32 1.4214138, %v4037_v3  ;;  %v4052_v46 = vmul.f32 %v8086_v4, %v4044_v47  ;;  %v4024_v17 = vmul.f32 1.0614054, %v8105_v52  ;;  %v4483_v37 = vadd.f32 -0.28449672, %v4051_v33 }
 0xbfb   : > { %v4038_v1 = vmul.f32 %v8095_v9, %v4478_v0  ;;  %v4479_v23 = vadd.f32 -1.4531521, %v4023_v15  ;;  %v8113_v27 = vpop.eup %5106  ;;  %5122 = vpow2.f32 %v4119_v8 }
 0xbfc   : > { %v4053_v40 = vmul.f32 %v8091_v49, %v4045_v16  ;;  %v4480_v35 = vadd.f32 -1.4531521, %v4024_v17  ;;  %v4484_v11 = vadd.f32 -0.28449672, %v4052_v46  ;;  %v4025_v51 = vmul.f32 1.0614054, %v8113_v27 }
 0xbfd   : > { %v4046_v26 = vadd.f32 1.4214138, %v4038_v1  ;;  %v4039_v31 = vmul.f32 %v8102_v58, %v4479_v23  ;;  %v8121_v28 = vpop.eup %5108  ;;  %v4067_v24 = vmul.f32 %v8080_v14, %v4483_v37  ;;  %5124 = vpow2.f32 %v4121_v50 }
 0xbfe   : > { %v4040_v60 = vmul.f32 %v8105_v52, %v4480_v35  ;;  %v4485_v47 = vadd.f32 -0.28449672, %v4053_v40  ;;  %v4481_v16 = vadd.f32 -1.4531521, %v4025_v51  ;;  %v4026_v1 = vmul.f32 1.0614054, %v8121_v28 }
 0xbff   : > { %v4054_v13 = vmul.f32 %v8095_v9, %v4046_v26  ;;  %v4047_v3 = vadd.f32 1.4214138, %v4039_v31  ;;  %v4068_v15 = vmul.f32 %v8086_v4, %v4484_v11 }
 0xc00   : > { %v4048_v0 = vadd.f32 1.4214138, %v4040_v60  ;;  %v4041_v46 = vmul.f32 %v8113_v27, %v4481_v16  ;;  %v4069_v5 = vmul.f32 %v8091_v49, %v4485_v47  ;;  %v4482_v35 = vadd.f32 -1.4531521, %v4026_v1 }
 0xc01   : > { %v4486_v42 = vadd.f32 -0.28449672, %v4054_v13  ;;  %v4055_v36 = vmul.f32 %v8102_v58, %v4047_v3  ;;  %v4076_v12 = vadd.f32 0.2548296, %v4068_v15  ;;  %v5111_v13 = vpop.eup %5110  ;;  %v4075_v3 = vadd.f32 0.2548296, %v4067_v24 }
 0xc02   : > { %v4056_v21 = vmul.f32 %v8105_v52, %v4048_v0  ;;  %v4049_v23 = vadd.f32 1.4214138, %v4041_v46  ;;  %v4077_v31 = vadd.f32 0.2548296, %v4069_v5  ;;  %v4042_v60 = vmul.f32 %v8121_v28, %v4482_v35 }
 0xc03   : > { %v4070_v25 = vmul.f32 %v8095_v9, %v4486_v42  ;;  %v4487_v17 = vadd.f32 -0.28449672, %v4055_v36  ;;  %v5113_v42 = vpop.eup %5112  ;;  %v4084_v8 = vmul.f32 %v8086_v4, %v4076_v12 }
 0xc04   : > { %v4488_v26 = vadd.f32 -0.28449672, %v4056_v21  ;;  %v4057_v41 = vmul.f32 %v8113_v27, %v4049_v23  ;;  %v5115_v16 = vpop.eup %5114  ;;  %v4085_v1 = vmul.f32 %v8091_v49, %v4077_v31 }
 0xc05   : > { %v4078_v40 = vadd.f32 0.2548296, %v4070_v25  ;;  %v4071_v22 = vmul.f32 %v8102_v58, %v4487_v17  ;;  %v4050_v25 = vadd.f32 1.4214138, %v4042_v60  ;;  %v5117_v36 = vpop.eup %5116  ;;  %v4083_v17 = vmul.f32 %v8080_v14, %v4075_v3 }
 0xc06   : > { %v4072_v33 = vmul.f32 %v8105_v52, %v4488_v26  ;;  %v4489_v0 = vadd.f32 -0.28449672, %v4057_v41  ;;  %v5119_v5 = vpop.eup %5118  ;;  %v4124_v50 = vmul.f32 %v5111_v13, %v4084_v8 }
 0xc07   : > { %v4079_v11 = vadd.f32 0.2548296, %v4071_v22  ;;  %v4086_v51 = vmul.f32 %v8095_v9, %v4078_v40  ;;  %v4058_v46 = vmul.f32 %v8121_v28, %v4050_v25  ;;  %v4125_v4 = vmul.f32 %v5119_v5, %v4085_v1  ;;  %v5121_v23 = vpop.eup %5120 }
 0xc08   : > { %v4080_v47 = vadd.f32 0.2548296, %v4072_v33  ;;  %v4073_v9 = vmul.f32 %v8113_v27, %v4489_v0  ;;  %v5123_v35 = vpop.eup %5122  ;;  %v4123_v12 = vmul.f32 %v5121_v23, %v4083_v17  ;;  %v4132_v31 = vsub.f32 1.0, %v4124_v50 }
 0xc09   : > { %v4087_v62 = vmul.f32 %v8102_v58, %v4079_v11  ;;  %v4126_v15 = vmul.f32 %v5113_v42, %v4086_v51  ;;  %v4490_v26 = vadd.f32 -0.28449672, %v4058_v46  ;;  %v4133_v60 = vsub.f32 1.0, %v4125_v4 }
 0xc0a   : > { %v4088_v37 = vmul.f32 %v8105_v52, %v4080_v47  ;;  %v4081_v40 = vadd.f32 0.2548296, %v4073_v9  ;;  %v5125_v42 = vpop.eup %5124  ;;  %v4131_v3 = vsub.f32 1.0, %v4123_v12  ;;  %v4168_v17 = vmul.f32 0.5, %v8059_v56 }
 0xc0b   : > { %v4127_v58 = vmul.f32 %v5115_v16, %v4087_v62  ;;  %v4134_v52 = vsub.f32 1.0, %v4126_v15  ;;  %v4074_v49 = vmul.f32 %v8121_v28, %v4490_v26  ;;  %v4149_v8 = vsub.f32 0.0, %v4133_v60 }
 0xc0c   : > { %v4128_v21 = vmul.f32 %v5117_v36, %v4088_v37  ;;  %v4089_v22 = vmul.f32 %v8113_v27, %v4081_v40  ;;  %v4148_v27 = vsub.f32 0.0, %v4132_v31  ;;  %v4147_v1 = vsub.f32 0.0, %v4131_v3 }
 0xc0d   : > { %v4135_v33 = vsub.f32 1.0, %v4127_v58  ;;  %v4082_v41 = vadd.f32 0.2548296, %v4074_v49  ;;  %v4150_v14 = vsub.f32 0.0, %v4134_v52  ;;  %v4157_v39 = vsel %vm4141_vm9, %v4133_v60, %v4149_v8 }
 0xc0e   : > { %v4136_v24 = vsub.f32 1.0, %v4128_v21  ;;  %v4129_v11 = vmul.f32 %v5123_v35, %v4089_v22  ;;  %v4156_v2 = vsel %vm4140_vm8, %v4132_v31, %v4148_v27  ;;  %v4166_v21 = vmul.f32 0.5, %v8047_v6 }
 0xc0f   : > { %v4090_v47 = vmul.f32 %v8121_v28, %v4082_v41  ;;  %v4151_v62 = vsub.f32 0.0, %v4135_v33  ;;  %v4158_v37 = vsel %vm4142_vm4, %v4134_v52, %v4150_v14  ;;  %v4169_v58 = vmul.f32 0.5, %v8069_v20 }
 0xc10   : > { %v4152_v51 = vsub.f32 0.0, %v4136_v24  ;;  %v4137_v13 = vsub.f32 1.0, %v4129_v11  ;;  %v4174_v5 = vadd.f32 1.0, %v4158_v37  ;;  %v4155_v57 = vsel %vm4139_vm3, %v4131_v3, %v4147_v1  ;;  %v4556_v11 = vld [vmem:[%s8256_s11] sm:$0xff]  }
 0xc11   : > { %v4130_v16 = vmul.f32 %v5125_v42, %v4090_v47  ;;  %v4159_v15 = vsel %vm4143_vm5, %v4135_v33, %v4151_v62  ;;  %v4172_v7 = vadd.f32 1.0, %v4156_v2  ;;  %v4170_v40 = vmul.f32 0.5, %v8074_v44  ;;  %v4207_v47 = vpop.permute.xlu1 %4206 }
 0xc12   : > { %v4153_v0 = vsub.f32 0.0, %v4137_v13  ;;  %v4160_v25 = vsel %vm4144_vm6, %v4136_v24, %v4152_v51  ;;  %v4175_v61 = vadd.f32 1.0, %v4159_v15  ;;  %v4173_v26 = vadd.f32 1.0, %v4157_v39 }
 0xc13   : > { %v4138_v36 = vsub.f32 1.0, %v4130_v16  ;;  %v4176_v48 = vadd.f32 1.0, %v4160_v25  ;;  %v4167_v4 = vmul.f32 0.5, %v8057_v54  ;;  %v4164_v52 = vmul.f32 0.5, %v8032_v30 }
 0xc14   : > { %v4161_v28 = vsel %vm4145_vm7, %v4137_v13, %v4153_v0  ;;  %v4182_v59 = vmul.f32 %v4174_v5, %v4166_v21  ;;  %v4171_v56 = vadd.f32 1.0, %v4155_v57  ;;  %v4165_v20 = vmul.f32 0.5, %v8040_v55  ;;  %v4202_v55 = vpop.permute.xlu0 %4201 }
 0xc15   : > { %v4177_v9 = vadd.f32 1.0, %v4161_v28  ;;  %v4154_v46 = vsub.f32 0.0, %v4138_v36  ;;  %v4184_v24 = vmul.f32 %v4176_v48, %v4168_v17  ;;  %v4183_v49 = vmul.f32 %v4175_v61, %v4167_v4 }
 0xc16   : > { %v4180_v35 = vmul.f32 %v4172_v7, %v4164_v52  ;;  %v4163_v12 = vmul.f32 0.5, %v8027_v10  ;;  %v4181_v44 = vmul.f32 %v4173_v26, %v4165_v20  ;;  %v4557_v10 = vld [vmem:[%s8256_s11 + $0x8] sm:$0xff]  }
 0xc17   : > { %v4162_v50 = vsel %vm4146_vm10, %v4138_v36, %v4154_v46  ;;  %v4185_v23 = vmul.f32 %v4177_v9, %v4169_v58  ;;  %v4217_v36 = vpop.permute.xlu1 %4216 }
 0xc18   : > { %v4178_v6 = vadd.f32 1.0, %v4162_v50  ;;  %v4192_v54 = vpack.c.bf16 %v4182_v59, %v4180_v35  ;;  %v4179_v31 = vmul.f32 %v4171_v56, %v4163_v12  ;;  %v4212_v0 = vpop.permute.xlu0 %4211 }
 0xc19   : > { %v4193_v33 = vpack.c.bf16 %v4185_v23, %v4183_v49 }
 0xc1a   : > { %v4186_v22 = vmul.f32 %v4178_v6, %v4170_v40  ;;  %v4191_v30 = vpack.c.bf16 %v4181_v44, %v4179_v31 }
 0xc1c   : > { %v4194_v32 = vpack.c.bf16 %v4186_v22, %v4184_v24 }
 0xc1e   : > { %4247 = vmatprep.subr.bf16.mxu1 %v4194_v32 }
 0xc1f   : > { %4248 = vmatpush1.bf16.msra.mxu1 %v4193_v33 }
 0xc20   : > { %4249 = vmatprep.subr.bf16.mxu1 %v4192_v54 }
 0xc23   : > { %4250 = vmatpush1.bf16.msra.mxu1 %v4191_v30 }
 0xc26   : > { %4493 = vmatmul.mubr.msk.bf16.vlgmr.msra.gmra.mxu1 %vm699_vm0, %v4556_v11 }
 0xc27   : > { %4277 = vmatprep.mubr.bf16.mxu1 %v8681_v19 }
 0xc2e   : > { %4494 = vmatmul.mubr.msk.bf16.gmra.mxu1 %vm699_vm0, %v4557_v10 }
 0xce6   : > { %v4269_v41 = vpop.f32.mrf.mxu1 }
 0xce7   : > { %v4270_v60 = vadd.f32 %v4269_v41, %v4202_v55 }
 0xce8   : > { %v4271_v14 = vpop.f32.mrf.mxu1 }
 0xce9   : > { %v4288_v51 = vadd.f32 %v4270_v60, %v7981_v18  ;;  %v4272_v13 = vadd.f32 %v4271_v14, %v4202_v55 }
 0xcea   : > { %v4273_v42 = vpop.f32.mrf.mxu1 }
 0xceb   : > { %4296 = vst [vmem:[%s8177_s22] sm:$0xff] %v4288_v51  ;;  %v4289_v19 = vadd.f32 %v4272_v13, %v7990_v29  ;;  %v4274_v3 = vadd.f32 %v4273_v42, %v4207_v47 }
 0xcec   : > { %v4275_v62 = vpop.f32.mrf.mxu1 }
 0xced   : > { %4297 = vst [vmem:[%s8177_s22 + $0x8] sm:$0xff] %v4289_v19  ;;  %v4290_v27 = vadd.f32 %v4274_v3, %v7978_v53  ;;  %v4276_v18 = vadd.f32 %v4275_v62, %v4207_v47 }
 0xcee   : > { %v4279_v16 = vpop.f32.mrf.mxu1 }
 0xcef   : > { %4298 = vst [vmem:[%s8177_s22 + $0x10] sm:$0xff] %v4290_v27  ;;  %v4291_v8 = vadd.f32 %v4276_v18, %v7984_v34  ;;  %v4280_v37 = vadd.f32 %v4279_v16, %v4212_v0 }
 0xcf0   : > { %v4281_v25 = vpop.f32.mrf.mxu1 }
 0xcf1   : > { %4299 = vst [vmem:[%s8177_s22 + $0x18] sm:$0xff] %v4291_v8  ;;  %v4292_v29 = vadd.f32 %v4280_v37, %v7987_v63  ;;  %v4282_v28 = vadd.f32 %v4281_v25, %v4212_v0 }
 0xcf2   : > { %v4283_v53 = vpop.f32.mrf.mxu1 }
 0xcf3   : > { %4300 = vst [vmem:[%s8177_s22 + $0x20] sm:$0xff] %v4292_v29  ;;  %v4293_v1 = vadd.f32 %v4282_v28, %v7995_v43  ;;  %v4284_v15 = vadd.f32 %v4283_v53, %v4217_v36 }
 0xcf4   : > { %v4285_v2 = vpop.f32.mrf.mxu1 }
 0xcf5   : > { %4301 = vst [vmem:[%s8177_s22 + $0x28] sm:$0xff] %v4293_v1  ;;  %v4294_v34 = vadd.f32 %v4284_v15, %v8001_v38  ;;  %v4286_v21 = vadd.f32 %v4285_v2, %v4217_v36 }
 0xcf7   : > { %4302 = vst [vmem:[%s8177_s22 + $0x30] sm:$0xff] %v4294_v34  ;;  %v4295_v63 = vadd.f32 %v4286_v21, %v8006_v45 }
 0xcf9   : > { %4303 = vst [vmem:[%s8177_s22 + $0x38] sm:$0xff] %v4295_v63 }
 0xcfa   : > { %5147 = shalt.err (!%p5144_p3)
}
 0xcfb   : > { %s5148_s20 = scalar_lea.hbm %s8196_s21, 1024  ;;  %s5152_s14 = scalar_lea.hbm %s8258_s13, 2048 }
 0xcfc   : > { %p5149_p4 = scmp.ne.s32.totalorder %s8196_s21, %s5148_s20  ;;  %p5153_p9 = scmp.lt.s32.totalorder %s8196_s21, %s8258_s13 }
 0xcfd   : > { %p5154_p10 = scmp.lt.s32.totalorder %s5152_s14, %s5148_s20 }
 0xcfe   : > { %p5150_p7 = pnand %p5149_p4, %p5308_p5 }
 0xcff   : > { %p5155_p11 = por %p5154_p10, %p5153_p9 }
 0xd00   : > { %p5151_p8 = pneg %p5150_p7 }
 0xd02   : > { %p5156_p12 = pnand %p5155_p11, %p5151_p8 }
 0xd04   : > { %5159 = shalt.err (!%p5156_p12)
}
 0xd05   : > { %s5198_s23 = smov 256   ;;  %s5199_s30 = smov 16  }
 0xd06   : > { %4502 = dma.vmem_to_hbm [thread:$0]  (%p5308_p5), %s8198_s27, 1024, %s8196_s21, %s8205_s29, %s5198_s23, %s5198_s23, %s5199_s30  }
 0xd07 PF: > { %p4508_p13 = scmp.ge.s32.totalorder %s5194_s28, 2  ;;  %s4333_s15 = sand.u32 1, %s5182_s25  }
 0xd08   : > { %s4334_s20 = scalar_lea.sflag [#allocation3], %s4333_s15 }
 0xd09   : > { %p4505_p0 = pnand %p4508_p13, %p5312_p6 }
 0xd0b   : > { %p4506_p1 = pneg %p4505_p0 }
 0xd0d   : > { %5177 = dma.done.wait (%p4506_p1), %s4334_s20, 1024  }
 0xd0e   : > { %5179 = vsyncadd (%p4506_p1), %s4334_s20, 4294966272  ;;  %s8690_s28 = sld [smem:[#allocation6_spill]]  ;;  %s8693_s25 = smov %s5186_s26 }
 0xd0f   : > { %s8691_s22 = sld [smem:[#allocation5_spill]] }
 0xd10   : > { %s8692_s27 = sld [smem:[#allocation7_spill]] }
 0xd14   : > { %p23_p2 = scmp.ge.s32.totalorder %s8690_s28, 4  }
 0xd15   : > { %s8694_s26 = smov %s8691_s22 }
 0xd16   :  { %25 = sbr.rel (!%p23_p2) target bundleno = 3 (0x3), region = 107 }
 0xd1b   :  { %4339 = vsyncpa [#allocation3], 1 }
 0xd1c   :  { %4341 = vsyncpa [#allocation3 + $0x1], 1 }

</bundles_post_ra>
